<compile_context>
chip_gen: v5e
topology: v5e:2x2
jax: 0.10.0
libtpu: 0.0.40
codegen_flags: <defaults>
</compile_context>

<pallas_src>
import functools

import numpy as np
import jax
import jax.numpy as jnp
from jax.experimental import pallas as pl
from jax.experimental.pallas import tpu as pltpu


# ------------------------------ fused VGG kernel ------------------------------
def _vgg_fused_kernel(*refs, n_conv, nb):
    x_ref = refs[0]
    conv_refs = refs[1:1 + 4 * n_conv]                  # (wb, bias, S, T) per layer
    g_ref = refs[1 + 4 * n_conv]                        # flatten row-gather
    fw1, fb1, fw2, fb2, fw3, fb3 = refs[2 + 4 * n_conv: 8 + 4 * n_conv]
    n_inputs = 8 + 4 * n_conv
    o_ref = refs[n_inputs]
    act_refs = refs[n_inputs + 1:]                      # VMEM scratch, n_conv-1 of them

    def load_rows(in_ref, i, start, h):
        # Rows [start, start+h) of image i's padded activation block.
        if in_ref.ndim == 3:                            # network input block (nb, Hp, XC)
            return in_ref[i, start:start + h, :]
        hp = in_ref.shape[0] // nb                      # 2-D scratch (nb*Hp, XC)
        return in_ref[i * hp + start: i * hp + start + h, :]

    def conv_pool(in_ref, wb_ref, bias_ref, s_ref, t_ref):
        h = s_ref.shape[2] // nb                        # rows per image pre-pool
        # --- conv: 3 matmuls with the batch folded into M (bf16 x bf16 -> f32) ---
        y = None
        for dy in range(3):
            xs = jnp.concatenate(
                [load_rows(in_ref, i, dy, h) for i in range(nb)], axis=0)   # (nb*h, XC) bf16
            d = jnp.dot(xs, wb_ref[dy], preferred_element_type=jnp.float32)
            y = d if y is None else y + d
        # --- bias + ReLU (f32 epilogue), then one bf16 cast for the pooling dots ---
        y = jnp.maximum(y + bias_ref[...], 0.0).astype(jnp.bfloat16)        # (nb*h, W*Cout)
        # --- 2x2/stride-2 max-pool: row selection first (block-diag over the nb
        #     images, inserts the top/bottom zero halo), then column selection
        #     (inserts the left/right zero halo).  0/1 bf16 matrices -> exact picks.
        r = jnp.maximum(
            jnp.dot(s_ref[0], y, preferred_element_type=jnp.float32),
            jnp.dot(s_ref[1], y, preferred_element_type=jnp.float32)).astype(jnp.bfloat16)
        p = jnp.maximum(
            jnp.dot(r, t_ref[0], preferred_element_type=jnp.float32),
            jnp.dot(r, t_ref[1], preferred_element_type=jnp.float32))
        return p.astype(jnp.bfloat16)                   # (nb*Hout_padded, ncol)

    cur = x_ref
    last = None
    for li in range(n_conv):
        wb_ref, bias_ref, s_ref, t_ref = conv_refs[4 * li: 4 * li + 4]
        p = conv_pool(cur, wb_ref, bias_ref, s_ref, t_ref)
        if li < n_conv - 1:
            act_refs[li][...] = p                       # bf16 activation stays in VMEM
            cur = act_refs[li]
        else:
            last = p                                    # (nb*Hout_last, Wout_last*Cout_last)

    # --- flatten(start_dim=1) in (h, w, c) order: tiny 0/1 row-gather dots + lane concat.
    hout = g_ref.shape[0]
    flat = jnp.concatenate(
        [jnp.dot(g_ref[hh], last, preferred_element_type=jnp.float32) for hh in range(hout)],
        axis=-1).astype(jnp.bfloat16)                   # (nb, feat)

    # --- classifier: Linear-ReLU-Linear-ReLU-Linear (Dropout = identity at inference).
    h1 = jnp.maximum(
        jnp.dot(flat, fw1[...], preferred_element_type=jnp.float32) + fb1[...], 0.0)
    h2 = jnp.maximum(
        jnp.dot(h1.astype(jnp.bfloat16), fw2[...], preferred_element_type=jnp.float32)
        + fb2[...], 0.0)
    logits = (jnp.dot(h2.astype(jnp.bfloat16), fw3[...], preferred_element_type=jnp.float32)
              + fb3[...])
    o_ref[0] = logits.astype(o_ref.dtype)


# ----------------------------- VGG forward wrapper ----------------------------
def vgg_forward(x_nchw, kp):
    n_conv = len(kp["convs"])
    nb = kp["gsel"].shape[1]                            # images per grid step (static)
    N = x_nchw.shape[0]
    assert N % nb == 0, (N, nb)
    steps = N // nb
    num_classes = kp["fc3"][0].shape[1]

    # NCHW -> NHWC, add the 1-pixel zero halo for the first conv, fold (w, c)
    # onto lanes, carry activations in bf16.
    x = jnp.transpose(x_nchw, (0, 2, 3, 1))
    x = jnp.pad(x, ((0, 0), (1, 1), (1, 1), (0, 0)))
    x = x.reshape(N, x.shape[1], x.shape[2] * x.shape[3]).astype(jnp.bfloat16)
    Hp0, XC0 = x.shape[1], x.shape[2]

    inputs = [x]
    for layer in kp["convs"]:
        inputs += [layer["wb"], layer["bias"], layer["S"], layer["T"]]
    inputs += [kp["gsel"]]
    for key_fc in ("fc1", "fc2", "fc3"):
        inputs += list(kp[key_fc])

    def _const_map(ndim):
        return lambda n: (0,) * ndim

    in_specs = [pl.BlockSpec((nb, Hp0, XC0), lambda n: (n, 0, 0))]
    for a in inputs[1:]:
        in_specs.append(pl.BlockSpec(a.shape, _const_map(a.ndim)))

    # Inter-layer activations for one grid step, kept in VMEM (bf16).
    scratch = []
    for layer in kp["convs"][:-1]:
        rows = layer["S"].shape[1]                      # nb * (Hout + 2)
        cols = layer["T"].shape[2]                      # (Wout + 2) * Cout
        scratch.append(pltpu.VMEM((rows, cols), jnp.bfloat16))

    # Advisory cost estimate.
    flops = 0
    for layer in kp["convs"]:
        _, xc, wcout = layer["wb"].shape
        _, srows, scols = layer["S"].shape
        ncol = layer["T"].shape[2]
        flops += 2 * 3 * scols * xc * wcout             # conv (M = nb*H = scols)
        flops += 2 * 2 * srows * scols * wcout          # row-pool selection dots
        flops += 2 * 2 * srows * wcout * ncol           # column-pool selection dots
    feat, hidden1 = kp["fc1"][0].shape
    hidden2 = kp["fc2"][0].shape[1]
    flops += 2 * nb * (feat * hidden1 + hidden1 * hidden2 + hidden2 * num_classes)
    flops *= steps
    bytes_accessed = sum(int(np.prod(a.shape)) * a.dtype.itemsize for a in inputs) \
        + N * num_classes * 4

    kernel = functools.partial(_vgg_fused_kernel, n_conv=n_conv, nb=nb)
    out = pl.pallas_call(
        kernel,
        out_shape=jax.ShapeDtypeStruct((steps, nb, num_classes), jnp.float32),
        grid=(steps,),
        in_specs=in_specs,
        out_specs=pl.BlockSpec((1, nb, num_classes), lambda n: (n, 0, 0)),
        scratch_shapes=scratch,
        compiler_params=pltpu.CompilerParams(
            dimension_semantics=("parallel",)),
        cost_estimate=pl.CostEstimate(flops=int(flops), transcendentals=0,
                                      bytes_accessed=int(bytes_accessed)),
    )(*inputs)
    return out.reshape(N, num_classes)


# ----------------------------- parameter preparation --------------------------
def init_params_torch(key, in_ch=3, cfg=(8, 16, 32), spatial=32,
                      hidden=64, num_classes=10):
    """PyTorch-layout params: conv (Cout,Cin,3,3), linear (out,in)."""
    tp = {"convs": [], "fcs": []}
    c_prev = in_ch
    for c in cfg:
        key, kw, kb = jax.random.split(key, 3)
        w = jax.random.normal(kw, (c, c_prev, 3, 3), jnp.float32) / jnp.sqrt(9.0 * c_prev)
        b = 0.01 * jax.random.normal(kb, (c,), jnp.float32)
        tp["convs"].append((w, b))
        c_prev = c
    s = spatial // (2 ** len(cfg))
    feat = c_prev * s * s
    for fi, fo in [(feat, hidden), (hidden, hidden), (hidden, num_classes)]:
        key, kw, kb = jax.random.split(key, 3)
        w = jax.random.normal(kw, (fo, fi), jnp.float32) / jnp.sqrt(float(fi))
        b = 0.01 * jax.random.normal(kb, (fo,), jnp.float32)
        tp["fcs"].append((w, b))
    return tp


def prepare_params(tp, spatial, nb):
    """Kernel-layout params: bf16 banded conv weights, bf16 0/1 pooling selection
    matrices (row pool block-diagonal over the nb images of a grid step, zero halo
    fused), tiled f32 biases, bf16 flatten gather + classifier weights."""
    kp = {"convs": []}
    n_conv = len(tp["convs"])
    size = spatial
    for li, (wt, bt) in enumerate(tp["convs"]):
        wt_np, bt_np = np.asarray(wt), np.asarray(bt)
        Cout, Cin = wt_np.shape[0], wt_np.shape[1]
        H = W = size
        Wp = W + 2
        Ho, Wo = H // 2, W // 2
        pad = 1 if li < n_conv - 1 else 0               # last conv layer: no halo
        Hop = Ho + 2 * pad
        ncol = (Wo + 2 * pad) * Cout
        assert H % 2 == 0 and W % 2 == 0

        # Banded weights: y[h, w*Cout+co] = sum_dy x2d[h+dy, :] @ wb[dy][:, w*Cout+co]
        wb = np.zeros((3, Wp * Cin, W * Cout), np.float32)
        for dy in range(3):
            for dx in range(3):
                blk = wt_np[:, :, dy, dx].T             # (Cin, Cout)
                for w_ in range(W):
                    wb[dy, (w_ + dx) * Cin:(w_ + dx + 1) * Cin,
                       w_ * Cout:(w_ + 1) * Cout] = blk
        bias = np.tile(bt_np, W).reshape(1, W * Cout)

        # Row pool (even / odd h), block-diagonal over the nb images + row halo.
        S = np.zeros((2, nb * Hop, nb * H), np.float32)
        for a in range(2):
            for i in range(nb):
                for ho in range(Ho):
                    S[a, i * Hop + ho + pad, i * H + 2 * ho + a] = 1.0
        # Column pool (even / odd w) + left/right zero halo on the lane axis.
        T = np.zeros((2, W * Cout, ncol), np.float32)
        for b_ in range(2):
            for wo in range(Wo):
                for c in range(Cout):
                    T[b_, (2 * wo + b_) * Cout + c, (wo + pad) * Cout + c] = 1.0

        kp["convs"].append(dict(
            wb=jnp.asarray(wb, jnp.bfloat16),
            bias=jnp.asarray(bias, jnp.float32),
            S=jnp.asarray(S, jnp.bfloat16),
            T=jnp.asarray(T, jnp.bfloat16)))
        size = Ho

    # Flatten row-gather: for output row h, pick row i*Hout+h of the last conv
    # output for image i; lane-concatenated over h -> (h, w, c) feature order.
    Ho_last = size
    G = np.zeros((Ho_last, nb, nb * Ho_last), np.float32)
    for h in range(Ho_last):
        for i in range(nb):
            G[h, i, i * Ho_last + h] = 1.0
    kp["gsel"] = jnp.asarray(G, jnp.bfloat16)

    # Classifier: fc1 rows permuted from torch's (c, h, w) flatten order to our
    # (h, w, c) order; fc2/fc3 transposed to (in, out). Weights pre-cast to bf16.
    (w1, b1), (w2, b2), (w3, b3) = tp["fcs"]
    hidden = w1.shape[0]
    Cl = tp["convs"][-1][0].shape[0]
    w1_eff = jnp.transpose(w1.reshape(hidden, Cl, Ho_last, Ho_last),
                           (2, 3, 1, 0)).reshape(Ho_last * Ho_last * Cl, hidden)
    kp["fc1"] = (w1_eff.astype(jnp.bfloat16), b1.reshape(1, -1).astype(jnp.float32))
    kp["fc2"] = (jnp.transpose(w2).astype(jnp.bfloat16), b2.reshape(1, -1).astype(jnp.float32))
    kp["fc3"] = (jnp.transpose(w3).astype(jnp.bfloat16), b3.reshape(1, -1).astype(jnp.float32))
    return kp


# ----------------------------- Pure-JAX reference (torch semantics) -----------
def reference_forward(x_nchw, tp):
    x = jnp.transpose(x_nchw, (0, 2, 3, 1))
    for wt, bt in tp["convs"]:
        w_hwio = jnp.transpose(wt, (2, 3, 1, 0))
        x = jax.lax.conv_general_dilated(
            x, w_hwio, window_strides=(1, 1), padding="SAME",
            dimension_numbers=("NHWC", "HWIO", "NHWC"))
        x = jax.nn.relu(x + bt)
        x = jax.lax.reduce_window(x, -jnp.inf, jax.lax.max,
                                  (1, 2, 2, 1), (1, 2, 2, 1), "VALID")
    x = jnp.transpose(x, (0, 3, 1, 2)).reshape(x.shape[0], -1)  # torch flatten(NCHW)
    for i, (w, b) in enumerate(tp["fcs"]):
        x = x @ w.T + b
        if i < 2:
            x = jax.nn.relu(x)
    return x


if __name__ == "__main__":
    key = jax.random.PRNGKey(0)
    key, kx, kp_ = jax.random.split(key, 3)
    # NCHW input like PyTorch. nb=4 images per grid step -> conv M = nb*H = 128,
    # and 2 grid steps so both v7x TensorCores are used.
    N, nb = 8, 4
    x = jax.random.normal(kx, (N, 3, 32, 32), jnp.float32)
    tparams = init_params_torch(kp_, in_ch=3, cfg=(8, 16, 32), spatial=32,
                                hidden=64, num_classes=10)
    kparams = prepare_params(tparams, spatial=32, nb=nb)

    out = jax.jit(vgg_forward)(x, kparams)
    out = jax.block_until_ready(out)

    ref = reference_forward(x, tparams)
    assert out.shape == (N, 10), out.shape
    assert bool(jnp.all(jnp.isfinite(out)))
    err = float(jnp.max(jnp.abs(out - ref)))
    assert jnp.allclose(out, ref, rtol=4e-2, atol=4e-2), ("max abs err", err)
    print("KERNEL_OK")
</pallas_src>

<mosaic_0001>
module attributes {stable_mosaic.version = 11 : i64} {
  func.func @_vgg_fused_kernel(%arg0: i32, %arg1: memref<4x34x102xbf16, #tpu.memory_space<vmem>>, %arg2: memref<3x102x256xbf16, #tpu.memory_space<vmem>>, %arg3: memref<1x256xf32, #tpu.memory_space<vmem>>, %arg4: memref<2x72x128xbf16, #tpu.memory_space<vmem>>, %arg5: memref<2x256x144xbf16, #tpu.memory_space<vmem>>, %arg6: memref<3x144x256xbf16, #tpu.memory_space<vmem>>, %arg7: memref<1x256xf32, #tpu.memory_space<vmem>>, %arg8: memref<2x40x64xbf16, #tpu.memory_space<vmem>>, %arg9: memref<2x256x160xbf16, #tpu.memory_space<vmem>>, %arg10: memref<3x160x256xbf16, #tpu.memory_space<vmem>>, %arg11: memref<1x256xf32, #tpu.memory_space<vmem>>, %arg12: memref<2x16x32xbf16, #tpu.memory_space<vmem>>, %arg13: memref<2x256x128xbf16, #tpu.memory_space<vmem>>, %arg14: memref<4x4x16xbf16, #tpu.memory_space<vmem>>, %arg15: memref<512x64xbf16, #tpu.memory_space<vmem>>, %arg16: memref<1x64xf32, #tpu.memory_space<vmem>>, %arg17: memref<64x64xbf16, #tpu.memory_space<vmem>>, %arg18: memref<1x64xf32, #tpu.memory_space<vmem>>, %arg19: memref<64x10xbf16, #tpu.memory_space<vmem>>, %arg20: memref<1x10xf32, #tpu.memory_space<vmem>>, %arg21: memref<1x4x10xf32, #tpu.memory_space<vmem>>, %arg22: memref<72x144xbf16, #tpu.memory_space<vmem>>, %arg23: memref<40x160xbf16, #tpu.memory_space<vmem>>) attributes {dimension_semantics = [#tpu.dimension_semantics<parallel>], iteration_bounds = array<i64: 2>, scalar_prefetch = 0 : i64, scratch_operands = 2 : i64, tpu.core_type = #tpu.core_type<tc>, window_params = [{transform_indices = @transform_0, window_bounds = array<i64: 4, 34, 102>}, {pipeline_mode = #tpu.pipeline_mode<synchronous>, transform_indices = @transform_1, window_bounds = array<i64: 3, 102, 256>}, {pipeline_mode = #tpu.pipeline_mode<synchronous>, transform_indices = @transform_2, window_bounds = array<i64: 1, 256>}, {pipeline_mode = #tpu.pipeline_mode<synchronous>, transform_indices = @transform_3, window_bounds = array<i64: 2, 72, 128>}, {pipeline_mode = #tpu.pipeline_mode<synchronous>, transform_indices = @transform_4, window_bounds = array<i64: 2, 256, 144>}, {pipeline_mode = #tpu.pipeline_mode<synchronous>, transform_indices = @transform_5, window_bounds = array<i64: 3, 144, 256>}, {pipeline_mode = #tpu.pipeline_mode<synchronous>, transform_indices = @transform_6, window_bounds = array<i64: 1, 256>}, {pipeline_mode = #tpu.pipeline_mode<synchronous>, transform_indices = @transform_7, window_bounds = array<i64: 2, 40, 64>}, {pipeline_mode = #tpu.pipeline_mode<synchronous>, transform_indices = @transform_8, window_bounds = array<i64: 2, 256, 160>}, {pipeline_mode = #tpu.pipeline_mode<synchronous>, transform_indices = @transform_9, window_bounds = array<i64: 3, 160, 256>}, {pipeline_mode = #tpu.pipeline_mode<synchronous>, transform_indices = @transform_10, window_bounds = array<i64: 1, 256>}, {pipeline_mode = #tpu.pipeline_mode<synchronous>, transform_indices = @transform_11, window_bounds = array<i64: 2, 16, 32>}, {pipeline_mode = #tpu.pipeline_mode<synchronous>, transform_indices = @transform_12, window_bounds = array<i64: 2, 256, 128>}, {pipeline_mode = #tpu.pipeline_mode<synchronous>, transform_indices = @transform_13, window_bounds = array<i64: 4, 4, 16>}, {pipeline_mode = #tpu.pipeline_mode<synchronous>, transform_indices = @transform_14, window_bounds = array<i64: 512, 64>}, {pipeline_mode = #tpu.pipeline_mode<synchronous>, transform_indices = @transform_15, window_bounds = array<i64: 1, 64>}, {pipeline_mode = #tpu.pipeline_mode<synchronous>, transform_indices = @transform_16, window_bounds = array<i64: 64, 64>}, {pipeline_mode = #tpu.pipeline_mode<synchronous>, transform_indices = @transform_17, window_bounds = array<i64: 1, 64>}, {pipeline_mode = #tpu.pipeline_mode<synchronous>, transform_indices = @transform_18, window_bounds = array<i64: 64, 10>}, {pipeline_mode = #tpu.pipeline_mode<synchronous>, transform_indices = @transform_19, window_bounds = array<i64: 1, 10>}, {transform_indices = @transform_20, window_bounds = array<i64: 1, 4, 10>}]} {
    %c0 = arith.constant 0 : index
    %c0_0 = arith.constant 0 : index
    %c0_1 = arith.constant 0 : index
    %0 = vector.load %arg1[%c0, %c0_0, %c0_1] : memref<4x34x102xbf16, #tpu.memory_space<vmem>>, vector<1x32x102xbf16>
    %1 = vector.shape_cast %0 : vector<1x32x102xbf16> to vector<32x102xbf16>
    %c1 = arith.constant 1 : index
    %c0_2 = arith.constant 0 : index
    %c0_3 = arith.constant 0 : index
    %2 = vector.load %arg1[%c1, %c0_2, %c0_3] : memref<4x34x102xbf16, #tpu.memory_space<vmem>>, vector<1x32x102xbf16>
    %3 = vector.shape_cast %2 : vector<1x32x102xbf16> to vector<32x102xbf16>
    %c2 = arith.constant 2 : index
    %c0_4 = arith.constant 0 : index
    %c0_5 = arith.constant 0 : index
    %4 = vector.load %arg1[%c2, %c0_4, %c0_5] : memref<4x34x102xbf16, #tpu.memory_space<vmem>>, vector<1x32x102xbf16>
    %5 = vector.shape_cast %4 : vector<1x32x102xbf16> to vector<32x102xbf16>
    %c3 = arith.constant 3 : index
    %c0_6 = arith.constant 0 : index
    %c0_7 = arith.constant 0 : index
    %6 = vector.load %arg1[%c3, %c0_6, %c0_7] : memref<4x34x102xbf16, #tpu.memory_space<vmem>>, vector<1x32x102xbf16>
    %7 = vector.shape_cast %6 : vector<1x32x102xbf16> to vector<32x102xbf16>
    %8 = tpu.concatenate %1, %3, %5, %7 in 0 : vector<32x102xbf16>, vector<32x102xbf16>, vector<32x102xbf16>, vector<32x102xbf16> -> vector<128x102xbf16>
    %c0_8 = arith.constant 0 : index
    %c0_9 = arith.constant 0 : index
    %c0_10 = arith.constant 0 : index
    %9 = vector.load %arg2[%c0_8, %c0_9, %c0_10] : memref<3x102x256xbf16, #tpu.memory_space<vmem>>, vector<1x102x256xbf16>
    %10 = vector.shape_cast %9 : vector<1x102x256xbf16> to vector<102x256xbf16>
    %cst = arith.constant dense<0.000000e+00> : vector<128x256xf32>
    %11 = tpu.matmul %8, %10, %cst {dimension_numbers = #tpu.dot_dimension_numbers<[1], [0], [0], [1], [0, 0, 1, 1], [], []>} : vector<128x102xbf16>, vector<102x256xbf16>, vector<128x256xf32> -> vector<128x256xf32>
    %c0_11 = arith.constant 0 : index
    %c1_12 = arith.constant 1 : index
    %c0_13 = arith.constant 0 : index
    %12 = vector.load %arg1[%c0_11, %c1_12, %c0_13] : memref<4x34x102xbf16, #tpu.memory_space<vmem>>, vector<1x32x102xbf16>
    %13 = vector.shape_cast %12 : vector<1x32x102xbf16> to vector<32x102xbf16>
    %c1_14 = arith.constant 1 : index
    %c1_15 = arith.constant 1 : index
    %c0_16 = arith.constant 0 : index
    %14 = vector.load %arg1[%c1_14, %c1_15, %c0_16] : memref<4x34x102xbf16, #tpu.memory_space<vmem>>, vector<1x32x102xbf16>
    %15 = vector.shape_cast %14 : vector<1x32x102xbf16> to vector<32x102xbf16>
    %c2_17 = arith.constant 2 : index
    %c1_18 = arith.constant 1 : index
    %c0_19 = arith.constant 0 : index
    %16 = vector.load %arg1[%c2_17, %c1_18, %c0_19] : memref<4x34x102xbf16, #tpu.memory_space<vmem>>, vector<1x32x102xbf16>
    %17 = vector.shape_cast %16 : vector<1x32x102xbf16> to vector<32x102xbf16>
    %c3_20 = arith.constant 3 : index
    %c1_21 = arith.constant 1 : index
    %c0_22 = arith.constant 0 : index
    %18 = vector.load %arg1[%c3_20, %c1_21, %c0_22] : memref<4x34x102xbf16, #tpu.memory_space<vmem>>, vector<1x32x102xbf16>
    %19 = vector.shape_cast %18 : vector<1x32x102xbf16> to vector<32x102xbf16>
    %20 = tpu.concatenate %13, %15, %17, %19 in 0 : vector<32x102xbf16>, vector<32x102xbf16>, vector<32x102xbf16>, vector<32x102xbf16> -> vector<128x102xbf16>
    %c1_23 = arith.constant 1 : index
    %c0_24 = arith.constant 0 : index
    %c0_25 = arith.constant 0 : index
    %21 = vector.load %arg2[%c1_23, %c0_24, %c0_25] : memref<3x102x256xbf16, #tpu.memory_space<vmem>>, vector<1x102x256xbf16>
    %22 = vector.shape_cast %21 : vector<1x102x256xbf16> to vector<102x256xbf16>
    %cst_26 = arith.constant dense<0.000000e+00> : vector<128x256xf32>
    %23 = tpu.matmul %20, %22, %cst_26 {dimension_numbers = #tpu.dot_dimension_numbers<[1], [0], [0], [1], [0, 0, 1, 1], [], []>} : vector<128x102xbf16>, vector<102x256xbf16>, vector<128x256xf32> -> vector<128x256xf32>
    %24 = arith.addf %11, %23 : vector<128x256xf32>
    %c0_27 = arith.constant 0 : index
    %c2_28 = arith.constant 2 : index
    %c0_29 = arith.constant 0 : index
    %25 = vector.load %arg1[%c0_27, %c2_28, %c0_29] : memref<4x34x102xbf16, #tpu.memory_space<vmem>>, vector<1x32x102xbf16>
    %26 = vector.shape_cast %25 : vector<1x32x102xbf16> to vector<32x102xbf16>
    %c1_30 = arith.constant 1 : index
    %c2_31 = arith.constant 2 : index
    %c0_32 = arith.constant 0 : index
    %27 = vector.load %arg1[%c1_30, %c2_31, %c0_32] : memref<4x34x102xbf16, #tpu.memory_space<vmem>>, vector<1x32x102xbf16>
    %28 = vector.shape_cast %27 : vector<1x32x102xbf16> to vector<32x102xbf16>
    %c2_33 = arith.constant 2 : index
    %c2_34 = arith.constant 2 : index
    %c0_35 = arith.constant 0 : index
    %29 = vector.load %arg1[%c2_33, %c2_34, %c0_35] : memref<4x34x102xbf16, #tpu.memory_space<vmem>>, vector<1x32x102xbf16>
    %30 = vector.shape_cast %29 : vector<1x32x102xbf16> to vector<32x102xbf16>
    %c3_36 = arith.constant 3 : index
    %c2_37 = arith.constant 2 : index
    %c0_38 = arith.constant 0 : index
    %31 = vector.load %arg1[%c3_36, %c2_37, %c0_38] : memref<4x34x102xbf16, #tpu.memory_space<vmem>>, vector<1x32x102xbf16>
    %32 = vector.shape_cast %31 : vector<1x32x102xbf16> to vector<32x102xbf16>
    %33 = tpu.concatenate %26, %28, %30, %32 in 0 : vector<32x102xbf16>, vector<32x102xbf16>, vector<32x102xbf16>, vector<32x102xbf16> -> vector<128x102xbf16>
    %c2_39 = arith.constant 2 : index
    %c0_40 = arith.constant 0 : index
    %c0_41 = arith.constant 0 : index
    %34 = vector.load %arg2[%c2_39, %c0_40, %c0_41] : memref<3x102x256xbf16, #tpu.memory_space<vmem>>, vector<1x102x256xbf16>
    %35 = vector.shape_cast %34 : vector<1x102x256xbf16> to vector<102x256xbf16>
    %cst_42 = arith.constant dense<0.000000e+00> : vector<128x256xf32>
    %36 = tpu.matmul %33, %35, %cst_42 {dimension_numbers = #tpu.dot_dimension_numbers<[1], [0], [0], [1], [0, 0, 1, 1], [], []>} : vector<128x102xbf16>, vector<102x256xbf16>, vector<128x256xf32> -> vector<128x256xf32>
    %37 = arith.addf %24, %36 : vector<128x256xf32>
    %c0_43 = arith.constant 0 : index
    %c0_44 = arith.constant 0 : index
    %38 = vector.load %arg3[%c0_43, %c0_44] : memref<1x256xf32, #tpu.memory_space<vmem>>, vector<1x256xf32>
    %39 = vector.broadcast %38 : vector<1x256xf32> to vector<128x256xf32>
    %40 = arith.addf %37, %39 : vector<128x256xf32>
    %cst_45 = arith.constant 0.000000e+00 : f32
    %41 = vector.broadcast %cst_45 : f32 to vector<128x256xf32>
    %42 = arith.maximumf %40, %41 : vector<128x256xf32>
    %43 = arith.truncf %42 : vector<128x256xf32> to vector<128x256xbf16>
    %c0_46 = arith.constant 0 : index
    %c0_47 = arith.constant 0 : index
    %c0_48 = arith.constant 0 : index
    %44 = vector.load %arg4[%c0_46, %c0_47, %c0_48] : memref<2x72x128xbf16, #tpu.memory_space<vmem>>, vector<1x72x128xbf16>
    %45 = vector.shape_cast %44 : vector<1x72x128xbf16> to vector<72x128xbf16>
    %cst_49 = arith.constant dense<0.000000e+00> : vector<72x256xf32>
    %46 = tpu.matmul %45, %43, %cst_49 {dimension_numbers = #tpu.dot_dimension_numbers<[1], [0], [0], [1], [0, 0, 1, 1], [], []>} : vector<72x128xbf16>, vector<128x256xbf16>, vector<72x256xf32> -> vector<72x256xf32>
    %c1_50 = arith.constant 1 : index
    %c0_51 = arith.constant 0 : index
    %c0_52 = arith.constant 0 : index
    %47 = vector.load %arg4[%c1_50, %c0_51, %c0_52] : memref<2x72x128xbf16, #tpu.memory_space<vmem>>, vector<1x72x128xbf16>
    %48 = vector.shape_cast %47 : vector<1x72x128xbf16> to vector<72x128xbf16>
    %cst_53 = arith.constant dense<0.000000e+00> : vector<72x256xf32>
    %49 = tpu.matmul %48, %43, %cst_53 {dimension_numbers = #tpu.dot_dimension_numbers<[1], [0], [0], [1], [0, 0, 1, 1], [], []>} : vector<72x128xbf16>, vector<128x256xbf16>, vector<72x256xf32> -> vector<72x256xf32>
    %50 = arith.maximumf %46, %49 : vector<72x256xf32>
    %51 = arith.truncf %50 : vector<72x256xf32> to vector<72x256xbf16>
    %c0_54 = arith.constant 0 : index
    %c0_55 = arith.constant 0 : index
    %c0_56 = arith.constant 0 : index
    %52 = vector.load %arg5[%c0_54, %c0_55, %c0_56] : memref<2x256x144xbf16, #tpu.memory_space<vmem>>, vector<1x256x144xbf16>
    %53 = vector.shape_cast %52 : vector<1x256x144xbf16> to vector<256x144xbf16>
    %cst_57 = arith.constant dense<0.000000e+00> : vector<72x144xf32>
    %54 = tpu.matmul %51, %53, %cst_57 {dimension_numbers = #tpu.dot_dimension_numbers<[1], [0], [0], [1], [0, 0, 1, 1], [], []>} : vector<72x256xbf16>, vector<256x144xbf16>, vector<72x144xf32> -> vector<72x144xf32>
    %c1_58 = arith.constant 1 : index
    %c0_59 = arith.constant 0 : index
    %c0_60 = arith.constant 0 : index
    %55 = vector.load %arg5[%c1_58, %c0_59, %c0_60] : memref<2x256x144xbf16, #tpu.memory_space<vmem>>, vector<1x256x144xbf16>
    %56 = vector.shape_cast %55 : vector<1x256x144xbf16> to vector<256x144xbf16>
    %cst_61 = arith.constant dense<0.000000e+00> : vector<72x144xf32>
    %57 = tpu.matmul %51, %56, %cst_61 {dimension_numbers = #tpu.dot_dimension_numbers<[1], [0], [0], [1], [0, 0, 1, 1], [], []>} : vector<72x256xbf16>, vector<256x144xbf16>, vector<72x144xf32> -> vector<72x144xf32>
    %58 = arith.maximumf %54, %57 : vector<72x144xf32>
    %59 = arith.truncf %58 : vector<72x144xf32> to vector<72x144xbf16>
    %c0_62 = arith.constant 0 : index
    %c0_63 = arith.constant 0 : index
    %60 = vector.load %arg22[%c0_62, %c0_63] : memref<72x144xbf16, #tpu.memory_space<vmem>>, vector<72x144xbf16>
    tpu.vector_store %arg22[%c0_62, %c0_63], %59 {strides = array<i32>} : memref<72x144xbf16, #tpu.memory_space<vmem>>, vector<72x144xbf16>,
    %c0_64 = arith.constant 0 : index
    %c0_65 = arith.constant 0 : index
    %61 = vector.load %arg22[%c0_64, %c0_65] : memref<72x144xbf16, #tpu.memory_space<vmem>>, vector<16x144xbf16>
    %c18 = arith.constant 18 : index
    %c0_66 = arith.constant 0 : index
    %62 = vector.load %arg22[%c18, %c0_66] : memref<72x144xbf16, #tpu.memory_space<vmem>>, vector<16x144xbf16>
    %c36 = arith.constant 36 : index
    %c0_67 = arith.constant 0 : index
    %63 = vector.load %arg22[%c36, %c0_67] : memref<72x144xbf16, #tpu.memory_space<vmem>>, vector<16x144xbf16>
    %c54 = arith.constant 54 : index
    %c0_68 = arith.constant 0 : index
    %64 = vector.load %arg22[%c54, %c0_68] : memref<72x144xbf16, #tpu.memory_space<vmem>>, vector<16x144xbf16>
    %65 = tpu.concatenate %61, %62, %63, %64 in 0 : vector<16x144xbf16>, vector<16x144xbf16>, vector<16x144xbf16>, vector<16x144xbf16> -> vector<64x144xbf16>
    %c0_69 = arith.constant 0 : index
    %c0_70 = arith.constant 0 : index
    %c0_71 = arith.constant 0 : index
    %66 = vector.load %arg6[%c0_69, %c0_70, %c0_71] : memref<3x144x256xbf16, #tpu.memory_space<vmem>>, vector<1x144x256xbf16>
    %67 = vector.shape_cast %66 : vector<1x144x256xbf16> to vector<144x256xbf16>
    %cst_72 = arith.constant dense<0.000000e+00> : vector<64x256xf32>
    %68 = tpu.matmul %65, %67, %cst_72 {dimension_numbers = #tpu.dot_dimension_numbers<[1], [0], [0], [1], [0, 0, 1, 1], [], []>} : vector<64x144xbf16>, vector<144x256xbf16>, vector<64x256xf32> -> vector<64x256xf32>
    %c1_73 = arith.constant 1 : index
    %c0_74 = arith.constant 0 : index
    %69 = vector.load %arg22[%c1_73, %c0_74] : memref<72x144xbf16, #tpu.memory_space<vmem>>, vector<16x144xbf16>
    %c19 = arith.constant 19 : index
    %c0_75 = arith.constant 0 : index
    %70 = vector.load %arg22[%c19, %c0_75] : memref<72x144xbf16, #tpu.memory_space<vmem>>, vector<16x144xbf16>
    %c37 = arith.constant 37 : index
    %c0_76 = arith.constant 0 : index
    %71 = vector.load %arg22[%c37, %c0_76] : memref<72x144xbf16, #tpu.memory_space<vmem>>, vector<16x144xbf16>
    %c55 = arith.constant 55 : index
    %c0_77 = arith.constant 0 : index
    %72 = vector.load %arg22[%c55, %c0_77] : memref<72x144xbf16, #tpu.memory_space<vmem>>, vector<16x144xbf16>
    %73 = tpu.concatenate %69, %70, %71, %72 in 0 : vector<16x144xbf16>, vector<16x144xbf16>, vector<16x144xbf16>, vector<16x144xbf16> -> vector<64x144xbf16>
    %c1_78 = arith.constant 1 : index
    %c0_79 = arith.constant 0 : index
    %c0_80 = arith.constant 0 : index
    %74 = vector.load %arg6[%c1_78, %c0_79, %c0_80] : memref<3x144x256xbf16, #tpu.memory_space<vmem>>, vector<1x144x256xbf16>
    %75 = vector.shape_cast %74 : vector<1x144x256xbf16> to vector<144x256xbf16>
    %cst_81 = arith.constant dense<0.000000e+00> : vector<64x256xf32>
    %76 = tpu.matmul %73, %75, %cst_81 {dimension_numbers = #tpu.dot_dimension_numbers<[1], [0], [0], [1], [0, 0, 1, 1], [], []>} : vector<64x144xbf16>, vector<144x256xbf16>, vector<64x256xf32> -> vector<64x256xf32>
    %77 = arith.addf %68, %76 : vector<64x256xf32>
    %c2_82 = arith.constant 2 : index
    %c0_83 = arith.constant 0 : index
    %78 = vector.load %arg22[%c2_82, %c0_83] : memref<72x144xbf16, #tpu.memory_space<vmem>>, vector<16x144xbf16>
    %c20 = arith.constant 20 : index
    %c0_84 = arith.constant 0 : index
    %79 = vector.load %arg22[%c20, %c0_84] : memref<72x144xbf16, #tpu.memory_space<vmem>>, vector<16x144xbf16>
    %c38 = arith.constant 38 : index
    %c0_85 = arith.constant 0 : index
    %80 = vector.load %arg22[%c38, %c0_85] : memref<72x144xbf16, #tpu.memory_space<vmem>>, vector<16x144xbf16>
    %c56 = arith.constant 56 : index
    %c0_86 = arith.constant 0 : index
    %81 = vector.load %arg22[%c56, %c0_86] : memref<72x144xbf16, #tpu.memory_space<vmem>>, vector<16x144xbf16>
    %82 = tpu.concatenate %78, %79, %80, %81 in 0 : vector<16x144xbf16>, vector<16x144xbf16>, vector<16x144xbf16>, vector<16x144xbf16> -> vector<64x144xbf16>
    %c2_87 = arith.constant 2 : index
    %c0_88 = arith.constant 0 : index
    %c0_89 = arith.constant 0 : index
    %83 = vector.load %arg6[%c2_87, %c0_88, %c0_89] : memref<3x144x256xbf16, #tpu.memory_space<vmem>>, vector<1x144x256xbf16>
    %84 = vector.shape_cast %83 : vector<1x144x256xbf16> to vector<144x256xbf16>
    %cst_90 = arith.constant dense<0.000000e+00> : vector<64x256xf32>
    %85 = tpu.matmul %82, %84, %cst_90 {dimension_numbers = #tpu.dot_dimension_numbers<[1], [0], [0], [1], [0, 0, 1, 1], [], []>} : vector<64x144xbf16>, vector<144x256xbf16>, vector<64x256xf32> -> vector<64x256xf32>
    %86 = arith.addf %77, %85 : vector<64x256xf32>
    %c0_91 = arith.constant 0 : index
    %c0_92 = arith.constant 0 : index
    %87 = vector.load %arg7[%c0_91, %c0_92] : memref<1x256xf32, #tpu.memory_space<vmem>>, vector<1x256xf32>
    %88 = vector.broadcast %87 : vector<1x256xf32> to vector<64x256xf32>
    %89 = arith.addf %86, %88 : vector<64x256xf32>
    %cst_93 = arith.constant 0.000000e+00 : f32
    %90 = vector.broadcast %cst_93 : f32 to vector<64x256xf32>
    %91 = arith.maximumf %89, %90 : vector<64x256xf32>
    %92 = arith.truncf %91 : vector<64x256xf32> to vector<64x256xbf16>
    %c0_94 = arith.constant 0 : index
    %c0_95 = arith.constant 0 : index
    %c0_96 = arith.constant 0 : index
    %93 = vector.load %arg8[%c0_94, %c0_95, %c0_96] : memref<2x40x64xbf16, #tpu.memory_space<vmem>>, vector<1x40x64xbf16>
    %94 = vector.shape_cast %93 : vector<1x40x64xbf16> to vector<40x64xbf16>
    %cst_97 = arith.constant dense<0.000000e+00> : vector<40x256xf32>
    %95 = tpu.matmul %94, %92, %cst_97 {dimension_numbers = #tpu.dot_dimension_numbers<[1], [0], [0], [1], [0, 0, 1, 1], [], []>} : vector<40x64xbf16>, vector<64x256xbf16>, vector<40x256xf32> -> vector<40x256xf32>
    %c1_98 = arith.constant 1 : index
    %c0_99 = arith.constant 0 : index
    %c0_100 = arith.constant 0 : index
    %96 = vector.load %arg8[%c1_98, %c0_99, %c0_100] : memref<2x40x64xbf16, #tpu.memory_space<vmem>>, vector<1x40x64xbf16>
    %97 = vector.shape_cast %96 : vector<1x40x64xbf16> to vector<40x64xbf16>
    %cst_101 = arith.constant dense<0.000000e+00> : vector<40x256xf32>
    %98 = tpu.matmul %97, %92, %cst_101 {dimension_numbers = #tpu.dot_dimension_numbers<[1], [0], [0], [1], [0, 0, 1, 1], [], []>} : vector<40x64xbf16>, vector<64x256xbf16>, vector<40x256xf32> -> vector<40x256xf32>
    %99 = arith.maximumf %95, %98 : vector<40x256xf32>
    %100 = arith.truncf %99 : vector<40x256xf32> to vector<40x256xbf16>
    %c0_102 = arith.constant 0 : index
    %c0_103 = arith.constant 0 : index
    %c0_104 = arith.constant 0 : index
    %101 = vector.load %arg9[%c0_102, %c0_103, %c0_104] : memref<2x256x160xbf16, #tpu.memory_space<vmem>>, vector<1x256x160xbf16>
    %102 = vector.shape_cast %101 : vector<1x256x160xbf16> to vector<256x160xbf16>
    %cst_105 = arith.constant dense<0.000000e+00> : vector<40x160xf32>
    %103 = tpu.matmul %100, %102, %cst_105 {dimension_numbers = #tpu.dot_dimension_numbers<[1], [0], [0], [1], [0, 0, 1, 1], [], []>} : vector<40x256xbf16>, vector<256x160xbf16>, vector<40x160xf32> -> vector<40x160xf32>
    %c1_106 = arith.constant 1 : index
    %c0_107 = arith.constant 0 : index
    %c0_108 = arith.constant 0 : index
    %104 = vector.load %arg9[%c1_106, %c0_107, %c0_108] : memref<2x256x160xbf16, #tpu.memory_space<vmem>>, vector<1x256x160xbf16>
    %105 = vector.shape_cast %104 : vector<1x256x160xbf16> to vector<256x160xbf16>
    %cst_109 = arith.constant dense<0.000000e+00> : vector<40x160xf32>
    %106 = tpu.matmul %100, %105, %cst_109 {dimension_numbers = #tpu.dot_dimension_numbers<[1], [0], [0], [1], [0, 0, 1, 1], [], []>} : vector<40x256xbf16>, vector<256x160xbf16>, vector<40x160xf32> -> vector<40x160xf32>
    %107 = arith.maximumf %103, %106 : vector<40x160xf32>
    %108 = arith.truncf %107 : vector<40x160xf32> to vector<40x160xbf16>
    %c0_110 = arith.constant 0 : index
    %c0_111 = arith.constant 0 : index
    %109 = vector.load %arg23[%c0_110, %c0_111] : memref<40x160xbf16, #tpu.memory_space<vmem>>, vector<40x160xbf16>
    tpu.vector_store %arg23[%c0_110, %c0_111], %108 {strides = array<i32>} : memref<40x160xbf16, #tpu.memory_space<vmem>>, vector<40x160xbf16>,
    %c0_112 = arith.constant 0 : index
    %c0_113 = arith.constant 0 : index
    %110 = vector.load %arg23[%c0_112, %c0_113] : memref<40x160xbf16, #tpu.memory_space<vmem>>, vector<8x160xbf16>
    %c10 = arith.constant 10 : index
    %c0_114 = arith.constant 0 : index
    %111 = vector.load %arg23[%c10, %c0_114] : memref<40x160xbf16, #tpu.memory_space<vmem>>, vector<8x160xbf16>
    %c20_115 = arith.constant 20 : index
    %c0_116 = arith.constant 0 : index
    %112 = vector.load %arg23[%c20_115, %c0_116] : memref<40x160xbf16, #tpu.memory_space<vmem>>, vector<8x160xbf16>
    %c30 = arith.constant 30 : index
    %c0_117 = arith.constant 0 : index
    %113 = vector.load %arg23[%c30, %c0_117] : memref<40x160xbf16, #tpu.memory_space<vmem>>, vector<8x160xbf16>
    %114 = tpu.concatenate %110, %111, %112, %113 in 0 : vector<8x160xbf16>, vector<8x160xbf16>, vector<8x160xbf16>, vector<8x160xbf16> -> vector<32x160xbf16>
    %c0_118 = arith.constant 0 : index
    %c0_119 = arith.constant 0 : index
    %c0_120 = arith.constant 0 : index
    %115 = vector.load %arg10[%c0_118, %c0_119, %c0_120] : memref<3x160x256xbf16, #tpu.memory_space<vmem>>, vector<1x160x256xbf16>
    %116 = vector.shape_cast %115 : vector<1x160x256xbf16> to vector<160x256xbf16>
    %cst_121 = arith.constant dense<0.000000e+00> : vector<32x256xf32>
    %117 = tpu.matmul %114, %116, %cst_121 {dimension_numbers = #tpu.dot_dimension_numbers<[1], [0], [0], [1], [0, 0, 1, 1], [], []>} : vector<32x160xbf16>, vector<160x256xbf16>, vector<32x256xf32> -> vector<32x256xf32>
    %c1_122 = arith.constant 1 : index
    %c0_123 = arith.constant 0 : index
    %118 = vector.load %arg23[%c1_122, %c0_123] : memref<40x160xbf16, #tpu.memory_space<vmem>>, vector<8x160xbf16>
    %c11 = arith.constant 11 : index
    %c0_124 = arith.constant 0 : index
    %119 = vector.load %arg23[%c11, %c0_124] : memref<40x160xbf16, #tpu.memory_space<vmem>>, vector<8x160xbf16>
    %c21 = arith.constant 21 : index
    %c0_125 = arith.constant 0 : index
    %120 = vector.load %arg23[%c21, %c0_125] : memref<40x160xbf16, #tpu.memory_space<vmem>>, vector<8x160xbf16>
    %c31 = arith.constant 31 : index
    %c0_126 = arith.constant 0 : index
    %121 = vector.load %arg23[%c31, %c0_126] : memref<40x160xbf16, #tpu.memory_space<vmem>>, vector<8x160xbf16>
    %122 = tpu.concatenate %118, %119, %120, %121 in 0 : vector<8x160xbf16>, vector<8x160xbf16>, vector<8x160xbf16>, vector<8x160xbf16> -> vector<32x160xbf16>
    %c1_127 = arith.constant 1 : index
    %c0_128 = arith.constant 0 : index
    %c0_129 = arith.constant 0 : index
    %123 = vector.load %arg10[%c1_127, %c0_128, %c0_129] : memref<3x160x256xbf16, #tpu.memory_space<vmem>>, vector<1x160x256xbf16>
    %124 = vector.shape_cast %123 : vector<1x160x256xbf16> to vector<160x256xbf16>
    %cst_130 = arith.constant dense<0.000000e+00> : vector<32x256xf32>
    %125 = tpu.matmul %122, %124, %cst_130 {dimension_numbers = #tpu.dot_dimension_numbers<[1], [0], [0], [1], [0, 0, 1, 1], [], []>} : vector<32x160xbf16>, vector<160x256xbf16>, vector<32x256xf32> -> vector<32x256xf32>
    %126 = arith.addf %117, %125 : vector<32x256xf32>
    %c2_131 = arith.constant 2 : index
    %c0_132 = arith.constant 0 : index
    %127 = vector.load %arg23[%c2_131, %c0_132] : memref<40x160xbf16, #tpu.memory_space<vmem>>, vector<8x160xbf16>
    %c12 = arith.constant 12 : index
    %c0_133 = arith.constant 0 : index
    %128 = vector.load %arg23[%c12, %c0_133] : memref<40x160xbf16, #tpu.memory_space<vmem>>, vector<8x160xbf16>
    %c22 = arith.constant 22 : index
    %c0_134 = arith.constant 0 : index
    %129 = vector.load %arg23[%c22, %c0_134] : memref<40x160xbf16, #tpu.memory_space<vmem>>, vector<8x160xbf16>
    %c32 = arith.constant 32 : index
    %c0_135 = arith.constant 0 : index
    %130 = vector.load %arg23[%c32, %c0_135] : memref<40x160xbf16, #tpu.memory_space<vmem>>, vector<8x160xbf16>
    %131 = tpu.concatenate %127, %128, %129, %130 in 0 : vector<8x160xbf16>, vector<8x160xbf16>, vector<8x160xbf16>, vector<8x160xbf16> -> vector<32x160xbf16>
    %c2_136 = arith.constant 2 : index
    %c0_137 = arith.constant 0 : index
    %c0_138 = arith.constant 0 : index
    %132 = vector.load %arg10[%c2_136, %c0_137, %c0_138] : memref<3x160x256xbf16, #tpu.memory_space<vmem>>, vector<1x160x256xbf16>
    %133 = vector.shape_cast %132 : vector<1x160x256xbf16> to vector<160x256xbf16>
    %cst_139 = arith.constant dense<0.000000e+00> : vector<32x256xf32>
    %134 = tpu.matmul %131, %133, %cst_139 {dimension_numbers = #tpu.dot_dimension_numbers<[1], [0], [0], [1], [0, 0, 1, 1], [], []>} : vector<32x160xbf16>, vector<160x256xbf16>, vector<32x256xf32> -> vector<32x256xf32>
    %135 = arith.addf %126, %134 : vector<32x256xf32>
    %c0_140 = arith.constant 0 : index
    %c0_141 = arith.constant 0 : index
    %136 = vector.load %arg11[%c0_140, %c0_141] : memref<1x256xf32, #tpu.memory_space<vmem>>, vector<1x256xf32>
    %137 = vector.broadcast %136 : vector<1x256xf32> to vector<32x256xf32>
    %138 = arith.addf %135, %137 : vector<32x256xf32>
    %cst_142 = arith.constant 0.000000e+00 : f32
    %139 = vector.broadcast %cst_142 : f32 to vector<32x256xf32>
    %140 = arith.maximumf %138, %139 : vector<32x256xf32>
    %141 = arith.truncf %140 : vector<32x256xf32> to vector<32x256xbf16>
    %c0_143 = arith.constant 0 : index
    %c0_144 = arith.constant 0 : index
    %c0_145 = arith.constant 0 : index
    %142 = vector.load %arg12[%c0_143, %c0_144, %c0_145] : memref<2x16x32xbf16, #tpu.memory_space<vmem>>, vector<1x16x32xbf16>
    %143 = vector.shape_cast %142 : vector<1x16x32xbf16> to vector<16x32xbf16>
    %cst_146 = arith.constant dense<0.000000e+00> : vector<16x256xf32>
    %144 = tpu.matmul %143, %141, %cst_146 {dimension_numbers = #tpu.dot_dimension_numbers<[1], [0], [0], [1], [0, 0, 1, 1], [], []>} : vector<16x32xbf16>, vector<32x256xbf16>, vector<16x256xf32> -> vector<16x256xf32>
    %c1_147 = arith.constant 1 : index
    %c0_148 = arith.constant 0 : index
    %c0_149 = arith.constant 0 : index
    %145 = vector.load %arg12[%c1_147, %c0_148, %c0_149] : memref<2x16x32xbf16, #tpu.memory_space<vmem>>, vector<1x16x32xbf16>
    %146 = vector.shape_cast %145 : vector<1x16x32xbf16> to vector<16x32xbf16>
    %cst_150 = arith.constant dense<0.000000e+00> : vector<16x256xf32>
    %147 = tpu.matmul %146, %141, %cst_150 {dimension_numbers = #tpu.dot_dimension_numbers<[1], [0], [0], [1], [0, 0, 1, 1], [], []>} : vector<16x32xbf16>, vector<32x256xbf16>, vector<16x256xf32> -> vector<16x256xf32>
    %148 = arith.maximumf %144, %147 : vector<16x256xf32>
    %149 = arith.truncf %148 : vector<16x256xf32> to vector<16x256xbf16>
    %c0_151 = arith.constant 0 : index
    %c0_152 = arith.constant 0 : index
    %c0_153 = arith.constant 0 : index
    %150 = vector.load %arg13[%c0_151, %c0_152, %c0_153] : memref<2x256x128xbf16, #tpu.memory_space<vmem>>, vector<1x256x128xbf16>
    %151 = vector.shape_cast %150 : vector<1x256x128xbf16> to vector<256x128xbf16>
    %cst_154 = arith.constant dense<0.000000e+00> : vector<16x128xf32>
    %152 = tpu.matmul %149, %151, %cst_154 {dimension_numbers = #tpu.dot_dimension_numbers<[1], [0], [0], [1], [0, 0, 1, 1], [], []>} : vector<16x256xbf16>, vector<256x128xbf16>, vector<16x128xf32> -> vector<16x128xf32>
    %c1_155 = arith.constant 1 : index
    %c0_156 = arith.constant 0 : index
    %c0_157 = arith.constant 0 : index
    %153 = vector.load %arg13[%c1_155, %c0_156, %c0_157] : memref<2x256x128xbf16, #tpu.memory_space<vmem>>, vector<1x256x128xbf16>
    %154 = vector.shape_cast %153 : vector<1x256x128xbf16> to vector<256x128xbf16>
    %cst_158 = arith.constant dense<0.000000e+00> : vector<16x128xf32>
    %155 = tpu.matmul %149, %154, %cst_158 {dimension_numbers = #tpu.dot_dimension_numbers<[1], [0], [0], [1], [0, 0, 1, 1], [], []>} : vector<16x256xbf16>, vector<256x128xbf16>, vector<16x128xf32> -> vector<16x128xf32>
    %156 = arith.maximumf %152, %155 : vector<16x128xf32>
    %157 = arith.truncf %156 : vector<16x128xf32> to vector<16x128xbf16>
    %c0_159 = arith.constant 0 : index
    %c0_160 = arith.constant 0 : index
    %c0_161 = arith.constant 0 : index
    %158 = vector.load %arg14[%c0_159, %c0_160, %c0_161] : memref<4x4x16xbf16, #tpu.memory_space<vmem>>, vector<1x4x16xbf16>
    %159 = vector.shape_cast %158 : vector<1x4x16xbf16> to vector<4x16xbf16>
    %cst_162 = arith.constant dense<0.000000e+00> : vector<4x128xf32>
    %160 = tpu.matmul %159, %157, %cst_162 {dimension_numbers = #tpu.dot_dimension_numbers<[1], [0], [0], [1], [0, 0, 1, 1], [], []>} : vector<4x16xbf16>, vector<16x128xbf16>, vector<4x128xf32> -> vector<4x128xf32>
    %c1_163 = arith.constant 1 : index
    %c0_164 = arith.constant 0 : index
    %c0_165 = arith.constant 0 : index
    %161 = vector.load %arg14[%c1_163, %c0_164, %c0_165] : memref<4x4x16xbf16, #tpu.memory_space<vmem>>, vector<1x4x16xbf16>
    %162 = vector.shape_cast %161 : vector<1x4x16xbf16> to vector<4x16xbf16>
    %cst_166 = arith.constant dense<0.000000e+00> : vector<4x128xf32>
    %163 = tpu.matmul %162, %157, %cst_166 {dimension_numbers = #tpu.dot_dimension_numbers<[1], [0], [0], [1], [0, 0, 1, 1], [], []>} : vector<4x16xbf16>, vector<16x128xbf16>, vector<4x128xf32> -> vector<4x128xf32>
    %c2_167 = arith.constant 2 : index
    %c0_168 = arith.constant 0 : index
    %c0_169 = arith.constant 0 : index
    %164 = vector.load %arg14[%c2_167, %c0_168, %c0_169] : memref<4x4x16xbf16, #tpu.memory_space<vmem>>, vector<1x4x16xbf16>
    %165 = vector.shape_cast %164 : vector<1x4x16xbf16> to vector<4x16xbf16>
    %cst_170 = arith.constant dense<0.000000e+00> : vector<4x128xf32>
    %166 = tpu.matmul %165, %157, %cst_170 {dimension_numbers = #tpu.dot_dimension_numbers<[1], [0], [0], [1], [0, 0, 1, 1], [], []>} : vector<4x16xbf16>, vector<16x128xbf16>, vector<4x128xf32> -> vector<4x128xf32>
    %c3_171 = arith.constant 3 : index
    %c0_172 = arith.constant 0 : index
    %c0_173 = arith.constant 0 : index
    %167 = vector.load %arg14[%c3_171, %c0_172, %c0_173] : memref<4x4x16xbf16, #tpu.memory_space<vmem>>, vector<1x4x16xbf16>
    %168 = vector.shape_cast %167 : vector<1x4x16xbf16> to vector<4x16xbf16>
    %cst_174 = arith.constant dense<0.000000e+00> : vector<4x128xf32>
    %169 = tpu.matmul %168, %157, %cst_174 {dimension_numbers = #tpu.dot_dimension_numbers<[1], [0], [0], [1], [0, 0, 1, 1], [], []>} : vector<4x16xbf16>, vector<16x128xbf16>, vector<4x128xf32> -> vector<4x128xf32>
    %170 = tpu.concatenate %160, %163, %166, %169 in 1 : vector<4x128xf32>, vector<4x128xf32>, vector<4x128xf32>, vector<4x128xf32> -> vector<4x512xf32>
    %171 = arith.truncf %170 : vector<4x512xf32> to vector<4x512xbf16>
    %c0_175 = arith.constant 0 : index
    %c0_176 = arith.constant 0 : index
    %172 = vector.load %arg15[%c0_175, %c0_176] : memref<512x64xbf16, #tpu.memory_space<vmem>>, vector<512x64xbf16>
    %cst_177 = arith.constant dense<0.000000e+00> : vector<4x64xf32>
    %173 = tpu.matmul %171, %172, %cst_177 {dimension_numbers = #tpu.dot_dimension_numbers<[1], [0], [0], [1], [0, 0, 1, 1], [], []>} : vector<4x512xbf16>, vector<512x64xbf16>, vector<4x64xf32> -> vector<4x64xf32>
    %c0_178 = arith.constant 0 : index
    %c0_179 = arith.constant 0 : index
    %174 = vector.load %arg16[%c0_178, %c0_179] : memref<1x64xf32, #tpu.memory_space<vmem>>, vector<1x64xf32>
    %175 = vector.broadcast %174 : vector<1x64xf32> to vector<4x64xf32>
    %176 = arith.addf %173, %175 : vector<4x64xf32>
    %cst_180 = arith.constant 0.000000e+00 : f32
    %177 = vector.broadcast %cst_180 : f32 to vector<4x64xf32>
    %178 = arith.maximumf %176, %177 : vector<4x64xf32>
    %179 = arith.truncf %178 : vector<4x64xf32> to vector<4x64xbf16>
    %c0_181 = arith.constant 0 : index
    %c0_182 = arith.constant 0 : index
    %180 = vector.load %arg17[%c0_181, %c0_182] : memref<64x64xbf16, #tpu.memory_space<vmem>>, vector<64x64xbf16>
    %cst_183 = arith.constant dense<0.000000e+00> : vector<4x64xf32>
    %181 = tpu.matmul %179, %180, %cst_183 {dimension_numbers = #tpu.dot_dimension_numbers<[1], [0], [0], [1], [0, 0, 1, 1], [], []>} : vector<4x64xbf16>, vector<64x64xbf16>, vector<4x64xf32> -> vector<4x64xf32>
    %c0_184 = arith.constant 0 : index
    %c0_185 = arith.constant 0 : index
    %182 = vector.load %arg18[%c0_184, %c0_185] : memref<1x64xf32, #tpu.memory_space<vmem>>, vector<1x64xf32>
    %183 = vector.broadcast %182 : vector<1x64xf32> to vector<4x64xf32>
    %184 = arith.addf %181, %183 : vector<4x64xf32>
    %cst_186 = arith.constant 0.000000e+00 : f32
    %185 = vector.broadcast %cst_186 : f32 to vector<4x64xf32>
    %186 = arith.maximumf %184, %185 : vector<4x64xf32>
    %187 = arith.truncf %186 : vector<4x64xf32> to vector<4x64xbf16>
    %c0_187 = arith.constant 0 : index
    %c0_188 = arith.constant 0 : index
    %188 = vector.load %arg19[%c0_187, %c0_188] : memref<64x10xbf16, #tpu.memory_space<vmem>>, vector<64x10xbf16>
    %cst_189 = arith.constant dense<0.000000e+00> : vector<4x10xf32>
    %189 = tpu.matmul %187, %188, %cst_189 {dimension_numbers = #tpu.dot_dimension_numbers<[1], [0], [0], [1], [0, 0, 1, 1], [], []>} : vector<4x64xbf16>, vector<64x10xbf16>, vector<4x10xf32> -> vector<4x10xf32>
    %c0_190 = arith.constant 0 : index
    %c0_191 = arith.constant 0 : index
    %190 = vector.load %arg20[%c0_190, %c0_191] : memref<1x10xf32, #tpu.memory_space<vmem>>, vector<1x10xf32>
    %191 = vector.broadcast %190 : vector<1x10xf32> to vector<4x10xf32>
    %192 = arith.addf %189, %191 : vector<4x10xf32>
    %c0_192 = arith.constant 0 : index
    %c0_193 = arith.constant 0 : index
    %c0_194 = arith.constant 0 : index
    %193 = vector.load %arg21[%c0_192, %c0_193, %c0_194] : memref<1x4x10xf32, #tpu.memory_space<vmem>>, vector<1x4x10xf32>
    %194 = vector.shape_cast %193 : vector<1x4x10xf32> to vector<4x10xf32>
    %195 = vector.shape_cast %192 : vector<4x10xf32> to vector<1x4x10xf32>
    tpu.vector_store %arg21[%c0_192, %c0_193, %c0_194], %195 {strides = array<i32>} : memref<1x4x10xf32, #tpu.memory_space<vmem>>, vector<1x4x10xf32>,
    return
  }
  func.func @transform_0(%arg0: i32) -> (i32, i32, i32) {
    %c0_i32 = arith.constant 0 : i32
    %c0_i32_0 = arith.constant 0 : i32
    %c0_i32_1 = arith.constant 0 : i32
    return %arg0, %c0_i32, %c0_i32_0 : i32, i32, i32
  }
  func.func @transform_1(%arg0: i32) -> (i32, i32, i32) {
    %c0_i32 = arith.constant 0 : i32
    %c0_i32_0 = arith.constant 0 : i32
    %c0_i32_1 = arith.constant 0 : i32
    %c0_i32_2 = arith.constant 0 : i32
    return %c0_i32, %c0_i32_0, %c0_i32_1 : i32, i32, i32
  }
  func.func @transform_2(%arg0: i32) -> (i32, i32) {
    %c0_i32 = arith.constant 0 : i32
    %c0_i32_0 = arith.constant 0 : i32
    %c0_i32_1 = arith.constant 0 : i32
    return %c0_i32, %c0_i32_0 : i32, i32
  }
  func.func @transform_3(%arg0: i32) -> (i32, i32, i32) {
    %c0_i32 = arith.constant 0 : i32
    %c0_i32_0 = arith.constant 0 : i32
    %c0_i32_1 = arith.constant 0 : i32
    %c0_i32_2 = arith.constant 0 : i32
    return %c0_i32, %c0_i32_0, %c0_i32_1 : i32, i32, i32
  }
  func.func @transform_4(%arg0: i32) -> (i32, i32, i32) {
    %c0_i32 = arith.constant 0 : i32
    %c0_i32_0 = arith.constant 0 : i32
    %c0_i32_1 = arith.constant 0 : i32
    %c0_i32_2 = arith.constant 0 : i32
    return %c0_i32, %c0_i32_0, %c0_i32_1 : i32, i32, i32
  }
  func.func @transform_5(%arg0: i32) -> (i32, i32, i32) {
    %c0_i32 = arith.constant 0 : i32
    %c0_i32_0 = arith.constant 0 : i32
    %c0_i32_1 = arith.constant 0 : i32
    %c0_i32_2 = arith.constant 0 : i32
    return %c0_i32, %c0_i32_0, %c0_i32_1 : i32, i32, i32
  }
  func.func @transform_6(%arg0: i32) -> (i32, i32) {
    %c0_i32 = arith.constant 0 : i32
    %c0_i32_0 = arith.constant 0 : i32
    %c0_i32_1 = arith.constant 0 : i32
    return %c0_i32, %c0_i32_0 : i32, i32
  }
  func.func @transform_7(%arg0: i32) -> (i32, i32, i32) {
    %c0_i32 = arith.constant 0 : i32
    %c0_i32_0 = arith.constant 0 : i32
    %c0_i32_1 = arith.constant 0 : i32
    %c0_i32_2 = arith.constant 0 : i32
    return %c0_i32, %c0_i32_0, %c0_i32_1 : i32, i32, i32
  }
  func.func @transform_8(%arg0: i32) -> (i32, i32, i32) {
    %c0_i32 = arith.constant 0 : i32
    %c0_i32_0 = arith.constant 0 : i32
    %c0_i32_1 = arith.constant 0 : i32
    %c0_i32_2 = arith.constant 0 : i32
    return %c0_i32, %c0_i32_0, %c0_i32_1 : i32, i32, i32
  }
  func.func @transform_9(%arg0: i32) -> (i32, i32, i32) {
    %c0_i32 = arith.constant 0 : i32
    %c0_i32_0 = arith.constant 0 : i32
    %c0_i32_1 = arith.constant 0 : i32
    %c0_i32_2 = arith.constant 0 : i32
    return %c0_i32, %c0_i32_0, %c0_i32_1 : i32, i32, i32
  }
  func.func @transform_10(%arg0: i32) -> (i32, i32) {
    %c0_i32 = arith.constant 0 : i32
    %c0_i32_0 = arith.constant 0 : i32
    %c0_i32_1 = arith.constant 0 : i32
    return %c0_i32, %c0_i32_0 : i32, i32
  }
  func.func @transform_11(%arg0: i32) -> (i32, i32, i32) {
    %c0_i32 = arith.constant 0 : i32
    %c0_i32_0 = arith.constant 0 : i32
    %c0_i32_1 = arith.constant 0 : i32
    %c0_i32_2 = arith.constant 0 : i32
    return %c0_i32, %c0_i32_0, %c0_i32_1 : i32, i32, i32
  }
  func.func @transform_12(%arg0: i32) -> (i32, i32, i32) {
    %c0_i32 = arith.constant 0 : i32
    %c0_i32_0 = arith.constant 0 : i32
    %c0_i32_1 = arith.constant 0 : i32
    %c0_i32_2 = arith.constant 0 : i32
    return %c0_i32, %c0_i32_0, %c0_i32_1 : i32, i32, i32
  }
  func.func @transform_13(%arg0: i32) -> (i32, i32, i32) {
    %c0_i32 = arith.constant 0 : i32
    %c0_i32_0 = arith.constant 0 : i32
    %c0_i32_1 = arith.constant 0 : i32
    %c0_i32_2 = arith.constant 0 : i32
    return %c0_i32, %c0_i32_0, %c0_i32_1 : i32, i32, i32
  }
  func.func @transform_14(%arg0: i32) -> (i32, i32) {
    %c0_i32 = arith.constant 0 : i32
    %c0_i32_0 = arith.constant 0 : i32
    %c0_i32_1 = arith.constant 0 : i32
    return %c0_i32, %c0_i32_0 : i32, i32
  }
  func.func @transform_15(%arg0: i32) -> (i32, i32) {
    %c0_i32 = arith.constant 0 : i32
    %c0_i32_0 = arith.constant 0 : i32
    %c0_i32_1 = arith.constant 0 : i32
    return %c0_i32, %c0_i32_0 : i32, i32
  }
  func.func @transform_16(%arg0: i32) -> (i32, i32) {
    %c0_i32 = arith.constant 0 : i32
    %c0_i32_0 = arith.constant 0 : i32
    %c0_i32_1 = arith.constant 0 : i32
    return %c0_i32, %c0_i32_0 : i32, i32
  }
  func.func @transform_17(%arg0: i32) -> (i32, i32) {
    %c0_i32 = arith.constant 0 : i32
    %c0_i32_0 = arith.constant 0 : i32
    %c0_i32_1 = arith.constant 0 : i32
    return %c0_i32, %c0_i32_0 : i32, i32
  }
  func.func @transform_18(%arg0: i32) -> (i32, i32) {
    %c0_i32 = arith.constant 0 : i32
    %c0_i32_0 = arith.constant 0 : i32
    %c0_i32_1 = arith.constant 0 : i32
    return %c0_i32, %c0_i32_0 : i32, i32
  }
  func.func @transform_19(%arg0: i32) -> (i32, i32) {
    %c0_i32 = arith.constant 0 : i32
    %c0_i32_0 = arith.constant 0 : i32
    %c0_i32_1 = arith.constant 0 : i32
    return %c0_i32, %c0_i32_0 : i32, i32
  }
  func.func @transform_20(%arg0: i32) -> (i32, i32, i32) {
    %c0_i32 = arith.constant 0 : i32
    %c0_i32_0 = arith.constant 0 : i32
    %c0_i32_1 = arith.constant 0 : i32
    return %arg0, %c0_i32, %c0_i32_0 : i32, i32, i32
  }
}

</mosaic_0001>

<bundles_post_ra>
// kernel: vgg_forward.1
= control target key start
LH: loop header
LB: loop body
LE: loop exit
PB: predicated region body
PF: predicated region fallthrough
CT: control target
= control target key end

     0   :  { %s11697_s0 = inlined_call_operand.vmem [shape: bf16[8,34,102], index: 0, kind: input, shape index: {}]   ;;  %s11698_s1 = inlined_call_operand.vmem [shape: bf16[3,102,256], index: 1, kind: input, shape index: {}]   ;;  %s11699_s2 = inlined_call_operand.vmem [shape: f32[1,256], index: 2, kind: input, shape index: {}]   ;;  %s11700_s3 = inlined_call_operand.vmem [shape: bf16[2,72,128], index: 3, kind: input, shape index: {}]   ;;  %s11701_s4 = inlined_call_operand.vmem [shape: bf16[2,256,144], index: 4, kind: input, shape index: {}]   ;;  %s11702_s5 = inlined_call_operand.vmem [shape: bf16[3,144,256], index: 5, kind: input, shape index: {}]   ;;  %s11703_s6 = inlined_call_operand.vmem [shape: f32[1,256], index: 6, kind: input, shape index: {}]   ;;  %s11704_s7 = inlined_call_operand.vmem [shape: bf16[2,40,64], index: 7, kind: input, shape index: {}]   ;;  %s11705_s8 = inlined_call_operand.vmem [shape: bf16[2,256,160], index: 8, kind: input, shape index: {}]   ;;  %s11706_s9 = inlined_call_operand.vmem [shape: bf16[3,160,256], index: 9, kind: input, shape index: {}]   ;;  %s11707_s10 = inlined_call_operand.vmem [shape: f32[1,256], index: 10, kind: input, shape index: {}]   ;;  %s11708_s11 = inlined_call_operand.vmem [shape: bf16[2,16,32], index: 11, kind: input, shape index: {}]   ;;  %s11709_s12 = inlined_call_operand.vmem [shape: bf16[2,256,128], index: 12, kind: input, shape index: {}]   ;;  %s11710_s13 = inlined_call_operand.vmem [shape: bf16[4,4,16], index: 13, kind: input, shape index: {}]   ;;  %s11711_s14 = inlined_call_operand.vmem [shape: bf16[512,64], index: 14, kind: input, shape index: {}]   ;;  %s11712_s15 = inlined_call_operand.vmem [shape: f32[1,64], index: 15, kind: input, shape index: {}]   ;;  %s11713_s16 = inlined_call_operand.vmem [shape: bf16[64,64], index: 16, kind: input, shape index: {}]   ;;  %s11714_s17 = inlined_call_operand.vmem [shape: f32[1,64], index: 17, kind: input, shape index: {}]   ;;  %s11715_s18 = inlined_call_operand.vmem [shape: bf16[64,10], index: 18, kind: input, shape index: {}]   ;;  %s11716_s19 = inlined_call_operand.vmem [shape: f32[1,10], index: 19, kind: input, shape index: {}]   ;;  %s11717_s20 = inlined_call_operand.hbm [shape: f32[2,4,10], index: 20, kind: output, shape index: {}]  }
   0x1   :  { %11732 = sst [smem:[#allocation21_spill]] %s11697_s0 }
   0x2   :  { %11733 = sst [smem:[#allocation22_spill]] %s11698_s1 }
   0x3   :  { %11734 = sst [smem:[#allocation23_spill]] %s11699_s2 }
   0x4   :  { %11735 = sst [smem:[#allocation24_spill]] %s11700_s3 }
   0x5   :  { %11736 = sst [smem:[#allocation25_spill]] %s11701_s4 }
   0x6   :  { %11737 = sst [smem:[#allocation26_spill]] %s11702_s5 }
   0x7   :  { %11738 = sst [smem:[#allocation27_spill]] %s11703_s6 }
   0x8   :  { %11739 = sst [smem:[#allocation28_spill]] %s11716_s19 }
   0x9   :  { %25 = vsyncpa [#allocation5], 0 }
   0xa   :  { %27 = vsyncpa [#allocation5 + $0x1], 0  ;;  %s8517_s1 = smov 0   ;;  %s8519_s22 = smov 0  }
   0xb   :  { %s8521_s23 = smov 0   ;;  %s8523_s24 = smov 0  }
   0xc LB: > { %11740 = sst [smem:[#allocation7_spill]] %s8398_s1  ;;  %s11721_s2 = sadd.s32 4294967295, %s8410_s24   ;;  %s8410_s24 = sphi %s8523_s24, %s11781_s24   ;;  %s8406_s23 = sphi %s8521_s23, %s11783_s23   ;;  %s8402_s22 = sphi %s8519_s22, %s11785_s22   ;;  %s8398_s1 = sphi %s8517_s1, %s11784_s1  }
   0xd   : > { %11741 = sst [smem:[#allocation8_spill]] %s8406_s23  ;;  %s6092_s25 = sadd.s32 4294967294, %s8410_s24  }
   0xe   : > { %11742 = sst [smem:[#allocation9_spill]] %s8410_s24  ;;  %s8540_s3 = sadd.s32 1, %s8410_s24  }
   0xf   : > { %11743 = sst [smem:[#allocation10_spill]] %s8540_s3  ;;  %s465_s26 = sadd.s32 1, %s8406_s23 }
  0x10   : > { %s462_s27 = ssub.s32 %s8410_s24, %s8540_s3  ;;  %p475_p0 = scmp.ne.s32.totalorder %s8406_s23, %s8402_s22 }
  0x11   : > { %p463_p1 = scmp.eq.s32.totalorder %s462_s27, 0  ;;  %p476_p2 = scmp.eq.s32.totalorder %s11721_s2, 1 }
  0x12   : > { %p481_p3 = scmp.ne.s32.totalorder %s8402_s22, %s8398_s1  ;;  %p482_p4 = scmp.eq.s32.totalorder %s6092_s25, 1 }
  0x13   : > { %s8552_s28 = scalar_select %p463_p1, %s8406_s23, %s465_s26  }
  0x14   : > { %p8554_p5 = por %p476_p2, %p475_p0  ;;  %p8558_p6 = por %p482_p4, %p481_p3 }
  0x15   : > { %11744 = sst [smem:[#allocation11_spill]] %s8552_s28  ;;  %p6095_p7 = scmp.ge.s32.totalorder %s8410_s24, 1 }
  0x16   : > { %s11745_s4 = scalar_select %p8554_p5, 1, 0 }
  0x17   : > { %s11747_s29 = scalar_select %p8558_p6, 1, 0 }
  0x18   : > { %11746 = sst [smem:[#allocation12_spill]] %s11745_s4  ;;  %p567_p8 = scmp.lt.s32.totalorder %s8410_s24, 3 }
  0x19   : > { %11748 = sst [smem:[#allocation13_spill]] %s11747_s29 }
  0x1a   : > { %p568_p9 = pnand %p6095_p7, %p567_p8 }
  0x1c   : > { %571 = sbr.rel (%p568_p9) target bundleno = 2799 (0xaef), region = 100 }
  0x21   : > { %s11749_s21 = sld [smem:[#allocation22_spill]]  ;;  %vm907_vm0 = vcmask 1042432   ;;  %s11750_s3 = sadd.s32 4294967295, %s8410_s24   ;;  %vm713_vm1 = vsmask.f32 7424  ;;  %vm882_vm2 = vcmask 834560  }
  0x22   : > { %s8654_s29 = sshll.u32 %s11750_s3, 2  ;;  %s11751_s30 = sld [smem:[#allocation21_spill]]  ;;  %vm1204_vm3 = vcmask 1046528   ;;  %vm2470_vm4 = vcmask 1043456   ;;  %vm2471_vm5 = vcmask 130052   ;;  %vm2848_vm7 = vcmask 130048  }
  0x23   : > { %p627_p10 = scmp.lt.s32.totalorder %s8654_s29, 7  ;;  %s11752_s4 = sld [smem:[#allocation23_spill]]  ;;  %vm9804_vm6 = vmor %vm2471_vm5, %vm2470_vm4  ;;  %vm2621_vm8 = vsmask.f32 6400  ;;  %vm2535_vm9 = vcmask 1045504   ;;  %vm2556_vm11 = vcmask 1044480  }
  0x24   : > { %s11753_s24 = sld [smem:[#allocation24_spill]]  ;;  %vm2662_vm10 = vsmask.f32 5376  ;;  %vm2703_vm12 = vsmask.f32 4352  ;;  %vm3553_vm13 = vcmask 523264  }
  0x25   : > { %s628_s28 = scalar_select %p627_p10, %s8654_s29, 7  ;;  %vm4283_vm14 = vcmask 261124  }
  0x26   : > { %s11756_s5 = sld [smem:[#allocation26_spill]]  ;;  %vm10953_vm15 = vmor %vm4283_vm14, %vm2470_vm4 }
  0x27   : > { %v6142_v0 = vld [vmem:[%s11749_s21 + $0xc8] sm:$0x77]  ;;  %v705_v1 = vld [vmem:[%s11749_s21 + $0x60] sm:$0x77]  ;;  %v6185_v6 = vld [vmem:[%s11749_s21 + $0xb8] sm:$0xf] }
  0x28   : > { %v854_v2 = vunpack.c.l.b16 %v6142_v0  ;;  %v855_v3 = vunpack.c.h.b16 %v6142_v0  ;;  %v1049_v4 = vunpack.c.l.b16 %v705_v1  ;;  %v1050_v5 = vunpack.c.h.b16 %v705_v1  ;;  %v7943_v7 = vld [vmem:[%s11749_s21 + $0xbc] sm:$0xf0]  ;;  %v7942_v12 = vld [vmem:[%s11749_s21 + $0xbc] sm:$0xf]  ;;  %v6187_v13 = vld [vmem:[%s11749_s21 + $0xc0] sm:$0xf0] }
  0x29   : > { %v6249_v14 = vld [vmem:[%s11749_s21 + $0x50] sm:$0xf]  ;;  %v7931_v15 = vld [vmem:[%s11749_s21 + $0x54] sm:$0xf0]  ;;  %v7930_v16 = vld [vmem:[%s11749_s21 + $0x54] sm:$0xf]  ;;  %v6186_v22 = vor.u32 %v7943_v7, %v6185_v6  ;;  %v6190_v23 = vor.u32 %v7942_v12, %v6187_v13 }
  0x2a   : > { %v868_v8 = vpack.c.b16 %v854_v2, %v854_v2  ;;  %v869_v9 = vpack.c.b16 %v855_v3, %v855_v3  ;;  %v1063_v10 = vpack.c.b16 %v1049_v4, %v1049_v4  ;;  %v1064_v11 = vpack.c.b16 %v1050_v5, %v1050_v5  ;;  %v6251_v17 = vld [vmem:[%s11749_s21 + $0x58] sm:$0xf0]  ;;  %v6177_v24 = vld [vmem:[%s11749_s21 + $0xa8] sm:$0xf]  ;;  %v7941_v25 = vld [vmem:[%s11749_s21 + $0xac] sm:$0xf0]  ;;  %s11754_s26 = smov %s11753_s24 }
  0x2b   : > { %v6250_v26 = vor.u32 %v7931_v15, %v6249_v14  ;;  %v6254_v27 = vor.u32 %v7930_v16, %v6251_v17  ;;  %v7940_v28 = vld [vmem:[%s11749_s21 + $0xac] sm:$0xf]  ;;  %v6179_v29 = vld [vmem:[%s11749_s21 + $0xb0] sm:$0xf0]  ;;  %v6241_v30 = vld [vmem:[%s11749_s21 + $0x40] sm:$0xf]  ;;  %v6178_v34 = vor.u32 %v7941_v25, %v6177_v24 }
  0x2c   : > { %v909_v18 = vsel %vm907_vm0, %v868_v8, 0  ;;  %v912_v19 = vsel %vm907_vm0, %v869_v9, 0  ;;  %v1094_v20 = vsel %vm907_vm0, %v1063_v10, 0  ;;  %v1097_v21 = vsel %vm907_vm0, %v1064_v11, 0  ;;  %v7929_v31 = vld [vmem:[%s11749_s21 + $0x44] sm:$0xf0] }
  0x2d   : > { %915 = vmatpush.bf16.msra.mxu0 %v909_v18  ;;  %964 = vmatpush.bf16.msra.mxu1 %v912_v19  ;;  %v7928_v32 = vld [vmem:[%s11749_s21 + $0x44] sm:$0xf]  ;;  %v6243_v33 = vld [vmem:[%s11749_s21 + $0x48] sm:$0xf0]  ;;  %v6182_v35 = vor.u32 %v7940_v28, %v6179_v29  ;;  %v6169_v36 = vld [vmem:[%s11749_s21 + $0x98] sm:$0xf]  ;;  %v6242_v38 = vor.u32 %v7929_v31, %v6241_v30 }
  0x2e   : > { %1100 = vmatpush.bf16.msra.mxu2 %v1094_v20  ;;  %1149 = vmatpush.bf16.msra.mxu3 %v1097_v21  ;;  %v7939_v37 = vld [vmem:[%s11749_s21 + $0x9c] sm:$0xf0]  ;;  %v6246_v39 = vor.u32 %v7928_v32, %v6243_v33  ;;  %v7938_v40 = vld [vmem:[%s11749_s21 + $0x9c] sm:$0xf]  ;;  %v6171_v41 = vld [vmem:[%s11749_s21 + $0xa0] sm:$0xf0] }
  0x2f   : > { %v6233_v42 = vld [vmem:[%s11749_s21 + $0x30] sm:$0xf]  ;;  %v7927_v43 = vld [vmem:[%s11749_s21 + $0x34] sm:$0xf0]  ;;  %v7926_v44 = vld [vmem:[%s11749_s21 + $0x34] sm:$0xf]  ;;  %v6170_v46 = vor.u32 %v7939_v37, %v6169_v36  ;;  %v6174_v47 = vor.u32 %v7938_v40, %v6171_v41 }
  0x30   : > { %v6235_v45 = vld [vmem:[%s11749_s21 + $0x38] sm:$0xf0]  ;;  %v6161_v48 = vld [vmem:[%s11749_s21 + $0x88] sm:$0xf]  ;;  %v7937_v49 = vld [vmem:[%s11749_s21 + $0x8c] sm:$0xf0]  ;;  %v6234_v50 = vor.u32 %v7927_v43, %v6233_v42 }
  0x31   : > { %916 = vmatpush.bf16.msra.mxu0 %v6186_v22  ;;  %965 = vmatpush.bf16.msra.mxu1 %v6190_v23  ;;  %v6238_v51 = vor.u32 %v7926_v44, %v6235_v45  ;;  %v7936_v52 = vld [vmem:[%s11749_s21 + $0x8c] sm:$0xf]  ;;  %v6163_v53 = vld [vmem:[%s11749_s21 + $0x90] sm:$0xf0]  ;;  %v6225_v54 = vld [vmem:[%s11749_s21 + $0x20] sm:$0xf]  ;;  %v6162_v61 = vor.u32 %v7937_v49, %v6161_v48 }
  0x32   : > { %1101 = vmatpush.bf16.msra.mxu2 %v6250_v26  ;;  %1150 = vmatpush.bf16.msra.mxu3 %v6254_v27  ;;  %v7925_v55 = vld [vmem:[%s11749_s21 + $0x24] sm:$0xf0]  ;;  %v7924_v56 = vld [vmem:[%s11749_s21 + $0x24] sm:$0xf]  ;;  %v6227_v57 = vld [vmem:[%s11749_s21 + $0x28] sm:$0xf0]  ;;  %v6166_v62 = vor.u32 %v7936_v52, %v6163_v53 }
  0x33   : > { %v6153_v58 = vld [vmem:[%s11749_s21 + $0x78] sm:$0xf]  ;;  %v7935_v59 = vld [vmem:[%s11749_s21 + $0x7c] sm:$0xf0]  ;;  %v7934_v60 = vld [vmem:[%s11749_s21 + $0x7c] sm:$0xf]  ;;  %v6226_v0 = vor.u32 %v7925_v55, %v6225_v54  ;;  %v6230_v1 = vor.u32 %v7924_v56, %v6227_v57 }
  0x34   : > { %v6155_v63 = vld [vmem:[%s11749_s21 + $0x80] sm:$0xf0]  ;;  %v6217_v2 = vld [vmem:[%s11749_s21 + $0x10] sm:$0xf]  ;;  %v7923_v3 = vld [vmem:[%s11749_s21 + $0x14] sm:$0xf0]  ;;  %v6154_v7 = vor.u32 %v7935_v59, %v6153_v58 }
  0x35   : > { %917 = vmatpush.bf16.msra.mxu0 %v6178_v34  ;;  %966 = vmatpush.bf16.msra.mxu1 %v6182_v35  ;;  %v7922_v4 = vld [vmem:[%s11749_s21 + $0x14] sm:$0xf]  ;;  %v6219_v5 = vld [vmem:[%s11749_s21 + $0x18] sm:$0xf0]  ;;  %v6145_v6 = vld [vmem:[%s11749_s21 + $0x68] sm:$0xf]  ;;  %v6158_v8 = vor.u32 %v7934_v60, %v6155_v63  ;;  %v6218_v12 = vor.u32 %v7923_v3, %v6217_v2 }
  0x36   : > { %1102 = vmatpush.bf16.msra.mxu2 %v6242_v38  ;;  %1151 = vmatpush.bf16.msra.mxu3 %v6246_v39  ;;  %s8299_s2 = smul.u32 20, %s628_s28  ;;  %v7933_v9 = vld [vmem:[%s11749_s21 + $0x6c] sm:$0xf0]  ;;  %v7932_v10 = vld [vmem:[%s11749_s21 + $0x6c] sm:$0xf]  ;;  %v6222_v13 = vor.u32 %v7922_v4, %v6219_v5  ;;  %s11766_s6 = sld [smem:[#allocation27_spill]] }
  0x37   : > { %v6147_v11 = vld [vmem:[%s11749_s21 + $0x70] sm:$0xf0]  ;;  %v6209_v14 = vld [vmem:[%s11749_s21] sm:$0xf]  ;;  %v7921_v15 = vld [vmem:[%s11749_s21 + $0x4] sm:$0xf0]  ;;  %v6146_v22 = vor.u32 %v7933_v9, %v6145_v6 }
  0x38   : > { %v7920_v16 = vld [vmem:[%s11749_s21 + $0x4] sm:$0xf]  ;;  %s8724_s0 = scalar_lea.vmem %s11751_s30, %s8299_s2  ;;  %v6211_v17 = vld [vmem:[%s11749_s21 + $0x8] sm:$0xf0]  ;;  %v6150_v23 = vor.u32 %v7932_v10, %v6147_v11  ;;  %v6210_v25 = vor.u32 %v7921_v15, %v6209_v14  ;;  %v6286_v4 = vld [vmem:[%s11749_s21 + $0x130] sm:$0x77] }
  0x39   : > { %918 = vmatpush.bf16.msra.mxu0 %v6170_v46  ;;  %967 = vmatpush.bf16.msra.mxu1 %v6174_v47  ;;  %v8285_v18 = vld [vmem:[%s8724_s0] sm:$0xff]   ;;  %v8731_v19 = vld [vmem:[%s8724_s0 + $0x8] sm:$0xff]  ;;  %v6214_v26 = vor.u32 %v7920_v16, %v6211_v17  ;;  %v706_v28 = vld [vmem:[%s8724_s0 + $0x10] sm:$0x1]  ;;  %v1285_v6 = vunpack.c.l.b16 %v6286_v4  ;;  %s11776_s30 = sld [smem:[#allocation28_spill]] }
  0x3a   : > { %1103 = vmatpush.bf16.msra.mxu2 %v6234_v50  ;;  %1152 = vmatpush.bf16.msra.mxu3 %v6238_v51  ;;  %v715_v20 = vshrl.u32 %v8285_v18, 16  ;;  %v717_v21 = vshll.u32 %v8285_v18, 16  ;;  %v722_v24 = vshll.u32 %v8731_v19, 16  ;;  %v711_v31 = vunpack.c.l.b16 %v706_v28  ;;  %v6099_v36 = vld [vmem:[%s8724_s0 + $0x14] sm:$0xff]   ;;  %v8756_v41 = vld [vmem:[%s8724_s0 + $0x1c] sm:$0xff]  ;;  %v8292_v57 = vld [vmem:[%s8724_s0 + $0x28] sm:$0xff]  }
  0x3b   : > { %v726_v34 = vshrl.u32 %v8731_v19, 16  ;;  %v8746_v37 = vld [vmem:[%s8724_s0 + $0x14] sm:$0xf0]  ;;  %v740_v42 = vshll.u32 %v6099_v36, 16  ;;  %v738_v43 = vshrl.u32 %v6099_v36, 16  ;;  %v745_v45 = vshll.u32 %v8756_v41, 16 }
  0x3c   : > { %v719_v27 = vrot.slane %v717_v21, 1  ;;  %v724_v29 = vrot.slane %v722_v24, 1  ;;  %v8740_v33 = vpack.c.b16 %v711_v31, %v711_v31  ;;  %v6127_v48 = vld [vmem:[%s8724_s0 + $0x24] sm:$0x1]  ;;  %v749_v52 = vshrl.u32 %v8756_v41, 16  ;;  %v8778_v58 = vld [vmem:[%s8724_s0 + $0x30] sm:$0xff] }
  0x3d   : > { %919 = vmatpush.bf16.msra.mxu0 %v6162_v61  ;;  %968 = vmatpush.bf16.msra.mxu1 %v6166_v62  ;;  %v742_v44 = vrot.slane %v740_v42, 1  ;;  %v747_v47 = vrot.slane %v745_v45, 1  ;;  %v735_v50 = vunpack.c.l.b16 %v6127_v48  ;;  %v763_v59 = vshll.u32 %v8292_v57, 16  ;;  %v7955_v11 = vld [vmem:[%s11749_s21 + $0x124] sm:$0xf0]  ;;  %v8807_v16 = vld [vmem:[%s8724_s0 + $0x3c] sm:$0xff]  }
  0x3e   : > { %1104 = vmatpush.bf16.msra.mxu2 %v6226_v0  ;;  %1153 = vmatpush.bf16.msra.mxu3 %v6230_v1  ;;  %v720_v30 = vor.u32 %v719_v27, %v715_v20  ;;  %v730_v35 = vshll.u32 %v8740_v33, 16  ;;  %v728_v38 = vor.u32 %v726_v34, %v724_v29  ;;  %v761_v60 = vshrl.u32 %v8292_v57, 16  ;;  %v6128_v1 = vld [vmem:[%s8724_s0 + $0x38] sm:$0x1]  ;;  %v8810_v17 = vld [vmem:[%s8724_s0 + $0x3c] sm:$0xf0] }
  0x3f   : > { %v743_v46 = vor.u32 %v742_v44, %v738_v43  ;;  %v8765_v51 = vpack.c.b16 %v735_v50, %v735_v50  ;;  %v751_v54 = vor.u32 %v749_v52, %v747_v47  ;;  %v765_v61 = vrot.slane %v763_v59, 1  ;;  %v7953_v24 = vld [vmem:[%s11749_s21 + $0x114] sm:$0xf0]  ;;  %v7951_v34 = vld [vmem:[%s11749_s21 + $0x104] sm:$0xf0] }
  0x40   : > { %v725_v32 = vsel %vm713_vm1, %v720_v30, %v724_v29  ;;  %v732_v39 = vrot.slane %v730_v35, 1  ;;  %v768_v62 = vshll.u32 %v8778_v58, 16  ;;  %v758_v3 = vunpack.c.l.b16 %v6128_v1  ;;  %v7950_v35 = vld [vmem:[%s11749_s21 + $0x104] sm:$0xf]  ;;  %v6305_v43 = vld [vmem:[%s11749_s21 + $0xf0] sm:$0xf] }
  0x41   : > { %920 = vmatpush.bf16.msra.mxu0 %v6154_v7  ;;  %969 = vmatpush.bf16.msra.mxu1 %v6158_v8  ;;  %v748_v49 = vsel %vm713_vm1, %v743_v46, %v747_v47  ;;  %v753_v53 = vshll.u32 %v8765_v51, 16  ;;  %v766_v63 = vor.u32 %v765_v61, %v761_v60  ;;  %v1286_v7 = vunpack.c.h.b16 %v6286_v4  ;;  %v6329_v8 = vld [vmem:[%s11749_s21 + $0x120] sm:$0xf]  ;;  %v7949_v44 = vld [vmem:[%s11749_s21 + $0xf4] sm:$0xf0] }
  0x42   : > { %1105 = vmatpush.bf16.msra.mxu2 %v6218_v12  ;;  %1154 = vmatpush.bf16.msra.mxu3 %v6222_v13  ;;  %v733_v40 = vsel %vm713_vm1, %v728_v38, %v732_v39  ;;  %v770_v0 = vrot.slane %v768_v62, 1  ;;  %v8790_v5 = vpack.c.b16 %v758_v3, %v758_v3  ;;  %v1299_v9 = vpack.c.b16 %v1285_v6, %v1285_v6  ;;  %v7954_v12 = vld [vmem:[%s11749_s21 + $0x124] sm:$0xf]  ;;  %v6331_v13 = vld [vmem:[%s11749_s21 + $0x128] sm:$0xf0] }
  0x43   : > { %v755_v55 = vrot.slane %v753_v53, 1  ;;  %v1300_v10 = vpack.c.b16 %v1286_v7, %v1286_v7  ;;  %v772_v14 = vshrl.u32 %v8778_v58, 16  ;;  %v6330_v21 = vor.u32 %v7955_v11, %v6329_v8  ;;  %v7948_v45 = vld [vmem:[%s11749_s21 + $0xf4] sm:$0xf]  ;;  %v6307_v47 = vld [vmem:[%s11749_s21 + $0xf8] sm:$0xf0] }
  0x44   : > { %v771_v2 = vsel %vm713_vm1, %v766_v63, %v770_v0  ;;  %v776_v15 = vshll.u32 %v8790_v5, 16  ;;  %v786_v38 = vshll.u32 %v8807_v16, 16  ;;  %v6306_v46 = vor.u32 %v7949_v44, %v6305_v43  ;;  %v7947_v50 = vld [vmem:[%s11749_s21 + $0xe4] sm:$0xf0]  ;;  %v7946_v52 = vld [vmem:[%s11749_s21 + $0xe4] sm:$0xf] }
  0x45   : > { %921 = vmatpush.bf16.msra.mxu0 %v6146_v22  ;;  %970 = vmatpush.bf16.msra.mxu1 %v6150_v23  ;;  %v756_v56 = vsel %vm713_vm1, %v751_v54, %v755_v55  ;;  %v1341_v20 = vsel %vm907_vm0, %v1300_v10, 0  ;;  %v6334_v22 = vor.u32 %v7954_v12, %v6331_v13  ;;  %v6321_v23 = vld [vmem:[%s11749_s21 + $0x110] sm:$0xf]  ;;  %v774_v27 = vor.u32 %v772_v14, %v770_v0  ;;  %v6299_v53 = vld [vmem:[%s11749_s21 + $0xe8] sm:$0xf0] }
  0x46   : > { %1106 = vmatpush.bf16.msra.mxu2 %v6210_v25  ;;  %1155 = vmatpush.bf16.msra.mxu3 %v6214_v26  ;;  %v7952_v25 = vld [vmem:[%s11749_s21 + $0x114] sm:$0xf]  ;;  %v6323_v26 = vld [vmem:[%s11749_s21 + $0x118] sm:$0xf0]  ;;  %v778_v28 = vrot.slane %v776_v15, 1  ;;  %v6322_v29 = vor.u32 %v7953_v24, %v6321_v23  ;;  %v6310_v48 = vor.u32 %v7948_v45, %v6307_v47  ;;  %v784_v54 = vshrl.u32 %v8807_v16, 16 }
  0x47   : > { %v6326_v30 = vor.u32 %v7952_v25, %v6323_v26  ;;  %v788_v55 = vrot.slane %v786_v38, 1  ;;  %v6302_v59 = vor.u32 %v7946_v52, %v6299_v53  ;;  %v6129_v62 = vld [vmem:[%s8724_s0 + $0x4c] sm:$0x1]  ;;  %v6289_v63 = vld [vmem:[%s11749_s21 + $0xd0] sm:$0xf]  ;;  %v1214_v47 = vrot.slane %v8756_v41, 1 }
  0x48   : > { %6191 = vmatmul.msk.bf16.vlgmr.msra.gmra.mxu0 %vm882_vm2, %v725_v32  ;;  %6199 = vmatmul.msk.bf16.vlgmr.msra.gmra.mxu1 %vm882_vm2, %v725_v32  ;;  %v779_v31 = vsel %vm713_vm1, %v774_v27, %v778_v28  ;;  %v6313_v32 = vld [vmem:[%s11749_s21 + $0x100] sm:$0xf]  ;;  %v7945_v0 = vld [vmem:[%s11749_s21 + $0xd4] sm:$0xf0]  ;;  %v7944_v1 = vld [vmem:[%s11749_s21 + $0xd4] sm:$0xf]  ;;  %v781_v6 = vunpack.c.l.b16 %v6129_v62 }
  0x49   : > { %6255 = vmatmul.msk.bf16.vlgmr.msra.gmra.mxu2 %vm882_vm2, %v8285_v18  ;;  %6263 = vmatmul.msk.bf16.vlgmr.msra.gmra.mxu3 %vm882_vm2, %v8285_v18  ;;  %v1338_v18 = vsel %vm907_vm0, %v1299_v9, 0  ;;  %v6314_v39 = vor.u32 %v7951_v34, %v6313_v32  ;;  %v789_v60 = vor.u32 %v788_v55, %v784_v54  ;;  %v6291_v3 = vld [vmem:[%s11749_s21 + $0xd8] sm:$0xf0]  ;;  %v8293_v14 = vld [vmem:[%s8724_s0] sm:$0xf0]  ;;  %vm4585_vm0 = vcmask 261120  }
  0x4a   : > { %1344 = vmatpush.bf16.msrb.mxu0 %v1338_v18  ;;  %1393 = vmatpush.bf16.msrb.mxu1 %v1341_v20  ;;  %v6294_v7 = vor.u32 %v7944_v1, %v6291_v3  ;;  %v8895_v8 = vpack.c.b16 %v781_v6, %v781_v6  ;;  %v8294_v15 = vld [vmem:[%s8724_s0] sm:$0xe]  ;;  %v1206_v20 = vrot.slane %v8731_v19, 1  ;;  %v8343_v38 = vld [vmem:[%s8724_s0 + $0x14] sm:$0xe] }
  0x4b   : > { %v8344_v45 = vor.u32 %v8343_v38, %v8746_v37  ;;  %v8296_v1 = vld [vmem:[%s8724_s0 + $0x28] sm:$0xf0] }
  0x4c   : > { %v799_v10 = vshll.u32 %v8895_v8, 16 }
  0x4e   : > { %1345 = vmatpush.bf16.msrb.mxu0 %v6330_v21  ;;  %1394 = vmatpush.bf16.msrb.mxu1 %v6334_v22  ;;  %v801_v12 = vrot.slane %v799_v10, 1 }
  0x52   : > { %1346 = vmatpush.bf16.msrb.mxu0 %v6322_v29  ;;  %1395 = vmatpush.bf16.msrb.mxu1 %v6326_v30 }
  0x56   : > { %1347 = vmatpush.bf16.msrb.mxu0 %v6314_v39 }
  0x58   : > { %6192 = vmatmul.msk.bf16.gmra.mxu0 %vm882_vm2, %v733_v40  ;;  %6200 = vmatmul.msk.bf16.gmra.mxu1 %vm882_vm2, %v733_v40  ;;  %v6315_v40 = vld [vmem:[%s11749_s21 + $0x108] sm:$0xf0] }
  0x59   : > { %6256 = vmatmul.msk.bf16.gmra.mxu2 %vm882_vm2, %v8731_v19  ;;  %6264 = vmatmul.msk.bf16.gmra.mxu3 %vm882_vm2, %v8731_v19  ;;  %v6318_v42 = vor.u32 %v7950_v35, %v6315_v40  ;;  %v1208_v19 = vrot.slane %v8740_v33, 1 }
  0x5a   : > { %1348 = vmatpush.bf16.msrb.mxu0 %v6306_v46  ;;  %v1213_v46 = vrot.slane %v8344_v45, 1 }
  0x5b   : > { %1396 = vmatpush.bf16.msrb.mxu1 %v6318_v42  ;;  %v1209_v35 = vsel %vm1204_vm3, %v1206_v20, %v1208_v19 }
  0x5c   : > { %v1215_v53 = vsel %vm1204_vm3, %v1213_v46, %v1214_v47 }
  0x5f   : > { %1397 = vmatpush.bf16.msrb.mxu1 %v6310_v48 }
  0x63   : > { %1398 = vmatpush.bf16.msrb.mxu1 %v6302_v59  ;;  %v1216_v59 = vrot.slane %v8765_v51, 1 }
  0x67   : > { %1399 = vmatpush.bf16.msrb.mxu1 %v6294_v7 }
  0x68   : > { %6193 = vmatmul.msk.bf16.gmra.mxu0 %vm882_vm2, %v748_v49  ;;  %6201 = vmatmul.msk.bf16.gmra.mxu1 %vm882_vm2, %v748_v49  ;;  %v6297_v49 = vld [vmem:[%s11749_s21 + $0xe0] sm:$0xf] }
  0x69   : > { %6257 = vmatmul.msk.bf16.gmra.mxu2 %vm882_vm2, %v6099_v36  ;;  %6265 = vmatmul.msk.bf16.gmra.mxu3 %vm882_vm2, %v6099_v36  ;;  %v8839_v36 = vld [vmem:[%s8724_s0 + $0x44] sm:$0xff] }
  0x6a   : > { %v795_v9 = vshrl.u32 %v8839_v36, 16 }
  0x78   : > { %6194 = vmatmul.msk.bf16.gmra.mxu0 %vm882_vm2, %v756_v56  ;;  %6202 = vmatmul.msk.bf16.gmra.mxu1 %vm882_vm2, %v756_v56  ;;  %v791_v56 = vshll.u32 %v8839_v36, 16 }
  0x79   : > { %6258 = vmatmul.msk.bf16.gmra.mxu2 %vm882_vm2, %v8756_v41  ;;  %6266 = vmatmul.msk.bf16.gmra.mxu3 %vm882_vm2, %v8756_v41 }
  0x7a   : > { %v793_v61 = vrot.slane %v791_v56, 1 }
  0x7c   : > { %v794_v4 = vsel %vm713_vm1, %v789_v60, %v793_v61  ;;  %v797_v11 = vor.u32 %v795_v9, %v793_v61 }
  0x7e   : > { %v802_v13 = vsel %vm713_vm1, %v797_v11, %v801_v12  ;;  %v1222_v12 = vrot.slane %v8778_v58, 1 }
  0x88   : > { %6195 = vmatmul.msk.bf16.gmra.mxu0 %vm882_vm2, %v771_v2  ;;  %6203 = vmatmul.msk.bf16.gmra.mxu1 %vm882_vm2, %v771_v2  ;;  %v6290_v2 = vor.u32 %v7945_v0, %v6289_v63  ;;  %v1217_v0 = vsel %vm1204_vm3, %v1214_v47, %v1216_v59 }
  0x89   : > { %6259 = vmatmul.msk.bf16.gmra.mxu2 %vm882_vm2, %v8292_v57  ;;  %6267 = vmatmul.msk.bf16.gmra.mxu3 %vm882_vm2, %v8292_v57  ;;  %v6298_v57 = vor.u32 %v7947_v50, %v6297_v49 }
  0x8b   : > { %1349 = vmatpush.bf16.msrb.mxu0 %v6298_v57 }
  0x8f   : > { %1350 = vmatpush.bf16.msrb.mxu0 %v6290_v2  ;;  %v8297_v2 = vld [vmem:[%s8724_s0 + $0x28] sm:$0xe] }
  0x90   : > { %v8298_v10 = vor.u32 %v8297_v2, %v8296_v1  ;;  %v1473_v2 = vld [vmem:[%s11752_s4] sm:$0x3]  ;;  %s11755_s4 = sld [smem:[#allocation25_spill]] }
  0x92   : > { %v1221_v11 = vrot.slane %v8298_v10, 1 }
  0x98   : > { %6196 = vmatmul.msk.bf16.gmra.mxu0 %vm882_vm2, %v779_v31  ;;  %6204 = vmatmul.msk.bf16.gmra.mxu1 %vm882_vm2, %v779_v31 }
  0x99   : > { %6260 = vmatmul.msk.bf16.gmra.mxu2 %vm882_vm2, %v8778_v58  ;;  %6268 = vmatmul.msk.bf16.gmra.mxu3 %vm882_vm2, %v8778_v58 }
  0xa8   : > { %6197 = vmatmul.msk.bf16.gmra.mxu0 %vm882_vm2, %v794_v4  ;;  %6205 = vmatmul.msk.bf16.gmra.mxu1 %vm882_vm2, %v794_v4 }
  0xa9   : > { %6261 = vmatmul.msk.bf16.gmra.mxu2 %vm882_vm2, %v8807_v16  ;;  %6269 = vmatmul.msk.bf16.gmra.mxu3 %vm882_vm2, %v8807_v16  ;;  %v8295_v16 = vor.u32 %v8294_v15, %v8293_v14 }
  0xab   : > { %v1205_v18 = vrot.slane %v8295_v16, 1 }
  0xad   : > { %v1207_v23 = vsel %vm1204_vm3, %v1205_v18, %v1206_v20  ;;  %v1223_v18 = vsel %vm1204_vm3, %v1221_v11, %v1222_v12 }
  0xb8   : > { %6198 = vmatmul.msk.bf16.gmra.mxu0 %vm882_vm2, %v802_v13  ;;  %6206 = vmatmul.msk.bf16.gmra.mxu1 %vm882_vm2, %v802_v13 }
  0xb9   : > { %6262 = vmatmul.msk.bf16.gmra.mxu2 %vm882_vm2, %v8839_v36  ;;  %6270 = vmatmul.msk.bf16.gmra.mxu3 %vm882_vm2, %v8839_v36 }
  0xc5   : > { %v923_v21 = vpop.f32.mrf.mxu0  ;;  %v972_v22 = vpop.f32.mrf.mxu1 }
  0xc8   : > { %6335 = vmatmul.msk.bf16.vlgmr.msrb.gmra.mxu0 %vm882_vm2, %v1207_v23  ;;  %6343 = vmatmul.msk.bf16.vlgmr.msrb.gmra.mxu1 %vm882_vm2, %v1207_v23 }
  0xcc   : > { %v1108_v24 = vpop.f32.mrf.mxu2  ;;  %v1157_v25 = vpop.f32.mrf.mxu3 }
  0xcd   : > { %v8912_v26 = vadd.f32 %v1108_v24, %v923_v21  ;;  %v8914_v27 = vadd.f32 %v1157_v25, %v972_v22  ;;  %v8916_v28 = vpop.f32.mrf.mxu0  ;;  %v8918_v29 = vpop.f32.mrf.mxu1  ;;  %v1224_v25 = vrot.slane %v8790_v5, 1  ;;  %v1230_v5 = vrot.slane %v8839_v36, 1 }
  0xd4   : > { %v8921_v30 = vpop.f32.mrf.mxu2  ;;  %v8923_v31 = vpop.f32.mrf.mxu3 }
  0xd5   : > { %v928_v32 = vpop.f32.mrf.mxu0  ;;  %v977_v34 = vpop.f32.mrf.mxu1  ;;  %v1111_v10 = vadd.f32 %v8921_v30, %v8916_v28  ;;  %v1160_v11 = vadd.f32 %v8923_v31, %v8918_v29 }
  0xd8   : > { %6336 = vmatmul.msk.bf16.gmra.mxu0 %vm882_vm2, %v1209_v35  ;;  %6344 = vmatmul.msk.bf16.gmra.mxu1 %vm882_vm2, %v1209_v35  ;;  %v8346_v35 = vld [vmem:[%s8724_s0 + $0x3c] sm:$0xe]  ;;  %s623_s0 = sand.u32 1, %s8402_s22  }
  0xd9   : > { %s6096_s28 = sshll.u32 %s623_s0, 2 }
  0xda   : > { %s625_s1 = scalar_lea.vmem [#allocation4], %s6096_s28  ;;  %s8368_s28 = scalar_lea.hbm %s11717_s20, 8 }
  0xdb   : > { %s6030_s19 = sshll.u32 %s625_s1, 4  ;;  %s6031_s19 = int_to_ptr.vmem [resolvable:$true] %s6030_s19 }
  0xdc   : > { %v1113_v39 = vpop.f32.mrf.mxu2  ;;  %v1162_v40 = vpop.f32.mrf.mxu3 }
  0xdd   : > { %v8929_v42 = vadd.f32 %v1113_v39, %v928_v32  ;;  %v8931_v43 = vadd.f32 %v1162_v40, %v977_v34  ;;  %v8933_v33 = vpop.f32.mrf.mxu0  ;;  %v8935_v44 = vpop.f32.mrf.mxu1  ;;  %v1225_v34 = vsel %vm1204_vm3, %v1222_v12, %v1224_v25  ;;  %v8347_v40 = vor.u32 %v8346_v35, %v8810_v17 }
  0xdf   : > { %v1229_v45 = vrot.slane %v8347_v40, 1 }
  0xe4   : > { %v8939_v48 = vpop.f32.mrf.mxu2  ;;  %v8941_v49 = vpop.f32.mrf.mxu3 }
  0xe5   : > { %v933_v50 = vpop.f32.mrf.mxu0  ;;  %v982_v52 = vpop.f32.mrf.mxu1 }
  0xe8   : > { %6337 = vmatmul.msk.bf16.gmra.mxu0 %vm882_vm2, %v1215_v53  ;;  %6345 = vmatmul.msk.bf16.gmra.mxu1 %vm882_vm2, %v1215_v53 }
  0xec   : > { %v1118_v54 = vpop.f32.mrf.mxu2  ;;  %v1167_v55 = vpop.f32.mrf.mxu3 }
  0xed   : > { %v8946_v37 = vadd.f32 %v1118_v54, %v933_v50  ;;  %v8948_v56 = vadd.f32 %v1167_v55, %v982_v52  ;;  %v8950_v41 = vpop.f32.mrf.mxu0  ;;  %v8952_v57 = vpop.f32.mrf.mxu1  ;;  %v1231_v50 = vsel %vm1204_vm3, %v1229_v45, %v1230_v5  ;;  %v1232_v54 = vrot.slane %v8895_v8, 1 }
  0xef   : > { %v1233_v36 = vsel %vm1204_vm3, %v1230_v5, %v1232_v54  ;;  %v1165_v54 = vadd.f32 %v8941_v49, %v8935_v44 }
  0xf4   : > { %v8955_v60 = vpop.f32.mrf.mxu2  ;;  %v8957_v61 = vpop.f32.mrf.mxu3 }
  0xf5   : > { %v938_v62 = vpop.f32.mrf.mxu0  ;;  %v987_v63 = vpop.f32.mrf.mxu1 }
  0xf8   : > { %6338 = vmatmul.msk.bf16.gmra.mxu0 %vm882_vm2, %v1217_v0  ;;  %6346 = vmatmul.msk.bf16.gmra.mxu1 %vm882_vm2, %v1217_v0 }
  0xfc   : > { %v1123_v3 = vpop.f32.mrf.mxu2  ;;  %v1172_v4 = vpop.f32.mrf.mxu3 }
  0xfd   : > { %v8964_v6 = vadd.f32 %v1123_v3, %v938_v62  ;;  %v8966_v7 = vadd.f32 %v1172_v4, %v987_v63  ;;  %v8968_v51 = vpop.f32.mrf.mxu0  ;;  %v8970_v9 = vpop.f32.mrf.mxu1  ;;  %v9031_v3 = vperm.slane %v1473_v2, 0  ;;  %v9033_v4 = vperm.slane %v1473_v2, 1 }
 0x104   : > { %v8973_v13 = vpop.f32.mrf.mxu2  ;;  %v8975_v14 = vpop.f32.mrf.mxu3 }
 0x105   : > { %v943_v15 = vpop.f32.mrf.mxu0  ;;  %v992_v16 = vpop.f32.mrf.mxu1 }
 0x108   : > { %6339 = vmatmul.msk.bf16.gmra.mxu0 %vm882_vm2, %v1223_v18  ;;  %6347 = vmatmul.msk.bf16.gmra.mxu1 %vm882_vm2, %v1223_v18 }
 0x10c   : > { %v1128_v20 = vpop.f32.mrf.mxu2  ;;  %v1177_v21 = vpop.f32.mrf.mxu3 }
 0x10d   : > { %v8980_v22 = vadd.f32 %v1128_v20, %v943_v15  ;;  %v8982_v23 = vadd.f32 %v1177_v21, %v992_v16  ;;  %v8984_v58 = vpop.f32.mrf.mxu0  ;;  %v8986_v24 = vpop.f32.mrf.mxu1 }
 0x115   : > { %v8989_v19 = vpop.f32.mrf.mxu0  ;;  %v8991_v32 = vpop.f32.mrf.mxu1 }
 0x118   : > { %6340 = vmatmul.msk.bf16.gmra.mxu0 %vm882_vm2, %v1225_v34  ;;  %6348 = vmatmul.msk.bf16.gmra.mxu1 %vm882_vm2, %v1225_v34 }
 0x11d   : > { %v8997_v38 = vpop.f32.mrf.mxu0  ;;  %v8999_v39 = vpop.f32.mrf.mxu1 }
 0x125   : > { %v9003_v46 = vpop.f32.mrf.mxu0  ;;  %v9005_v47 = vpop.f32.mrf.mxu1 }
 0x128   : > { %6341 = vmatmul.msk.bf16.gmra.mxu0 %vm882_vm2, %v1231_v50  ;;  %6349 = vmatmul.msk.bf16.gmra.mxu1 %vm882_vm2, %v1231_v50  ;;  %v1116_v50 = vadd.f32 %v8939_v48, %v8933_v33 }
 0x12d   : > { %v9010_v52 = vpop.f32.mrf.mxu0  ;;  %v9012_v53 = vpop.f32.mrf.mxu1 }
 0x135   : > { %v9015_v17 = vpop.f32.mrf.mxu0  ;;  %v9017_v55 = vpop.f32.mrf.mxu1 }
 0x138   : > { %6342 = vmatmul.msk.bf16.gmra.mxu0 %vm882_vm2, %v1233_v36  ;;  %6350 = vmatmul.msk.bf16.gmra.mxu1 %vm882_vm2, %v1233_v36 }
 0x13d   : > { %v9022_v59 = vpop.f32.mrf.mxu0  ;;  %v9024_v62 = vpop.f32.mrf.mxu1 }
 0x145   : > { %v1352_v63 = vpop.f32.mrf.mxu0  ;;  %v1401_v0 = vpop.f32.mrf.mxu1 }
 0x146   : > { %v1441_v1 = vadd.f32 %v1352_v63, %v8912_v26  ;;  %v1442_v8 = vadd.f32 %v1401_v0, %v8914_v27 }
 0x148   : > { %v1479_v26 = vadd.f32 %v9031_v3, %v1441_v1  ;;  %v1480_v27 = vadd.f32 %v9033_v4, %v1442_v8 }
 0x14a   : > { %v1511_v25 = vmax.f32 %v1479_v26, 0.0  ;;  %v1512_v34 = vmax.f32 %v1480_v27, 0.0 }
 0x14d   : > { %v1354_v12 = vpop.f32.mrf.mxu0  ;;  %v1403_v15 = vpop.f32.mrf.mxu1 }
 0x14e   : > { %v1443_v16 = vadd.f32 %v1354_v12, %v1111_v10  ;;  %v1444_v18 = vadd.f32 %v1403_v15, %v1160_v11 }
 0x150   : > { %v1481_v20 = vadd.f32 %v9031_v3, %v1443_v16  ;;  %v1482_v21 = vadd.f32 %v9033_v4, %v1444_v18  ;;  %v1121_v16 = vadd.f32 %v8955_v60, %v8950_v41  ;;  %v1170_v18 = vadd.f32 %v8957_v61, %v8952_v57 }
 0x152   : > { %v1513_v35 = vmax.f32 %v1481_v20, 0.0  ;;  %v1514_v40 = vmax.f32 %v1482_v21, 0.0 }
 0x154   : > { %v9043_v28 = vpack.c.bf16 %v1513_v35, %v1511_v25  ;;  %v9045_v30 = vpack.c.bf16 %v1514_v40, %v1512_v34 }
 0x155   : > { %v1357_v29 = vpop.f32.mrf.mxu0  ;;  %v1406_v31 = vpop.f32.mrf.mxu1 }
 0x156   : > { %v1445_v45 = vadd.f32 %v1357_v29, %v8929_v42  ;;  %v1446_v5 = vadd.f32 %v1406_v31, %v8931_v43 }
 0x158   : > { %v1483_v0 = vadd.f32 %v9031_v3, %v1445_v45  ;;  %v1484_v1 = vadd.f32 %v9033_v4, %v1446_v5 }
 0x15a   : > { %v1515_v11 = vmax.f32 %v1483_v0, 0.0  ;;  %v1516_v43 = vmax.f32 %v1484_v1, 0.0  ;;  %v1130_v0 = vpop.f32.mrf.mxu2  ;;  %v1179_v1 = vpop.f32.mrf.mxu3 }
 0x15d   : > { %v1359_v36 = vpop.f32.mrf.mxu0  ;;  %v1408_v63 = vpop.f32.mrf.mxu1 }
 0x15e   : > { %v1447_v8 = vadd.f32 %v1359_v36, %v1116_v50  ;;  %v1448_v2 = vadd.f32 %v1408_v63, %v1165_v54  ;;  %v1126_v36 = vadd.f32 %v8973_v13, %v8968_v51  ;;  %v1175_v63 = vadd.f32 %v8975_v14, %v8970_v9 }
 0x160   : > { %v1485_v10 = vadd.f32 %v9031_v3, %v1447_v8  ;;  %v1486_v42 = vadd.f32 %v9033_v4, %v1448_v2 }
 0x162   : > { %v1517_v12 = vmax.f32 %v1485_v10, 0.0  ;;  %v1518_v15 = vmax.f32 %v1486_v42, 0.0 }
 0x164   : > { %v9057_v33 = vpack.c.bf16 %v1517_v12, %v1515_v11  ;;  %v9059_v48 = vpack.c.bf16 %v1518_v15, %v1516_v43 }
 0x165   : > { %v1362_v44 = vpop.f32.mrf.mxu0  ;;  %v1411_v49 = vpop.f32.mrf.mxu1 }
 0x166   : > { %v1449_v26 = vadd.f32 %v1362_v44, %v8946_v37  ;;  %v1450_v27 = vadd.f32 %v1411_v49, %v8948_v56 }
 0x168   : > { %v1487_v25 = vadd.f32 %v9031_v3, %v1449_v26  ;;  %v1488_v34 = vadd.f32 %v9033_v4, %v1450_v27  ;;  %v1133_v26 = vpop.f32.mrf.mxu2  ;;  %v1182_v27 = vpop.f32.mrf.mxu3 }
 0x16a   : > { %v1519_v31 = vmax.f32 %v1487_v25, 0.0  ;;  %v1520_v56 = vmax.f32 %v1488_v34, 0.0 }
 0x16d   : > { %v1364_v20 = vpop.f32.mrf.mxu0  ;;  %v1413_v21 = vpop.f32.mrf.mxu1 }
 0x16e   : > { %v1451_v35 = vadd.f32 %v1364_v20, %v1121_v16  ;;  %v1452_v40 = vadd.f32 %v1413_v21, %v1170_v18 }
 0x170   : > { %v1489_v29 = vadd.f32 %v9031_v3, %v1451_v35  ;;  %v1490_v37 = vadd.f32 %v9033_v4, %v1452_v40  ;;  %v1135_v25 = vpop.f32.mrf.mxu2  ;;  %v1184_v34 = vpop.f32.mrf.mxu3 }
 0x172   : > { %v1521_v45 = vmax.f32 %v1489_v29, 0.0  ;;  %v1522_v5 = vmax.f32 %v1490_v37, 0.0 }
 0x174   : > { %v9071_v41 = vpack.c.bf16 %v1521_v45, %v1519_v31  ;;  %v9073_v60 = vpack.c.bf16 %v1522_v5, %v1520_v56 }
 0x175   : > { %v1367_v57 = vpop.f32.mrf.mxu0  ;;  %v1416_v61 = vpop.f32.mrf.mxu1 }
 0x176   : > { %v1453_v50 = vadd.f32 %v1367_v57, %v8964_v6  ;;  %v1454_v54 = vadd.f32 %v1416_v61, %v8966_v7 }
 0x178   : > { %v1491_v10 = vadd.f32 %v9031_v3, %v1453_v50  ;;  %v1492_v42 = vadd.f32 %v9033_v4, %v1454_v54  ;;  %v1138_v29 = vpop.f32.mrf.mxu2  ;;  %v1187_v37 = vpop.f32.mrf.mxu3 }
 0x17a   : > { %v1523_v12 = vmax.f32 %v1491_v10, 0.0  ;;  %v1524_v15 = vmax.f32 %v1492_v42, 0.0 }
 0x17d   : > { %v1369_v8 = vpop.f32.mrf.mxu0  ;;  %v1418_v2 = vpop.f32.mrf.mxu1 }
 0x17e   : > { %v1455_v11 = vadd.f32 %v1369_v8, %v1126_v36  ;;  %v1456_v43 = vadd.f32 %v1418_v2, %v1175_v63 }
 0x180   : > { %v1493_v6 = vadd.f32 %v9031_v3, %v1455_v11  ;;  %v1494_v7 = vadd.f32 %v9033_v4, %v1456_v43  ;;  %v1140_v45 = vpop.f32.mrf.mxu2  ;;  %v1189_v5 = vpop.f32.mrf.mxu3 }
 0x181   : > { %v1141_v11 = vadd.f32 %v1140_v45, %v9010_v52  ;;  %v1190_v43 = vadd.f32 %v1189_v5, %v9012_v53  ;;  %v1136_v52 = vadd.f32 %v1135_v25, %v8997_v38  ;;  %v1185_v53 = vadd.f32 %v1184_v34, %v8999_v39 }
 0x182   : > { %v1525_v51 = vmax.f32 %v1493_v6, 0.0  ;;  %v1526_v13 = vmax.f32 %v1494_v7, 0.0 }
 0x184   : > { %v9085_v44 = vpack.c.bf16 %v1525_v51, %v1523_v12  ;;  %v9087_v9 = vpack.c.bf16 %v1526_v13, %v1524_v15  ;;  %v1131_v12 = vadd.f32 %v1130_v0, %v8984_v58  ;;  %v1180_v15 = vadd.f32 %v1179_v1, %v8986_v24 }
 0x185   : > { %v1372_v14 = vpop.f32.mrf.mxu0  ;;  %v1421_v49 = vpop.f32.mrf.mxu1  ;;  %v1139_v51 = vadd.f32 %v1138_v29, %v9003_v46  ;;  %v1188_v13 = vadd.f32 %v1187_v37, %v9005_v47 }
 0x186   : > { %v9090_v16 = vadd.f32 %v1372_v14, %v8980_v22  ;;  %v9093_v18 = vadd.f32 %v1421_v49, %v8982_v23 }
 0x188   : > { %v1143_v54 = vpop.f32.mrf.mxu2  ;;  %v1192_v36 = vpop.f32.mrf.mxu3 }
 0x189   : > { %v1144_v8 = vadd.f32 %v1143_v54, %v9015_v17  ;;  %v1193_v2 = vadd.f32 %v1192_v36, %v9017_v55 }
 0x18d   : > { %v1374_v20 = vpop.f32.mrf.mxu0  ;;  %v1423_v21 = vpop.f32.mrf.mxu1 }
 0x190   : > { %v1145_v10 = vpop.f32.mrf.mxu2  ;;  %v1194_v42 = vpop.f32.mrf.mxu3 }
 0x191   : > { %v1146_v17 = vadd.f32 %v1145_v10, %v9022_v59  ;;  %v1195_v55 = vadd.f32 %v1194_v42, %v9024_v62  ;;  %v1134_v59 = vadd.f32 %v1133_v26, %v8989_v19  ;;  %v1183_v62 = vadd.f32 %v1182_v27, %v8991_v32 }
 0x192   : > { %v1459_v27 = vadd.f32 %v1374_v20, %v1131_v12  ;;  %v1495_v12 = vadd.f32 %v9031_v3, %v9090_v16  ;;  %v7963_v16 = vld [vmem:[%s11754_s26 + $0x3c] sm:$0xff] }
 0x195   : > { %v1377_v35 = vpop.f32.mrf.mxu0  ;;  %v1426_v40 = vpop.f32.mrf.mxu1 }
 0x196   : > { %v1461_v37 = vadd.f32 %v1377_v35, %v1134_v59 }
 0x198   : > { %v1499_v35 = vadd.f32 %v9031_v3, %v1461_v37  ;;  %v7995_v37 = vld [vmem:[%s11755_s4 + $0xf4] sm:$0xf0] }
 0x19d   : > { %v1379_v31 = vpop.f32.mrf.mxu0  ;;  %v1428_v56 = vpop.f32.mrf.mxu1 }
 0x19e   : > { %v1463_v1 = vadd.f32 %v1379_v31, %v1136_v52  ;;  %v1464_v29 = vadd.f32 %v1428_v56, %v1185_v53  ;;  %v1460_v31 = vadd.f32 %v1423_v21, %v1180_v15  ;;  %v1496_v15 = vadd.f32 %v9033_v4, %v9093_v18 }
 0x19f   : > { %v1527_v52 = vmax.f32 %v1495_v12, 0.0 }
 0x1a0   : > { %v1501_v56 = vadd.f32 %v9031_v3, %v1463_v1  ;;  %v1502_v36 = vadd.f32 %v9033_v4, %v1464_v29  ;;  %v1498_v20 = vadd.f32 %v9033_v4, %v1460_v31  ;;  %v1528_v53 = vmax.f32 %v1496_v15, 0.0 }
 0x1a5   : > { %v1382_v57 = vpop.f32.mrf.mxu0  ;;  %v1431_v61 = vpop.f32.mrf.mxu1 }
 0x1a6   : > { %v1465_v45 = vadd.f32 %v1382_v57, %v1139_v51  ;;  %v1466_v5 = vadd.f32 %v1431_v61, %v1188_v13  ;;  %v1462_v57 = vadd.f32 %v1426_v40, %v1183_v62  ;;  %v1531_v51 = vmax.f32 %v1499_v35, 0.0  ;;  %v6444_v35 = vld [vmem:[%s11755_s4 + $0x68] sm:$0xf0] }
 0x1a8   : > { %v1503_v61 = vadd.f32 %v9031_v3, %v1465_v45  ;;  %v1500_v40 = vadd.f32 %v9033_v4, %v1462_v57  ;;  %v7978_v57 = vld [vmem:[%s11755_s4 + $0x74] sm:$0xf] }
 0x1aa   : > { %v1535_v10 = vmax.f32 %v1503_v61, 0.0  ;;  %v1532_v13 = vmax.f32 %v1500_v40, 0.0  ;;  %v6452_v61 = vld [vmem:[%s11755_s4 + $0x78] sm:$0xf0] }
 0x1ad   : > { %v1384_v50 = vpop.f32.mrf.mxu0  ;;  %v1433_v22 = vpop.f32.mrf.mxu1 }
 0x1ae   : > { %v1467_v14 = vadd.f32 %v1384_v50, %v1141_v11  ;;  %v1468_v49 = vadd.f32 %v1433_v22, %v1190_v43  ;;  %v1504_v50 = vadd.f32 %v9033_v4, %v1466_v5  ;;  %v1497_v11 = vadd.f32 %v9031_v3, %v1459_v27 }
 0x1b0   : > { %v1505_v38 = vadd.f32 %v9031_v3, %v1467_v14  ;;  %v1506_v39 = vadd.f32 %v9033_v4, %v1468_v49  ;;  %v1536_v42 = vmax.f32 %v1504_v50, 0.0  ;;  %v1529_v14 = vmax.f32 %v1497_v11, 0.0  ;;  %v6508_v11 = vld [vmem:[%s11755_s4 + $0xe8] sm:$0xf0] }
 0x1b1   : > { %v1530_v49 = vmax.f32 %v1498_v20, 0.0  ;;  %v6434_v20 = vld [vmem:[%s11755_s4 + $0x50] sm:$0xf] }
 0x1b2   : > { %v1551_v45 = vpack.c.bf16 %v1529_v14, %v1527_v52  ;;  %v6500_v14 = vld [vmem:[%s11755_s4 + $0xd8] sm:$0xf0] }
 0x1b3   : > { %v1552_v5 = vpack.c.bf16 %v1530_v49, %v1528_v53 }
 0x1b5   : > { %v1387_v23 = vpop.f32.mrf.mxu0  ;;  %v1436_v63 = vpop.f32.mrf.mxu1 }
 0x1b6   : > { %v1469_v6 = vadd.f32 %v1387_v23, %v1144_v8  ;;  %v1470_v7 = vadd.f32 %v1436_v63, %v1193_v2  ;;  %v1537_v8 = vmax.f32 %v1505_v38, 0.0  ;;  %v1538_v2 = vmax.f32 %v1506_v39, 0.0  ;;  %v6450_v38 = vld [vmem:[%s11755_s4 + $0x70] sm:$0xf]  ;;  %v7979_v39 = vld [vmem:[%s11755_s4 + $0x74] sm:$0xf0] }
 0x1b8   : > { %v1507_v24 = vadd.f32 %v9031_v3, %v1469_v6  ;;  %v1508_v46 = vadd.f32 %v9033_v4, %v1470_v7  ;;  %v1555_v21 = vpack.c.bf16 %v1537_v8, %v1535_v10  ;;  %v1556_v43 = vpack.c.bf16 %v1538_v2, %v1536_v42  ;;  %v7993_v8 = vld [vmem:[%s11755_s4 + $0xe4] sm:$0xf0]  ;;  %v7976_v2 = vld [vmem:[%s11755_s4 + $0x64] sm:$0xf] }
 0x1b9   : > { %v1533_v6 = vmax.f32 %v1501_v56, 0.0  ;;  %v1534_v7 = vmax.f32 %v1502_v36, 0.0  ;;  %v6442_v56 = vld [vmem:[%s11755_s4 + $0x60] sm:$0xf]  ;;  %v7977_v36 = vld [vmem:[%s11755_s4 + $0x64] sm:$0xf0]  ;;  %v6447_v10 = vor.u32 %v7976_v2, %v6444_v35 }
 0x1ba   : > { %v1539_v22 = vmax.f32 %v1507_v24, 0.0  ;;  %v1540_v19 = vmax.f32 %v1508_v46, 0.0  ;;  %v7992_v42 = vld [vmem:[%s11755_s4 + $0xe4] sm:$0xf] }
 0x1bd   : > { %v1389_v54 = vpop.f32.mrf.mxu0  ;;  %v1438_v58 = vpop.f32.mrf.mxu1 }
 0x1be   : > { %v1471_v0 = vadd.f32 %v1389_v54, %v1146_v17  ;;  %v1472_v47 = vadd.f32 %v1438_v58, %v1195_v55  ;;  %v1553_v17 = vpack.c.bf16 %v1533_v6, %v1531_v51  ;;  %v1554_v55 = vpack.c.bf16 %v1534_v7, %v1532_v13  ;;  %v6375_v58 = vld [vmem:[%s11754_s26 + $0x44] sm:$0xf]  ;;  %v6498_v6 = vld [vmem:[%s11755_s4 + $0xd0] sm:$0xf]  ;;  %v7991_v7 = vld [vmem:[%s11755_s4 + $0xd4] sm:$0xf0] }
 0x1bf   : > { %v1689_v24 = vunpack.c.l.b16 %v6375_v58  ;;  %v6499_v15 = vor.u32 %v7991_v7, %v6498_v6  ;;  %v7974_v51 = vld [vmem:[%s11755_s4 + $0x54] sm:$0xf]  ;;  %v6436_v13 = vld [vmem:[%s11755_s4 + $0x58] sm:$0xf0]  ;;  %v7971_v58 = vld [vmem:[%s11755_s4 + $0x34] sm:$0xf0] }
 0x1c0   : > { %v1509_v25 = vadd.f32 %v9031_v3, %v1471_v0  ;;  %v1510_v34 = vadd.f32 %v9033_v4, %v1472_v47  ;;  %v7956_v3 = vld [vmem:[%s11753_s24] sm:$0xff]  ;;  %v7957_v4 = vld [vmem:[%s11754_s26 + $0x8] sm:$0xff]  ;;  %s6028_s24 = scalar_lea.hbm %s11717_s20, %s8654_s29 }
 0x1c1   : > { %v1694_v47 = vpack.c.b16 %v1689_v24, %v1689_v24  ;;  %v6482_v24 = vld [vmem:[%s11755_s4 + $0xb0] sm:$0xf]  ;;  %s6032_s2 = sshll.u32 %s6028_s24, 4  ;;  %s6033_s2 = int_to_ptr.hbm [resolvable:$true] %s6032_s2 }
 0x1c2   : > { %v1541_v26 = vmax.f32 %v1509_v25, 0.0  ;;  %v1542_v32 = vmax.f32 %v1510_v34, 0.0  ;;  %v6514_v25 = vld [vmem:[%s11755_s4 + $0xf0] sm:$0xf]  ;;  %v6451_v34 = vor.u32 %v7979_v39, %v6450_v38 }
 0x1c3   : > { %v6515_v50 = vor.u32 %v7995_v37, %v6514_v25  ;;  %v7970_v25 = vld [vmem:[%s11755_s4 + $0x34] sm:$0xf] }
 0x1c4   : > { %v1557_v23 = vpack.c.bf16 %v1541_v26, %v1539_v22  ;;  %v1558_v63 = vpack.c.bf16 %v1542_v32, %v1540_v19  ;;  %v6455_v22 = vor.u32 %v7978_v57, %v6452_v61  ;;  %v7994_v19 = vld [vmem:[%s11755_s4 + $0xf4] sm:$0xf]  ;;  %v6516_v26 = vld [vmem:[%s11755_s4 + $0xf8] sm:$0xf0]  ;;  %1986 = vmatpush.bf16.msra.mxu0 %v6451_v34 }
 0x1c5   : > { %v6519_v32 = vor.u32 %v7994_v19, %v6516_v26  ;;  %2019 = vmatpush.bf16.msra.mxu1 %v6515_v50  ;;  %v6420_v34 = vld [vmem:[%s11755_s4 + $0x38] sm:$0xf0]  ;;  %v7986_v37 = vld [vmem:[%s11755_s4 + $0xb4] sm:$0xf]  ;;  %v6410_v26 = vld [vmem:[%s11755_s4 + $0x20] sm:$0xf] }
 0x1c6   : > { %1596 = vmatpush.bf16.msrb.mxu2 %v1557_v23  ;;  %1629 = vmatpush.bf16.msrb.mxu3 %v1558_v63  ;;  %v6423_v57 = vor.u32 %v7970_v25, %v6420_v34  ;;  %v6484_v61 = vld [vmem:[%s11755_s4 + $0xb8] sm:$0xf0] }
 0x1c7   : > { %v6487_v50 = vor.u32 %v7986_v37, %v6484_v61 }
 0x1ca   : > { %1597 = vmatpush.bf16.msrb.mxu2 %v1555_v21  ;;  %1630 = vmatpush.bf16.msrb.mxu3 %v1556_v43 }
 0x1ce   : > { %1598 = vmatpush.bf16.msrb.mxu2 %v1553_v17  ;;  %1631 = vmatpush.bf16.msrb.mxu3 %v1554_v55 }
 0x1d2   : > { %1599 = vmatpush.bf16.msrb.mxu2 %v1551_v45  ;;  %1632 = vmatpush.bf16.msrb.mxu3 %v1552_v5 }
 0x1d6   : > { %1600 = vmatpush.bf16.msrb.mxu2 %v9085_v44  ;;  %1633 = vmatpush.bf16.msrb.mxu3 %v9087_v9 }
 0x1da   : > { %1601 = vmatpush.bf16.msrb.mxu2 %v9071_v41  ;;  %1634 = vmatpush.bf16.msrb.mxu3 %v9073_v60 }
 0x1de   : > { %1602 = vmatpush.bf16.msrb.mxu2 %v9057_v33  ;;  %1635 = vmatpush.bf16.msrb.mxu3 %v9059_v48 }
 0x1e2   : > { %1603 = vmatpush.bf16.msrb.mxu2 %v9043_v28  ;;  %1636 = vmatpush.bf16.msrb.mxu3 %v9045_v30 }
 0x1e5   : > { %1604 = vmatmul.bf16.vlgmr.msrb.gmra.mxu2 %v7956_v3  ;;  %1637 = vmatmul.bf16.vlgmr.msrb.gmra.mxu3 %v7956_v3  ;;  %v6490_v3 = vld [vmem:[%s11755_s4 + $0xc0] sm:$0xf] }
 0x1e6   : > { %1700 = vmatpush.bf16.msra.mxu2 %v1557_v23  ;;  %1733 = vmatpush.bf16.msra.mxu3 %v1558_v63  ;;  %v6506_v23 = vld [vmem:[%s11755_s4 + $0xe0] sm:$0xf]  ;;  %v6443_v63 = vor.u32 %v7977_v36, %v6442_v56 }
 0x1e7   : > { %v6507_v40 = vor.u32 %v7993_v8, %v6506_v23  ;;  %v6474_v56 = vld [vmem:[%s11755_s4 + $0xa0] sm:$0xf]  ;;  %v7985_v23 = vld [vmem:[%s11755_s4 + $0xa4] sm:$0xf0]  ;;  %v6412_v8 = vld [vmem:[%s11755_s4 + $0x28] sm:$0xf0] }
 0x1e8   : > { %1987 = vmatpush.bf16.msra.mxu0 %v6443_v63  ;;  %v7968_v63 = vld [vmem:[%s11755_s4 + $0x24] sm:$0xf]  ;;  %v6475_v2 = vor.u32 %v7985_v23, %v6474_v56 }
 0x1e9   : > { %2020 = vmatpush.bf16.msra.mxu1 %v6507_v40  ;;  %v6415_v35 = vor.u32 %v7968_v63, %v6412_v8  ;;  %v7984_v40 = vld [vmem:[%s11755_s4 + $0xa4] sm:$0xf] }
 0x1ea   : > { %1701 = vmatpush.bf16.msra.mxu2 %v1555_v21  ;;  %1734 = vmatpush.bf16.msra.mxu3 %v1556_v43  ;;  %v6511_v21 = vor.u32 %v7992_v42, %v6508_v11  ;;  %v7975_v43 = vld [vmem:[%s11755_s4 + $0x54] sm:$0xf0]  ;;  %v6402_v42 = vld [vmem:[%s11755_s4 + $0x10] sm:$0xf] }
 0x1eb   : > { %v6435_v12 = vor.u32 %v7975_v43, %v6434_v20  ;;  %v7967_v20 = vld [vmem:[%s11755_s4 + $0x14] sm:$0xf0] }
 0x1ec   : > { %v7983_v43 = vld [vmem:[%s11755_s4 + $0x94] sm:$0xf0]  ;;  %v6403_v6 = vor.u32 %v7967_v20, %v6402_v42  ;;  %v8026_v20 = vld [vmem:[%s11755_s4 + $0x1f4] sm:$0xf] }
 0x1ed   : > { %1988 = vmatpush.bf16.msra.mxu0 %v6435_v12  ;;  %2021 = vmatpush.bf16.msra.mxu1 %v6499_v15  ;;  %v7966_v12 = vld [vmem:[%s11755_s4 + $0x14] sm:$0xf]  ;;  %v6404_v15 = vld [vmem:[%s11755_s4 + $0x18] sm:$0xf0] }
 0x1ee   : > { %1702 = vmatpush.bf16.msra.mxu2 %v1553_v17  ;;  %1735 = vmatpush.bf16.msra.mxu3 %v1554_v55  ;;  %v7990_v17 = vld [vmem:[%s11755_s4 + $0xd4] sm:$0xf]  ;;  %v6439_v55 = vor.u32 %v7974_v51, %v6436_v13  ;;  %v6407_v13 = vor.u32 %v7966_v12, %v6404_v15  ;;  %v6602_v12 = vld [vmem:[%s11755_s4 + $0x160] sm:$0xf]  ;;  %v8009_v15 = vld [vmem:[%s11755_s4 + $0x164] sm:$0xf0] }
 0x1ef   : > { %v6503_v49 = vor.u32 %v7990_v17, %v6500_v14  ;;  %v7982_v51 = vld [vmem:[%s11755_s4 + $0x94] sm:$0xf]  ;;  %v6468_v17 = vld [vmem:[%s11755_s4 + $0x98] sm:$0xf0] }
 0x1f2   : > { %1703 = vmatpush.bf16.msra.mxu2 %v1551_v45  ;;  %1736 = vmatpush.bf16.msra.mxu3 %v1552_v5  ;;  %v6426_v45 = vld [vmem:[%s11755_s4 + $0x40] sm:$0xf]  ;;  %v7973_v5 = vld [vmem:[%s11755_s4 + $0x44] sm:$0xf0] }
 0x1f5   : > { %1609 = vmatmul.bf16.gmra.mxu2 %v7957_v4  ;;  %1642 = vmatmul.bf16.gmra.mxu3 %v7957_v4  ;;  %v6427_v4 = vor.u32 %v7973_v5, %v6426_v45  ;;  %v6394_v45 = vld [vmem:[%s11755_s4] sm:$0xf]  ;;  %v7965_v5 = vld [vmem:[%s11755_s4 + $0x4] sm:$0xf0] }
 0x1f6   : > { %1704 = vmatpush.bf16.msra.mxu2 %v9085_v44  ;;  %1737 = vmatpush.bf16.msra.mxu3 %v9087_v9  ;;  %v7958_v44 = vld [vmem:[%s11754_s26 + $0x10] sm:$0xff] }
 0x1f7   : > { %v7962_v9 = vld [vmem:[%s11754_s26 + $0x34] sm:$0xff]  ;;  %1989 = vmatpush.bf16.msra.mxu0 %v6427_v4  ;;  %v6395_v4 = vor.u32 %v7965_v5, %v6394_v45  ;;  %v6604_v45 = vld [vmem:[%s11755_s4 + $0x168] sm:$0xf0] }
 0x1fa   : > { %1705 = vmatpush.bf16.msra.mxu2 %v9071_v41  ;;  %1738 = vmatpush.bf16.msra.mxu3 %v9073_v60  ;;  %v7959_v41 = vld [vmem:[%s11754_s26 + $0x18] sm:$0xff]  ;;  %v7961_v60 = vld [vmem:[%s11754_s26 + $0x2c] sm:$0xff] }
 0x1fe   : > { %1706 = vmatpush.bf16.msra.mxu2 %v9057_v33  ;;  %1739 = vmatpush.bf16.msra.mxu3 %v9059_v48  ;;  %v1567_v33 = vld [vmem:[%s11754_s26 + $0x20] sm:$0xf] }
 0x1ff   : > { %v1585_v48 = vunpack.c.l.b16 %v1567_v33  ;;  %v6428_v33 = vld [vmem:[%s11755_s4 + $0x48] sm:$0xf0] }
 0x202   : > { %1707 = vmatpush.bf16.msra.mxu2 %v9043_v28  ;;  %1740 = vmatpush.bf16.msra.mxu3 %v9045_v30  ;;  %v1590_v28 = vpack.c.b16 %v1585_v48, %v1585_v48  ;;  %v7960_v30 = vld [vmem:[%s11754_s26 + $0x24] sm:$0xff] }
 0x205   : > { %1614 = vmatmul.bf16.gmra.mxu2 %v7958_v44  ;;  %1647 = vmatmul.bf16.gmra.mxu3 %v7958_v44  ;;  %v7989_v44 = vld [vmem:[%s11755_s4 + $0xc4] sm:$0xf0] }
 0x206   : > { %2052 = vmatpush.bf16.msrb.mxu2 %v6455_v22  ;;  %2085 = vmatpush.bf16.msrb.mxu3 %v6519_v32  ;;  %v6491_v48 = vor.u32 %v7989_v44, %v6490_v3  ;;  %v7969_v32 = vld [vmem:[%s11755_s4 + $0x24] sm:$0xf0]  ;;  %v6458_v3 = vld [vmem:[%s11755_s4 + $0x80] sm:$0xf] }
 0x207   : > { %v6411_v36 = vor.u32 %v7969_v32, %v6410_v26  ;;  %v7981_v44 = vld [vmem:[%s11755_s4 + $0x84] sm:$0xf0] }
 0x208   : > { %2022 = vmatpush.bf16.msra.mxu1 %v6491_v48  ;;  %v6459_v48 = vor.u32 %v7981_v44, %v6458_v3  ;;  %v6668_v44 = vld [vmem:[%s11755_s4 + $0x1e8] sm:$0xf0] }
 0x20a   : > { %2053 = vmatpush.bf16.msrb.mxu2 %v6447_v10  ;;  %2086 = vmatpush.bf16.msrb.mxu3 %v6511_v21  ;;  %v6476_v10 = vld [vmem:[%s11755_s4 + $0xa8] sm:$0xf0]  ;;  %v6466_v21 = vld [vmem:[%s11755_s4 + $0x90] sm:$0xf] }
 0x20b   : > { %v6479_v11 = vor.u32 %v7984_v40, %v6476_v10  ;;  %v6467_v7 = vor.u32 %v7983_v43, %v6466_v21  ;;  %v8011_v40 = vld [vmem:[%s11755_s4 + $0x174] sm:$0xf0]  ;;  %v6612_v10 = vld [vmem:[%s11755_s4 + $0x178] sm:$0xf0] }
 0x20c   : > { %v6676_v21 = vld [vmem:[%s11755_s4 + $0x1f8] sm:$0xf0] }
 0x20d   : > { %v6679_v43 = vor.u32 %v8026_v20, %v6676_v21  ;;  %v8002_v20 = vld [vmem:[%s11755_s4 + $0x134] sm:$0xf]  ;;  %v6580_v21 = vld [vmem:[%s11755_s4 + $0x138] sm:$0xf0] }
 0x20e   : > { %2054 = vmatpush.bf16.msrb.mxu2 %v6439_v55  ;;  %2087 = vmatpush.bf16.msrb.mxu3 %v6503_v49  ;;  %v6471_v55 = vor.u32 %v7982_v51, %v6468_v17  ;;  %v6666_v51 = vld [vmem:[%s11755_s4 + $0x1e0] sm:$0xf]  ;;  %v8025_v17 = vld [vmem:[%s11755_s4 + $0x1e4] sm:$0xf0] }
 0x20f   : > { %v6667_v5 = vor.u32 %v8025_v17, %v6666_v51  ;;  %v6634_v17 = vld [vmem:[%s11755_s4 + $0x1a0] sm:$0xf] }
 0x215   : > { %1619 = vmatmul.bf16.gmra.mxu2 %v7959_v41  ;;  %1652 = vmatmul.bf16.gmra.mxu3 %v7959_v41  ;;  %v7972_v41 = vld [vmem:[%s11755_s4 + $0x44] sm:$0xf] }
 0x225   : > { %1624 = vmatmul.bf16.gmra.mxu2 %v1590_v28  ;;  %1657 = vmatmul.bf16.gmra.mxu3 %v1590_v28  ;;  %v6431_v28 = vor.u32 %v7972_v41, %v6428_v33  ;;  %v7964_v41 = vld [vmem:[%s11755_s4 + $0x4] sm:$0xf]  ;;  %v6396_v33 = vld [vmem:[%s11755_s4 + $0x8] sm:$0xf0] }
 0x227   : > { %2055 = vmatpush.bf16.msrb.mxu2 %v6431_v28  ;;  %v6399_v28 = vor.u32 %v7964_v41, %v6396_v33  ;;  %v6594_v33 = vld [vmem:[%s11755_s4 + $0x150] sm:$0xf] }
 0x22b   : > { %2056 = vmatpush.bf16.msrb.mxu2 %v6423_v57 }
 0x22f   : > { %2057 = vmatpush.bf16.msrb.mxu2 %v6415_v35  ;;  %v6610_v35 = vld [vmem:[%s11755_s4 + $0x170] sm:$0xf] }
 0x233   : > { %2058 = vmatpush.bf16.msrb.mxu2 %v6407_v13  ;;  %v6603_v13 = vor.u32 %v8009_v15, %v6602_v12  ;;  %v6644_v12 = vld [vmem:[%s11755_s4 + $0x1b8] sm:$0xf0]  ;;  %v6570_v15 = vld [vmem:[%s11755_s4 + $0x120] sm:$0xf] }
 0x235   : > { %1708 = vmatmul.bf16.vlgmr.msra.gmra.mxu2 %v7960_v30  ;;  %1741 = vmatmul.bf16.vlgmr.msra.gmra.mxu3 %v7960_v30  ;;  %v7988_v30 = vld [vmem:[%s11755_s4 + $0xc4] sm:$0xf] }
 0x237   : > { %2059 = vmatpush.bf16.msrb.mxu2 %v6399_v28  ;;  %v6658_v28 = vld [vmem:[%s11755_s4 + $0x1d0] sm:$0xf] }
 0x245   : > { %1713 = vmatmul.bf16.gmra.mxu2 %v7961_v60  ;;  %1746 = vmatmul.bf16.gmra.mxu3 %v7961_v60  ;;  %v6492_v60 = vld [vmem:[%s11755_s4 + $0xc8] sm:$0xf0] }
 0x255   : > { %1718 = vmatmul.bf16.gmra.mxu2 %v7962_v9  ;;  %1751 = vmatmul.bf16.gmra.mxu3 %v7962_v9  ;;  %v6418_v9 = vld [vmem:[%s11755_s4 + $0x30] sm:$0xf] }
 0x256   : > { %v6419_v38 = vor.u32 %v7971_v58, %v6418_v9 }
 0x258   : > { %1990 = vmatpush.bf16.msra.mxu0 %v6419_v38 }
 0x25c   : > { %1991 = vmatpush.bf16.msra.mxu0 %v6411_v36 }
 0x260   : > { %1992 = vmatpush.bf16.msra.mxu0 %v6403_v6 }
 0x264   : > { %1993 = vmatpush.bf16.msra.mxu0 %v6395_v4  ;;  %v8024_v4 = vld [vmem:[%s11755_s4 + $0x1e4] sm:$0xf] }
 0x265   : > { %1723 = vmatmul.bf16.gmra.mxu2 %v7963_v16  ;;  %1756 = vmatmul.bf16.gmra.mxu3 %v7963_v16  ;;  %v6495_v16 = vor.u32 %v7988_v30, %v6492_v60  ;;  %v7980_v30 = vld [vmem:[%s11755_s4 + $0x84] sm:$0xf]  ;;  %v6460_v60 = vld [vmem:[%s11755_s4 + $0x88] sm:$0xf0]  ;;  %v6671_v41 = vor.u32 %v8024_v4, %v6668_v44 }
 0x266   : > { %v6463_v9 = vor.u32 %v7980_v30, %v6460_v60  ;;  %v8023_v60 = vld [vmem:[%s11755_s4 + $0x1d4] sm:$0xf0]  ;;  %v8000_v44 = vld [vmem:[%s11755_s4 + $0x124] sm:$0xf] }
 0x267   : > { %2088 = vmatpush.bf16.msrb.mxu3 %v6495_v16 }
 0x268   : > { %v9170_v18 = vpop.f32.mrf.mxu2  ;;  %v9172_v54 = vpop.f32.mrf.mxu3 }
 0x26b   : > { %2089 = vmatpush.bf16.msrb.mxu3 %v6487_v50 }
 0x26f   : > { %2090 = vmatpush.bf16.msrb.mxu3 %v6479_v11 }
 0x270   : > { %v9177_v46 = vpop.f32.mrf.mxu2  ;;  %v9179_v0 = vpop.f32.mrf.mxu3 }
 0x273   : > { %2091 = vmatpush.bf16.msrb.mxu3 %v6471_v55  ;;  %v8008_v55 = vld [vmem:[%s11755_s4 + $0x164] sm:$0xf] }
 0x274   : > { %v6607_v3 = vor.u32 %v8008_v55, %v6604_v45  ;;  %v8017_v55 = vld [vmem:[%s11755_s4 + $0x1a4] sm:$0xf0] }
 0x275   : > { %1728 = vmatmul.bf16.gmra.mxu2 %v1694_v47  ;;  %1761 = vmatmul.bf16.gmra.mxu3 %v1694_v47  ;;  %v7987_v47 = vld [vmem:[%s11755_s4 + $0xb4] sm:$0xf0]  ;;  %v6635_v4 = vor.u32 %v8017_v55, %v6634_v17 }
 0x276   : > { %v6483_v39 = vor.u32 %v7987_v47, %v6482_v24 }
 0x277   : > { %2092 = vmatpush.bf16.msrb.mxu3 %v6463_v9  ;;  %v8006_v9 = vld [vmem:[%s11755_s4 + $0x154] sm:$0xf] }
 0x278   : > { %v9181_v59 = vpop.f32.mrf.mxu2  ;;  %v9183_v62 = vpop.f32.mrf.mxu3  ;;  %2023 = vmatpush.bf16.msra.mxu1 %v6483_v39 }
 0x27b   : > { %2410 = vmatpush.bf16.msra.mxu3 %v6679_v43 }
 0x27c   : > { %2024 = vmatpush.bf16.msra.mxu1 %v6475_v2 }
 0x27f   : > { %2411 = vmatpush.bf16.msra.mxu3 %v6671_v41  ;;  %v6572_v41 = vld [vmem:[%s11755_s4 + $0x128] sm:$0xf0] }
 0x280   : > { %v9185_v1 = vpop.f32.mrf.mxu2  ;;  %v9187_v29 = vpop.f32.mrf.mxu3  ;;  %2025 = vmatpush.bf16.msra.mxu1 %v6467_v7 }
 0x284   : > { %2026 = vmatpush.bf16.msra.mxu1 %v6459_v48  ;;  %v8007_v48 = vld [vmem:[%s11755_s4 + $0x154] sm:$0xf0] }
 0x285   : > { %v6595_v30 = vor.u32 %v8007_v48, %v6594_v33  ;;  %v8016_v33 = vld [vmem:[%s11755_s4 + $0x1a4] sm:$0xf]  ;;  %v6575_v48 = vor.u32 %v8000_v44, %v6572_v41 }
 0x288   : > { %v9213_v27 = vpop.f32.mrf.mxu2  ;;  %v9215_v31 = vpop.f32.mrf.mxu3 }
 0x290   : > { %v9265_v52 = vpop.f32.mrf.mxu2  ;;  %v9267_v53 = vpop.f32.mrf.mxu3 }
 0x298   : > { %v9317_v22 = vpop.f32.mrf.mxu2  ;;  %v9319_v19 = vpop.f32.mrf.mxu3 }
 0x2a0   : > { %v9369_v14 = vpop.f32.mrf.mxu2  ;;  %v9371_v49 = vpop.f32.mrf.mxu3 }
 0x2a8   : > { %v9397_v16 = vpop.f32.mrf.mxu2  ;;  %v9399_v58 = vpop.f32.mrf.mxu3 }
 0x2b0   : > { %v1627_v24 = vpop.f32.mrf.mxu2  ;;  %v1660_v47 = vpop.f32.mrf.mxu3 }
 0x2b1   : > { %v6596_v24 = vld [vmem:[%s11755_s4 + $0x158] sm:$0xf0]  ;;  %v6659_v47 = vor.u32 %v8023_v60, %v6658_v28  ;;  %v6636_v28 = vld [vmem:[%s11755_s4 + $0x1a8] sm:$0xf0]  ;;  %v7999_v60 = vld [vmem:[%s11755_s4 + $0x114] sm:$0xf0] }
 0x2b8   : > { %v1709_v38 = vpop.f32.mrf.mxu2  ;;  %v1742_v39 = vpop.f32.mrf.mxu3 }
 0x2b9   : > { %v1766_v37 = vmax.f32 %v9170_v18, %v1709_v38  ;;  %v1767_v57 = vmax.f32 %v9172_v54, %v1742_v39  ;;  %v6599_v38 = vor.u32 %v8006_v9, %v6596_v24  ;;  %v8022_v39 = vld [vmem:[%s11755_s4 + $0x1d4] sm:$0xf]  ;;  %v6626_v9 = vld [vmem:[%s11755_s4 + $0x190] sm:$0xf]  ;;  %v8015_v24 = vld [vmem:[%s11755_s4 + $0x194] sm:$0xf0] }
 0x2c0   : > { %v1711_v25 = vpop.f32.mrf.mxu2  ;;  %v1744_v34 = vpop.f32.mrf.mxu3 }
 0x2c1   : > { %v1768_v61 = vmax.f32 %v9177_v46, %v1711_v25  ;;  %v1769_v50 = vmax.f32 %v9179_v0, %v1744_v34  ;;  %v6660_v25 = vld [vmem:[%s11755_s4 + $0x1d8] sm:$0xf0]  ;;  %v6586_v34 = vld [vmem:[%s11755_s4 + $0x140] sm:$0xf] }
 0x2c3   : > { %v9405_v26 = vpack.c.bf16 %v1768_v61, %v1766_v37  ;;  %v9407_v32 = vpack.c.bf16 %v1769_v50, %v1767_v57  ;;  %v6663_v37 = vor.u32 %v8022_v39, %v6660_v25  ;;  %v8005_v57 = vld [vmem:[%s11755_s4 + $0x144] sm:$0xf0]  ;;  %v6650_v61 = vld [vmem:[%s11755_s4 + $0x1c0] sm:$0xf]  ;;  %v6564_v25 = vld [vmem:[%s11755_s4 + $0x118] sm:$0xf0] }
 0x2c4   : > { %v8021_v50 = vld [vmem:[%s11755_s4 + $0x1c4] sm:$0xf0] }
 0x2c5   : > { %1994 = vmatmul.bf16.vlgmr.msra.gmra.mxu0 %v9405_v26  ;;  %2027 = vmatmul.bf16.vlgmr.msra.gmra.mxu1 %v9407_v32 }
 0x2c6   : > { %2060 = vmatmul.bf16.vlgmr.msrb.gmra.mxu2 %v9405_v26  ;;  %2093 = vmatmul.bf16.vlgmr.msrb.gmra.mxu3 %v9407_v32 }
 0x2c7   : > { %2412 = vmatpush.bf16.msra.mxu3 %v6663_v37  ;;  %v6628_v37 = vld [vmem:[%s11755_s4 + $0x198] sm:$0xf0] }
 0x2c8   : > { %v1714_v56 = vpop.f32.mrf.mxu2  ;;  %v1747_v18 = vpop.f32.mrf.mxu3 }
 0x2c9   : > { %v1770_v46 = vmax.f32 %v9181_v59, %v1714_v56  ;;  %v1771_v0 = vmax.f32 %v9183_v62, %v1747_v18  ;;  %v6674_v59 = vld [vmem:[%s11755_s4 + $0x1f0] sm:$0xf]  ;;  %v6611_v62 = vor.u32 %v8011_v40, %v6610_v35  ;;  %v6587_v56 = vor.u32 %v8005_v57, %v6586_v34  ;;  %v8004_v18 = vld [vmem:[%s11755_s4 + $0x144] sm:$0xf]  ;;  %v6652_v35 = vld [vmem:[%s11755_s4 + $0x1c8] sm:$0xf0] }
 0x2ca   : > { %v8014_v34 = vld [vmem:[%s11755_s4 + $0x194] sm:$0xf]  ;;  %v6627_v57 = vor.u32 %v8015_v24, %v6626_v9 }
 0x2cb   : > { %2311 = vmatpush.bf16.msrb.mxu0 %v6611_v62 }
 0x2cf   : > { %2312 = vmatpush.bf16.msrb.mxu0 %v6603_v13  ;;  %v8001_v13 = vld [vmem:[%s11755_s4 + $0x124] sm:$0xf0] }
 0x2d0   : > { %v1716_v36 = vpop.f32.mrf.mxu2  ;;  %v1749_v54 = vpop.f32.mrf.mxu3 }
 0x2d1   : > { %v1772_v23 = vmax.f32 %v9185_v1, %v1716_v36  ;;  %v1773_v63 = vmax.f32 %v9187_v29, %v1749_v54  ;;  %v8027_v1 = vld [vmem:[%s11755_s4 + $0x1f4] sm:$0xf0]  ;;  %v8010_v29 = vld [vmem:[%s11755_s4 + $0x174] sm:$0xf]  ;;  %v6588_v36 = vld [vmem:[%s11755_s4 + $0x148] sm:$0xf0] }
 0x2d2   : > { %v6675_v42 = vor.u32 %v8027_v1, %v6674_v59  ;;  %v6615_v11 = vor.u32 %v8010_v29, %v6612_v10 }
 0x2d3   : > { %v9417_v8 = vpack.c.bf16 %v1772_v23, %v1770_v46  ;;  %v9419_v2 = vpack.c.bf16 %v1773_v63, %v1771_v0  ;;  %2313 = vmatpush.bf16.msrb.mxu0 %v6595_v30  ;;  %v6651_v0 = vor.u32 %v8021_v50, %v6650_v61  ;;  %v6591_v23 = vor.u32 %v8004_v18, %v6588_v36  ;;  %v8020_v63 = vld [vmem:[%s11755_s4 + $0x1c4] sm:$0xf]  ;;  %v6562_v30 = vld [vmem:[%s11755_s4 + $0x110] sm:$0xf]  ;;  %v6554_v50 = vld [vmem:[%s11755_s4 + $0x100] sm:$0xf] }
 0x2d4   : > { %2344 = vmatpush.bf16.msrb.mxu1 %v6675_v42  ;;  %2377 = vmatpush.bf16.msra.mxu2 %v6615_v11  ;;  %v6655_v42 = vor.u32 %v8020_v63, %v6652_v35  ;;  %v6578_v11 = vld [vmem:[%s11755_s4 + $0x130] sm:$0xf]  ;;  %v6563_v39 = vor.u32 %v7999_v60, %v6562_v30  ;;  %v6618_v18 = vld [vmem:[%s11755_s4 + $0x180] sm:$0xf]  ;;  %v8013_v36 = vld [vmem:[%s11755_s4 + $0x184] sm:$0xf0] }
 0x2d5   : > { %1999 = vmatmul.bf16.gmra.mxu0 %v9417_v8  ;;  %2032 = vmatmul.bf16.gmra.mxu1 %v9419_v2 }
 0x2d6   : > { %2065 = vmatmul.bf16.gmra.mxu2 %v9417_v8  ;;  %2098 = vmatmul.bf16.gmra.mxu3 %v9419_v2 }
 0x2d7   : > { %2314 = vmatpush.bf16.msrb.mxu0 %v6587_v56  ;;  %2413 = vmatpush.bf16.msra.mxu3 %v6655_v42  ;;  %v7997_v56 = vld [vmem:[%s11755_s4 + $0x104] sm:$0xf0] }
 0x2d8   : > { %v1719_v6 = vpop.f32.mrf.mxu2  ;;  %v1752_v7 = vpop.f32.mrf.mxu3  ;;  %2345 = vmatpush.bf16.msrb.mxu1 %v6667_v5  ;;  %2378 = vmatpush.bf16.msra.mxu2 %v6607_v3  ;;  %v6571_v3 = vor.u32 %v8001_v13, %v6570_v15 }
 0x2d9   : > { %v1774_v40 = vmax.f32 %v9213_v27, %v1719_v6  ;;  %v1775_v59 = vmax.f32 %v9215_v31, %v1752_v7  ;;  %v8003_v27 = vld [vmem:[%s11755_s4 + $0x134] sm:$0xf0]  ;;  %v6642_v31 = vld [vmem:[%s11755_s4 + $0x1b0] sm:$0xf]  ;;  %v6583_v6 = vor.u32 %v8002_v20, %v6580_v21  ;;  %v8018_v7 = vld [vmem:[%s11755_s4 + $0x1b4] sm:$0xf] }
 0x2da   : > { %v6647_v51 = vor.u32 %v8018_v7, %v6644_v12 }
 0x2dc   : > { %2346 = vmatpush.bf16.msrb.mxu1 %v6659_v47  ;;  %2379 = vmatpush.bf16.msra.mxu2 %v6599_v38  ;;  %v7998_v47 = vld [vmem:[%s11755_s4 + $0x114] sm:$0xf]  ;;  %v6639_v38 = vor.u32 %v8016_v33, %v6636_v28 }
 0x2dd   : > { %2414 = vmatpush.bf16.msra.mxu3 %v6647_v51  ;;  %v6567_v61 = vor.u32 %v7998_v47, %v6564_v25 }
 0x2e0   : > { %v1721_v54 = vpop.f32.mrf.mxu2  ;;  %v1754_v46 = vpop.f32.mrf.mxu3  ;;  %2347 = vmatpush.bf16.msrb.mxu1 %v6651_v0  ;;  %2380 = vmatpush.bf16.msra.mxu2 %v6591_v23  ;;  %v6631_v0 = vor.u32 %v8014_v34, %v6628_v37  ;;  %v6555_v23 = vor.u32 %v7997_v56, %v6554_v50 }
 0x2e1   : > { %v1776_v62 = vmax.f32 %v9265_v52, %v1721_v54  ;;  %v1777_v1 = vmax.f32 %v9267_v53, %v1754_v46  ;;  %v6579_v52 = vor.u32 %v8003_v27, %v6578_v11  ;;  %v8019_v53 = vld [vmem:[%s11755_s4 + $0x1b4] sm:$0xf0]  ;;  %v7996_v54 = vld [vmem:[%s11755_s4 + $0x104] sm:$0xf]  ;;  %v6556_v46 = vld [vmem:[%s11755_s4 + $0x108] sm:$0xf0]  ;;  %2415 = vmatpush.bf16.msra.mxu3 %v6639_v38 }
 0x2e2   : > { %v6643_v43 = vor.u32 %v8019_v53, %v6642_v31 }
 0x2e3   : > { %v9525_v29 = vpack.c.bf16 %v1776_v62, %v1774_v40  ;;  %v9527_v10 = vpack.c.bf16 %v1777_v1, %v1775_v59  ;;  %2315 = vmatpush.bf16.msrb.mxu0 %v6579_v52  ;;  %v6619_v40 = vor.u32 %v8013_v36, %v6618_v18  ;;  %v6559_v59 = vor.u32 %v7996_v54, %v6556_v46  ;;  %v8012_v62 = vld [vmem:[%s11755_s4 + $0x184] sm:$0xf]  ;;  %v6620_v1 = vld [vmem:[%s11755_s4 + $0x188] sm:$0xf0]  ;;  %v6756_v36 = vld [vmem:[%s11756_s5 + $0x100] sm:$0xf] }
 0x2e4   : > { %2348 = vmatpush.bf16.msrb.mxu1 %v6643_v43  ;;  %2381 = vmatpush.bf16.msra.mxu2 %v6583_v6  ;;  %v6623_v20 = vor.u32 %v8012_v62, %v6620_v1  ;;  %v8061_v54 = vld [vmem:[%s11756_s5 + $0x104] sm:$0xf0]  ;;  %s6018_s4 = scalar_lea.sflag [#allocation5], %s623_s0 }
 0x2e5   : > { %2004 = vmatmul.bf16.gmra.mxu0 %v9525_v29  ;;  %2037 = vmatmul.bf16.gmra.mxu1 %v9527_v10  ;;  %v6757_v46 = vor.u32 %v8061_v54, %v6756_v36 }
 0x2e6   : > { %2070 = vmatmul.bf16.gmra.mxu2 %v9525_v29  ;;  %2103 = vmatmul.bf16.gmra.mxu3 %v9527_v10 }
 0x2e7   : > { %2316 = vmatpush.bf16.msrb.mxu0 %v6571_v3  ;;  %2416 = vmatpush.bf16.msra.mxu3 %v6631_v0  ;;  %v8060_v0 = vld [vmem:[%s11756_s5 + $0x104] sm:$0xf] }
 0x2e8   : > { %v1724_v45 = vpop.f32.mrf.mxu2  ;;  %v1757_v5 = vpop.f32.mrf.mxu3  ;;  %2349 = vmatpush.bf16.msrb.mxu1 %v6635_v4  ;;  %2382 = vmatpush.bf16.msra.mxu2 %v6575_v48 }
 0x2e9   : > { %v1778_v42 = vmax.f32 %v9317_v22, %v1724_v45  ;;  %v1779_v11 = vmax.f32 %v9319_v19, %v1757_v5 }
 0x2eb   : > { %2317 = vmatpush.bf16.msrb.mxu0 %v6563_v39  ;;  %2417 = vmatpush.bf16.msra.mxu3 %v6623_v20  ;;  %v6740_v20 = vld [vmem:[%s11756_s5 + $0xe0] sm:$0xf] }
 0x2ec   : > { %2350 = vmatpush.bf16.msrb.mxu1 %v6627_v57  ;;  %2383 = vmatpush.bf16.msra.mxu2 %v6567_v61 }
 0x2ef   : > { %2318 = vmatpush.bf16.msrb.mxu0 %v6555_v23  ;;  %v6758_v23 = vld [vmem:[%s11756_s5 + $0x108] sm:$0xf0] }
 0x2f0   : > { %v1726_v63 = vpop.f32.mrf.mxu2  ;;  %v1759_v35 = vpop.f32.mrf.mxu3  ;;  %2351 = vmatpush.bf16.msrb.mxu1 %v6619_v40  ;;  %2384 = vmatpush.bf16.msra.mxu2 %v6559_v59  ;;  %v6761_v40 = vor.u32 %v8060_v0, %v6758_v23  ;;  %v8051_v0 = vld [vmem:[%s11756_s5 + $0xb4] sm:$0xf0]  ;;  %v8050_v23 = vld [vmem:[%s11756_s5 + $0xb4] sm:$0xf] }
 0x2f1   : > { %v1780_v27 = vmax.f32 %v9369_v14, %v1726_v63  ;;  %v1781_v31 = vmax.f32 %v9371_v49, %v1759_v35 }
 0x2f3   : > { %v1790_v52 = vpack.c.bf16 %v1780_v27, %v1778_v42  ;;  %v1791_v53 = vpack.c.bf16 %v1781_v31, %v1779_v11  ;;  %2861 = vmatpush.bf16.msra.mxu0 %v6757_v46  ;;  %v6748_v42 = vld [vmem:[%s11756_s5 + $0xf0] sm:$0xf]  ;;  %v8059_v11 = vld [vmem:[%s11756_s5 + $0xf4] sm:$0xf0]  ;;  %v8058_v27 = vld [vmem:[%s11756_s5 + $0xf4] sm:$0xf] }
 0x2f4   : > { %2919 = vmatpush.bf16.msrb.mxu2 %v6761_v40  ;;  %v6749_v31 = vor.u32 %v8059_v11, %v6748_v42  ;;  %v6716_v46 = vld [vmem:[%s11756_s5 + $0xb0] sm:$0xf]  ;;  %v6708_v42 = vld [vmem:[%s11756_s5 + $0xa0] sm:$0xf]  ;;  %v8049_v11 = vld [vmem:[%s11756_s5 + $0xa4] sm:$0xf0] }
 0x2f5   : > { %2009 = vmatmul.bf16.gmra.mxu0 %v1790_v52  ;;  %2042 = vmatmul.bf16.gmra.mxu1 %v1791_v53  ;;  %v6717_v40 = vor.u32 %v8051_v0, %v6716_v46 }
 0x2f6   : > { %2075 = vmatmul.bf16.gmra.mxu2 %v1790_v52  ;;  %2108 = vmatmul.bf16.gmra.mxu3 %v1791_v53 }
 0x2f7   : > { %2862 = vmatpush.bf16.msra.mxu0 %v6749_v31 }
 0x2f8   : > { %v1729_v21 = vpop.f32.mrf.mxu2  ;;  %v1762_v22 = vpop.f32.mrf.mxu3 }
 0x2f9   : > { %v1782_v19 = vmax.f32 %v9397_v16, %v1729_v21  ;;  %v1783_v14 = vmax.f32 %v9399_v58, %v1762_v22  ;;  %v8057_v21 = vld [vmem:[%s11756_s5 + $0xe4] sm:$0xf0]  ;;  %v8056_v22 = vld [vmem:[%s11756_s5 + $0xe4] sm:$0xf] }
 0x2fb   : > { %v1792_v6 = vpack.c.bf16 %v1782_v19, %v1782_v19  ;;  %v1793_v7 = vpack.c.bf16 %v1783_v14, %v1783_v14  ;;  %v6741_v19 = vor.u32 %v8057_v21, %v6740_v20  ;;  %v6742_v14 = vld [vmem:[%s11756_s5 + $0xe8] sm:$0xf0] }
 0x2fd   : > { %2863 = vmatpush.bf16.msra.mxu0 %v6741_v19 }
 0x300   : > { %v1731_v43 = vpop.f32.mrf.mxu2  ;;  %v1764_v49 = vpop.f32.mrf.mxu3 }
 0x305   : > { %2014 = vmatmul.bf16.gmra.mxu0 %v1792_v6  ;;  %2047 = vmatmul.bf16.gmra.mxu1 %v1793_v7 }
 0x306   : > { %2080 = vmatmul.bf16.gmra.mxu2 %v1792_v6  ;;  %2113 = vmatmul.bf16.gmra.mxu3 %v1793_v7 }
 0x315   : > { %2319 = vmatmul.bf16.vlgmr.msrb.gmra.mxu0 %v9405_v26  ;;  %2352 = vmatmul.bf16.vlgmr.msrb.gmra.mxu1 %v9407_v32 }
 0x316   : > { %2385 = vmatmul.bf16.vlgmr.msra.gmra.mxu2 %v9405_v26  ;;  %2418 = vmatmul.bf16.vlgmr.msra.gmra.mxu3 %v9407_v32 }
 0x325   : > { %2324 = vmatmul.bf16.gmra.mxu0 %v9417_v8  ;;  %2357 = vmatmul.bf16.gmra.mxu1 %v9419_v2 }
 0x326   : > { %2390 = vmatmul.bf16.gmra.mxu2 %v9417_v8  ;;  %2423 = vmatmul.bf16.gmra.mxu3 %v9419_v2 }
 0x335   : > { %2329 = vmatmul.bf16.gmra.mxu0 %v9525_v29  ;;  %2362 = vmatmul.bf16.gmra.mxu1 %v9527_v10 }
 0x336   : > { %2395 = vmatmul.bf16.gmra.mxu2 %v9525_v29  ;;  %2428 = vmatmul.bf16.gmra.mxu3 %v9527_v10 }
 0x342   : > { %v1995_v16 = vpop.f32.mrf.mxu0  ;;  %v2028_v58 = vpop.f32.mrf.mxu1 }
 0x343   : > { %v9647_v26 = vadd.f32 %v2028_v58, %v1995_v16 }
 0x345   : > { %2334 = vmatmul.bf16.gmra.mxu0 %v1790_v52  ;;  %2367 = vmatmul.bf16.gmra.mxu1 %v1791_v53 }
 0x346   : > { %2400 = vmatmul.bf16.gmra.mxu2 %v1790_v52  ;;  %2433 = vmatmul.bf16.gmra.mxu3 %v1791_v53  ;;  %v6750_v52 = vld [vmem:[%s11756_s5 + $0xf8] sm:$0xf0] }
 0x347   : > { %v6753_v53 = vor.u32 %v8058_v27, %v6750_v52  ;;  %v8048_v27 = vld [vmem:[%s11756_s5 + $0xa4] sm:$0xf]  ;;  %v6709_v52 = vor.u32 %v8049_v11, %v6708_v42 }
 0x349   : > { %v2061_v32 = vpop.f32.mrf.mxu2  ;;  %v2094_v8 = vpop.f32.mrf.mxu3  ;;  %2920 = vmatpush.bf16.msrb.mxu2 %v6753_v53  ;;  %v6710_v53 = vld [vmem:[%s11756_s5 + $0xa8] sm:$0xf0] }
 0x34a   : > { %v9649_v12 = vadd.f32 %v2094_v8, %v2061_v32  ;;  %v9651_v2 = vpop.f32.mrf.mxu0  ;;  %v9653_v15 = vpop.f32.mrf.mxu1  ;;  %v6732_v32 = vld [vmem:[%s11756_s5 + $0xd0] sm:$0xf]  ;;  %v8055_v8 = vld [vmem:[%s11756_s5 + $0xd4] sm:$0xf0] }
 0x351   : > { %v9655_v51 = vpop.f32.mrf.mxu2  ;;  %v9657_v29 = vpop.f32.mrf.mxu3 }
 0x352   : > { %v2000_v10 = vpop.f32.mrf.mxu0  ;;  %v2033_v13 = vpop.f32.mrf.mxu1 }
 0x353   : > { %v9659_v17 = vadd.f32 %v2033_v13, %v2000_v10  ;;  %v8054_v10 = vld [vmem:[%s11756_s5 + $0xd4] sm:$0xf]  ;;  %v6733_v13 = vor.u32 %v8055_v8, %v6732_v32 }
 0x355   : > { %2339 = vmatmul.bf16.gmra.mxu0 %v1792_v6  ;;  %2372 = vmatmul.bf16.gmra.mxu1 %v1793_v7 }
 0x356   : > { %2405 = vmatmul.bf16.gmra.mxu2 %v1792_v6  ;;  %2438 = vmatmul.bf16.gmra.mxu3 %v1793_v7  ;;  %v6745_v6 = vor.u32 %v8056_v22, %v6742_v14  ;;  %v6713_v22 = vor.u32 %v8048_v27, %v6710_v53 }
 0x357   : > { %2864 = vmatpush.bf16.msra.mxu0 %v6733_v13  ;;  %v8046_v13 = vld [vmem:[%s11756_s5 + $0x94] sm:$0xf] }
 0x358   : > { %2921 = vmatpush.bf16.msrb.mxu2 %v6745_v6  ;;  %v8047_v6 = vld [vmem:[%s11756_s5 + $0x94] sm:$0xf0] }
 0x359   : > { %v2066_v55 = vpop.f32.mrf.mxu2  ;;  %v2099_v45 = vpop.f32.mrf.mxu3 }
 0x35a   : > { %v9661_v5 = vadd.f32 %v2099_v45, %v2066_v55  ;;  %v9663_v3 = vpop.f32.mrf.mxu0  ;;  %v9665_v4 = vpop.f32.mrf.mxu1  ;;  %v6734_v55 = vld [vmem:[%s11756_s5 + $0xd8] sm:$0xf0] }
 0x35b   : > { %v6737_v45 = vor.u32 %v8054_v10, %v6734_v55  ;;  %v8063_v10 = vld [vmem:[%s11756_s5 + $0x114] sm:$0xf0]  ;;  %v6702_v55 = vld [vmem:[%s11756_s5 + $0x98] sm:$0xf0] }
 0x35d   : > { %2922 = vmatpush.bf16.msrb.mxu2 %v6737_v45 }
 0x361   : > { %v9667_v44 = vpop.f32.mrf.mxu2  ;;  %v9669_v41 = vpop.f32.mrf.mxu3 }
 0x362   : > { %v2005_v33 = vpop.f32.mrf.mxu0  ;;  %v2038_v48 = vpop.f32.mrf.mxu1 }
 0x363   : > { %v9671_v28 = vadd.f32 %v2038_v48, %v2005_v33  ;;  %v6724_v33 = vld [vmem:[%s11756_s5 + $0xc0] sm:$0xf]  ;;  %v8053_v48 = vld [vmem:[%s11756_s5 + $0xc4] sm:$0xf0] }
 0x369   : > { %v2071_v30 = vpop.f32.mrf.mxu2  ;;  %v2104_v60 = vpop.f32.mrf.mxu3 }
 0x36a   : > { %v9673_v9 = vadd.f32 %v2104_v60, %v2071_v30  ;;  %v9675_v24 = vpop.f32.mrf.mxu0  ;;  %v9677_v47 = vpop.f32.mrf.mxu1  ;;  %v8052_v30 = vld [vmem:[%s11756_s5 + $0xc4] sm:$0xf]  ;;  %v6725_v60 = vor.u32 %v8053_v48, %v6724_v33  ;;  %v8062_v33 = vld [vmem:[%s11756_s5 + $0x114] sm:$0xf]  ;;  %v6766_v48 = vld [vmem:[%s11756_s5 + $0x118] sm:$0xf0] }
 0x36c   : > { %2865 = vmatpush.bf16.msra.mxu0 %v6725_v60  ;;  %v6769_v60 = vor.u32 %v8062_v33, %v6766_v48 }
 0x36e   : > { %2955 = vmatpush.bf16.msrb.mxu3 %v6769_v60 }
 0x370   : > { %2866 = vmatpush.bf16.msra.mxu0 %v6717_v40 }
 0x371   : > { %v9679_v38 = vpop.f32.mrf.mxu2  ;;  %v9681_v39 = vpop.f32.mrf.mxu3 }
 0x372   : > { %v2010_v25 = vpop.f32.mrf.mxu0  ;;  %v2043_v34 = vpop.f32.mrf.mxu1 }
 0x373   : > { %v9683_v37 = vadd.f32 %v2043_v34, %v2010_v25  ;;  %v6726_v25 = vld [vmem:[%s11756_s5 + $0xc8] sm:$0xf0] }
 0x374   : > { %2867 = vmatpush.bf16.msra.mxu0 %v6709_v52 }
 0x379   : > { %v2076_v57 = vpop.f32.mrf.mxu2  ;;  %v2109_v61 = vpop.f32.mrf.mxu3 }
 0x37a   : > { %v9685_v50 = vadd.f32 %v2109_v61, %v2076_v57  ;;  %v9687_v56 = vpop.f32.mrf.mxu0  ;;  %v9689_v18 = vpop.f32.mrf.mxu1  ;;  %v6729_v61 = vor.u32 %v8052_v30, %v6726_v25 }
 0x37c   : > { %2923 = vmatpush.bf16.msrb.mxu2 %v6729_v61  ;;  %v2031_v61 = vadd.f32 %v9653_v15, %v9651_v2 }
 0x381   : > { %v9703_v63 = vpop.f32.mrf.mxu2  ;;  %v9705_v35 = vpop.f32.mrf.mxu3 }
 0x382   : > { %v2015_v59 = vpop.f32.mrf.mxu0  ;;  %v2048_v62 = vpop.f32.mrf.mxu1 }
 0x383   : > { %v9707_v1 = vadd.f32 %v2048_v62, %v2015_v59  ;;  %v6718_v59 = vld [vmem:[%s11756_s5 + $0xb8] sm:$0xf0] }
 0x384   : > { %v6721_v62 = vor.u32 %v8050_v23, %v6718_v59 }
 0x386   : > { %2924 = vmatpush.bf16.msrb.mxu2 %v6721_v62 }
 0x389   : > { %v2081_v43 = vpop.f32.mrf.mxu2  ;;  %v2114_v49 = vpop.f32.mrf.mxu3 }
 0x38a   : > { %v9733_v7 = vadd.f32 %v2114_v49, %v2081_v43  ;;  %v2017_v16 = vpop.f32.mrf.mxu0  ;;  %v2050_v58 = vpop.f32.mrf.mxu1  ;;  %2925 = vmatpush.bf16.msrb.mxu2 %v6713_v22  ;;  %v6700_v49 = vld [vmem:[%s11756_s5 + $0x90] sm:$0xf] }
 0x38b   : > { %v6764_v16 = vld [vmem:[%s11756_s5 + $0x110] sm:$0xf]  ;;  %v6701_v8 = vor.u32 %v8047_v6, %v6700_v49 }
 0x38d   : > { %2868 = vmatpush.bf16.msra.mxu0 %v6701_v8 }
 0x391   : > { %v2083_v34 = vpop.f32.mrf.mxu2  ;;  %v2116_v57 = vpop.f32.mrf.mxu3 }
 0x392   : > { %v2320_v36 = vpop.f32.mrf.mxu0  ;;  %v2353_v54 = vpop.f32.mrf.mxu1 }
 0x393   : > { %v2354_v31 = vadd.f32 %v2353_v54, %v2320_v36  ;;  %v2097_v36 = vadd.f32 %v9657_v29, %v9655_v51 }
 0x395   : > { %v2443_v58 = vmax.f32 %v9647_v26, %v2354_v31  ;;  %v6765_v26 = vor.u32 %v8063_v10, %v6764_v16 }
 0x397   : > { %2897 = vmatpush.bf16.msra.mxu1 %v6765_v26 }
 0x399   : > { %v2386_v20 = vpop.f32.mrf.mxu2  ;;  %v2419_v21 = vpop.f32.mrf.mxu3 }
 0x39a   : > { %v2420_v19 = vadd.f32 %v2419_v21, %v2386_v20  ;;  %v2322_v14 = vpop.f32.mrf.mxu0  ;;  %v2355_v43 = vpop.f32.mrf.mxu1 }
 0x39b   : > { %v2356_v25 = vadd.f32 %v2355_v43, %v2322_v14  ;;  %v2036_v43 = vadd.f32 %v9665_v4, %v9663_v3 }
 0x39c   : > { %v2444_v32 = vmax.f32 %v9649_v12, %v2420_v19  ;;  %v6705_v12 = vor.u32 %v8046_v13, %v6702_v55 }
 0x39d   : > { %v2445_v23 = vmax.f32 %v2031_v61, %v2356_v25 }
 0x39e   : > { %v2461_v30 = vpack.c.bf16 %v2444_v32, %v2443_v58  ;;  %2926 = vmatpush.bf16.msrb.mxu2 %v6705_v12 }
 0x3a0   : > { %2473 = vst.msk [vmem:[#allocation2] sm:$0xff] %vm9804_vm6, %v2461_v30 }
 0x3a1   : > { %v2388_v34 = vpop.f32.mrf.mxu2  ;;  %v2421_v57 = vpop.f32.mrf.mxu3 }
 0x3a2   : > { %v2422_v54 = vadd.f32 %v2421_v57, %v2388_v34  ;;  %v2325_v46 = vpop.f32.mrf.mxu0  ;;  %v2358_v0 = vpop.f32.mrf.mxu1 }
 0x3a3   : > { %v2359_v62 = vadd.f32 %v2358_v0, %v2325_v46 }
 0x3a4   : > { %v2446_v40 = vmax.f32 %v2097_v36, %v2422_v54 }
 0x3a5   : > { %v2447_v2 = vmax.f32 %v9659_v17, %v2359_v62  ;;  %v2102_v17 = vadd.f32 %v9669_v41, %v9667_v44 }
 0x3a6   : > { %v2462_v59 = vpack.c.bf16 %v2446_v40, %v2445_v23 }
 0x3a7   : > { %v2482_v51 = vld [vmem:[#allocation2] sm:$0xff] }
 0x3a8   : > { %2474 = vst.msk [vmem:[#allocation2 + $0x8] sm:$0xff] %vm9804_vm6, %v2462_v59  ;;  %v2495_v20 = vunpack.c.l.b16 %v2482_v51  ;;  %v2496_v22 = vunpack.c.h.b16 %v2482_v51  ;;  %v3194_v10 = vld [vmem:[#allocation2] sm:$0xee] }
 0x3a9   : > { %v2391_v42 = vpop.f32.mrf.mxu2  ;;  %v2424_v11 = vpop.f32.mrf.mxu3  ;;  %v3198_v3 = vunpack.c.l.b16 %v3194_v10  ;;  %v3199_v30 = vunpack.c.h.b16 %v3194_v10 }
 0x3aa   : > { %v2425_v27 = vadd.f32 %v2424_v11, %v2391_v42  ;;  %v2327_v31 = vpop.f32.mrf.mxu0  ;;  %v2360_v52 = vpop.f32.mrf.mxu1 }
 0x3ab   : > { %v2361_v21 = vadd.f32 %v2360_v52, %v2327_v31 }
 0x3ac   : > { %v2448_v15 = vmax.f32 %v9661_v5, %v2425_v27 }
 0x3ad   : > { %v2449_v13 = vmax.f32 %v2036_v43, %v2361_v21 }
 0x3ae   : > { %v2463_v29 = vpack.c.bf16 %v2448_v15, %v2447_v2 }
 0x3af   : > { %v2483_v53 = vld [vmem:[#allocation2 + $0x8] sm:$0xff] }
 0x3b0   : > { %2475 = vst.msk [vmem:[#allocation2 + $0x10] sm:$0xff] %vm9804_vm6, %v2463_v29  ;;  %v2497_v19 = vunpack.c.l.b16 %v2483_v53  ;;  %v2498_v14 = vunpack.c.h.b16 %v2483_v53 }
 0x3b1   : > { %v2393_v49 = vpop.f32.mrf.mxu2  ;;  %v2426_v6 = vpop.f32.mrf.mxu3 }
 0x3b2   : > { %v2427_v5 = vadd.f32 %v2426_v6, %v2393_v49  ;;  %v2330_v16 = vpop.f32.mrf.mxu0  ;;  %v2363_v58 = vpop.f32.mrf.mxu1  ;;  %v9830_v32 = vpack.c.b16 %v2497_v19, %v2495_v20  ;;  %v9832_v8 = vpack.c.b16 %v2498_v14, %v2496_v22  ;;  %v3200_v44 = vpack.c.b16 %v2497_v19, %v3198_v3 }
 0x3b3   : > { %v2364_v33 = vadd.f32 %v2363_v58, %v2330_v16  ;;  %v3201_v36 = vpack.c.b16 %v2498_v14, %v3199_v30 }
 0x3b4   : > { %v2450_v55 = vmax.f32 %v2102_v17, %v2427_v5  ;;  %v2594_v26 = vshll.u32 %v9830_v32, 16  ;;  %v2606_v12 = vshll.u32 %v9832_v8, 16  ;;  %v2592_v62 = vshrl.u32 %v9830_v32, 16 }
 0x3b5   : > { %v2451_v59 = vmax.f32 %v9671_v28, %v2364_v33  ;;  %v2604_v42 = vshrl.u32 %v9832_v8, 16  ;;  %v3202_v11 = vrot.slane %v3200_v44, 1  ;;  %v3205_v29 = vrot.slane %v3201_v36, 1  ;;  %v8043_v33 = vld [vmem:[%s11756_s5 + $0x74] sm:$0xf0] }
 0x3b6   : > { %v2464_v4 = vpack.c.bf16 %v2450_v55, %v2449_v13  ;;  %v2596_v57 = vrot.slane %v2594_v26, 1  ;;  %v2608_v61 = vrot.slane %v2606_v12, 1  ;;  %v2041_v13 = vadd.f32 %v9677_v47, %v9675_v24  ;;  %v8042_v24 = vld [vmem:[%s11756_s5 + $0x74] sm:$0xf] }
 0x3b7   : > { %v2582_v48 = vld [vmem:[#allocation2 + $0x10] sm:$0x11]  ;;  %v2484_v19 = vld [vmem:[#allocation2 + $0x10] sm:$0xee]  ;;  %v2107_v55 = vadd.f32 %v9681_v39, %v9679_v38 }
 0x3b8   : > { %2476 = vst.msk [vmem:[#allocation2 + $0x18] sm:$0xff] %vm9804_vm6, %v2464_v4  ;;  %v2587_v41 = vunpack.c.l.b16 %v2582_v48  ;;  %v2588_v60 = vunpack.c.h.b16 %v2582_v48  ;;  %v2597_v15 = vor.u32 %v2596_v57, %v2592_v62  ;;  %v2609_v51 = vor.u32 %v2608_v61, %v2604_v42  ;;  %v6836_v4 = vld [vmem:[%s11756_s5 + $0x70] sm:$0xf]  ;;  %v6838_v48 = vld [vmem:[%s11756_s5 + $0x78] sm:$0xf0] }
 0x3b9   : > { %v2396_v25 = vpop.f32.mrf.mxu2  ;;  %v2429_v34 = vpop.f32.mrf.mxu3  ;;  %v2505_v58 = vunpack.c.l.b16 %v2484_v19  ;;  %v2506_v38 = vunpack.c.h.b16 %v2484_v19  ;;  %v6837_v39 = vor.u32 %v8043_v33, %v6836_v4  ;;  %v8040_v57 = vld [vmem:[%s11756_s5 + $0x64] sm:$0xf]  ;;  %v9900_v42 = vadd.f32 %v9689_v18, %v9687_v56 }
 0x3ba   : > { %v2430_v54 = vadd.f32 %v2429_v34, %v2396_v25  ;;  %v2332_v46 = vpop.f32.mrf.mxu0  ;;  %v2365_v0 = vpop.f32.mrf.mxu1  ;;  %v2589_v23 = vpack.c.b16 %v2587_v41, %v2587_v41  ;;  %v2590_v40 = vpack.c.b16 %v2588_v60, %v2588_v60  ;;  %v6828_v41 = vld [vmem:[%s11756_s5 + $0x60] sm:$0xf]  ;;  %v6841_v25 = vor.u32 %v8042_v24, %v6838_v48  ;;  %v8041_v34 = vld [vmem:[%s11756_s5 + $0x64] sm:$0xf0] }
 0x3bb   : > { %3078 = vmatpush.bf16.msrb.mxu0 %v6837_v39 }
 0x3bc   : > { %v2452_v27 = vmax.f32 %v9673_v9, %v2430_v54  ;;  %v2599_v31 = vshll.u32 %v2589_v23, 16  ;;  %v2611_v52 = vshll.u32 %v2590_v40, 16  ;;  %v3203_v2 = vrot.slane %v2589_v23, 1  ;;  %v6830_v54 = vld [vmem:[%s11756_s5 + $0x68] sm:$0xf0]  ;;  %3136 = vmatpush.bf16.msra.mxu2 %v6841_v25 }
 0x3bd   : > { %v3206_v53 = vrot.slane %v2590_v40, 1  ;;  %v2366_v9 = vadd.f32 %v2365_v0, %v2332_v46  ;;  %v9894_v46 = vld [vmem:[#allocation2 + $0x10] sm:$0xcc]  ;;  %v6833_v62 = vor.u32 %v8040_v57, %v6830_v54  ;;  %v6814_v25 = vld [vmem:[%s11756_s5 + $0x48] sm:$0xf0] }
 0x3be   : > { %v2465_v20 = vpack.c.bf16 %v2452_v27, %v2451_v59  ;;  %v2601_v21 = vrot.slane %v2599_v31, 1  ;;  %v2613_v22 = vrot.slane %v2611_v52, 1  ;;  %v9843_v28 = vsel %vm1204_vm3, %v3202_v11, %v3203_v2  ;;  %v6820_v52 = vld [vmem:[%s11756_s5 + $0x50] sm:$0xf]  ;;  %v8039_v2 = vld [vmem:[%s11756_s5 + $0x54] sm:$0xf0] }
 0x3bf   : > { %v9845_v14 = vld [vmem:[#allocation2 + $0x18] sm:$0xff]  ;;  %v9848_v43 = vsel %vm1204_vm3, %v3205_v29, %v3206_v53  ;;  %v2453_v30 = vmax.f32 %v2041_v13, %v2366_v9  ;;  %v6829_v59 = vor.u32 %v8041_v34, %v6828_v41  ;;  %v9904_v11 = vadd.f32 %v9705_v35, %v9703_v63 }
 0x3c0   : > { %2477 = vst.msk [vmem:[#allocation2 + $0x20] sm:$0xff] %vm9804_vm6, %v2465_v20  ;;  %v2602_v49 = vsel %vm713_vm1, %v2597_v15, %v2601_v21  ;;  %v2614_v6 = vsel %vm713_vm1, %v2609_v51, %v2613_v22  ;;  %v2507_v17 = vunpack.c.l.b16 %v9845_v14  ;;  %v2508_v10 = vunpack.c.h.b16 %v9845_v14  ;;  %v8038_v51 = vld [vmem:[%s11756_s5 + $0x54] sm:$0xf]  ;;  %v6822_v29 = vld [vmem:[%s11756_s5 + $0x58] sm:$0xf0]  ;;  %3137 = vmatpush.bf16.msra.mxu2 %v6833_v62 }
 0x3c1   : > { %v2398_v5 = vpop.f32.mrf.mxu2  ;;  %v2431_v16 = vpop.f32.mrf.mxu3  ;;  %2869 = vmatmul.bf16.vlgmr.msra.gmra.mxu0 %v2602_v49  ;;  %6770 = vmatmul.msk.bf16.vlgmr.msra.gmra.mxu1 %vm2848_vm7, %v2614_v6  ;;  %v6821_v35 = vor.u32 %v8039_v2, %v6820_v52  ;;  %v3210_v53 = vunpack.c.l.b16 %v9894_v46  ;;  %vm6015_vm1 = vcmask 76800  }
 0x3c2   : > { %v2432_v26 = vadd.f32 %v2431_v16, %v2398_v5  ;;  %2927 = vmatmul.bf16.vlgmr.msrb.gmra.mxu2 %v2602_v49  ;;  %6774 = vmatmul.msk.bf16.vlgmr.msrb.gmra.mxu3 %vm2848_vm7, %v2614_v6  ;;  %v2335_v12 = vpop.f32.mrf.mxu0  ;;  %v2368_v3 = vpop.f32.mrf.mxu1  ;;  %v9873_v47 = vpack.c.b16 %v2507_v17, %v2505_v58  ;;  %v9883_v60 = vpack.c.b16 %v2508_v10, %v2506_v38  ;;  %v6812_v49 = vld [vmem:[%s11756_s5 + $0x40] sm:$0xf]  ;;  %v8037_v6 = vld [vmem:[%s11756_s5 + $0x44] sm:$0xf0]  ;;  %v3211_v5 = vunpack.c.h.b16 %v9894_v46 }
 0x3c3   : > { %v2369_v36 = vadd.f32 %v2368_v3, %v2335_v12  ;;  %3079 = vmatpush.bf16.msrb.mxu0 %v6829_v59  ;;  %v6813_v48 = vor.u32 %v8037_v6, %v6812_v49  ;;  %v9950_v54 = vpack.c.b16 %v2507_v17, %v3210_v53  ;;  %v6806_v49 = vld [vmem:[%s11756_s5 + $0x38] sm:$0xf0] }
 0x3c4   : > { %v2454_v44 = vmax.f32 %v2107_v55, %v2432_v26  ;;  %v2623_v23 = vshrl.u32 %v9873_v47, 16  ;;  %v2626_v40 = vshll.u32 %v9873_v47, 16  ;;  %v2640_v18 = vshrl.u32 %v9883_v60, 16 }
 0x3c5   : > { %v2643_v63 = vshll.u32 %v9883_v60, 16  ;;  %v2455_v16 = vmax.f32 %v9683_v37, %v2369_v36  ;;  %v6825_v55 = vor.u32 %v8038_v51, %v6822_v29  ;;  %v8036_v37 = vld [vmem:[%s11756_s5 + $0x44] sm:$0xf]  ;;  %v8035_v51 = vld [vmem:[%s11756_s5 + $0x34] sm:$0xf0]  ;;  %v9972_v53 = vpack.c.b16 %v2508_v10, %v3211_v5 }
 0x3c6   : > { %v2466_v61 = vpack.c.bf16 %v2454_v44, %v2453_v30  ;;  %v2625_v58 = vrot.slane %v2623_v23, 1  ;;  %v2628_v13 = vrot.slane %v2626_v40, 2  ;;  %v2642_v24 = vrot.slane %v2640_v18, 1  ;;  %v8034_v29 = vld [vmem:[%s11756_s5 + $0x34] sm:$0xf] }
 0x3c7   : > { %v2583_v0 = vld [vmem:[#allocation2 + $0x20] sm:$0x33]  ;;  %v2487_v33 = vld [vmem:[#allocation2 + $0x20] sm:$0xcc]  ;;  %v2645_v38 = vrot.slane %v2643_v63, 2  ;;  %3080 = vmatpush.bf16.msrb.mxu0 %v6821_v35  ;;  %3138 = vmatpush.bf16.msra.mxu2 %v6825_v55  ;;  %v6817_v2 = vor.u32 %v8036_v37, %v6814_v25 }
 0x3c8   : > { %2478 = vst.msk [vmem:[#allocation2 + $0x28] sm:$0xff] %vm9804_vm6, %v2466_v61  ;;  %v2617_v27 = vunpack.c.l.b16 %v2583_v0  ;;  %v2618_v31 = vunpack.c.h.b16 %v2583_v0  ;;  %v2629_v34 = vor.u32 %v2628_v13, %v2625_v58  ;;  %v2525_v36 = vunpack.c.l.b16 %v2487_v33  ;;  %v6804_v35 = vld [vmem:[%s11756_s5 + $0x30] sm:$0xf]  ;;  %v6796_v5 = vld [vmem:[%s11756_s5 + $0x20] sm:$0xf] }
 0x3c9   : > { %v2401_v15 = vpop.f32.mrf.mxu2  ;;  %v2434_v56 = vpop.f32.mrf.mxu3  ;;  %v2526_v52 = vunpack.c.h.b16 %v2487_v33  ;;  %v6809_v58 = vor.u32 %v8034_v29, %v6806_v49 }
 0x3ca   : > { %v2435_v20 = vadd.f32 %v2434_v56, %v2401_v15  ;;  %v2337_v21 = vpop.f32.mrf.mxu0  ;;  %v2370_v22 = vpop.f32.mrf.mxu1  ;;  %v9923_v19 = vpack.c.b16 %v2617_v27, %v2617_v27  ;;  %v9925_v9 = vpack.c.b16 %v2618_v31, %v2618_v31  ;;  %v2646_v27 = vor.u32 %v2645_v38, %v2642_v24 }
 0x3cb   : > { %v2371_v46 = vadd.f32 %v2370_v22, %v2337_v21  ;;  %3081 = vmatpush.bf16.msrb.mxu0 %v6813_v48  ;;  %v6805_v22 = vor.u32 %v8035_v51, %v6804_v35  ;;  %3139 = vmatpush.bf16.msra.mxu2 %v6817_v2  ;;  %v8029_v2 = vld [vmem:[%s11756_s5 + $0x4] sm:$0xf0] }
 0x3cc   : > { %v2456_v26 = vmax.f32 %v9685_v50, %v2435_v20  ;;  %v2631_v12 = vshrl.u32 %v9923_v19, 16  ;;  %v2634_v3 = vshll.u32 %v9923_v19, 16  ;;  %v2648_v4 = vshrl.u32 %v9925_v9, 16 }
 0x3cd   : > { %v2651_v39 = vshll.u32 %v9925_v9, 16  ;;  %v2457_v6 = vmax.f32 %v9900_v42, %v2371_v46  ;;  %v8033_v42 = vld [vmem:[%s11756_s5 + $0x24] sm:$0xf0]  ;;  %v6780_v46 = vld [vmem:[%s11756_s5] sm:$0xf] }
 0x3ce   : > { %v2467_v30 = vpack.c.bf16 %v2456_v26, %v2455_v16  ;;  %v2633_v44 = vrot.slane %v2631_v12, 1  ;;  %v2636_v50 = vrot.slane %v2634_v3, 2  ;;  %v2650_v41 = vrot.slane %v2648_v4, 1  ;;  %v8032_v26 = vld [vmem:[%s11756_s5 + $0x24] sm:$0xf] }
 0x3cf   : > { %v2653_v57 = vrot.slane %v2651_v39, 2  ;;  %v9946_v61 = vld [vmem:[#allocation2 + $0x28] sm:$0xff]  ;;  %3082 = vmatpush.bf16.msrb.mxu0 %v6805_v22  ;;  %v3214_v3 = vrot.slane %v9950_v54, 2  ;;  %v3217_v4 = vrot.slane %v9972_v53, 2  ;;  %v6797_v39 = vor.u32 %v8033_v42, %v6796_v5  ;;  %3140 = vmatpush.bf16.msra.mxu2 %v6809_v58  ;;  %v6790_v54 = vld [vmem:[%s11756_s5 + $0x18] sm:$0xf0] }
 0x3d0   : > { %2479 = vst.msk [vmem:[#allocation2 + $0x30] sm:$0xff] %vm9804_vm6, %v2467_v30  ;;  %v2637_v0 = vor.u32 %v2636_v50, %v2633_v44  ;;  %v2527_v23 = vunpack.c.l.b16 %v9946_v61  ;;  %v2528_v40 = vunpack.c.h.b16 %v9946_v61  ;;  %v6798_v12 = vld [vmem:[%s11756_s5 + $0x28] sm:$0xf0]  ;;  %v6788_v44 = vld [vmem:[%s11756_s5 + $0x10] sm:$0xf]  ;;  %v6781_v5 = vor.u32 %v8029_v2, %v6780_v46 }
 0x3d1   : > { %v2403_v59 = vpop.f32.mrf.mxu2  ;;  %v2436_v62 = vpop.f32.mrf.mxu3  ;;  %v2654_v31 = vor.u32 %v2653_v57, %v2650_v41  ;;  %v8031_v50 = vld [vmem:[%s11756_s5 + $0x14] sm:$0xf0]  ;;  %v3196_v42 = vld [vmem:[#allocation2 + $0x20] sm:$0x88] }
 0x3d2   : > { %v2437_v15 = vadd.f32 %v2436_v62, %v2403_v59  ;;  %v2340_v56 = vpop.f32.mrf.mxu0  ;;  %v2373_v17 = vpop.f32.mrf.mxu1  ;;  %v2638_v18 = vsel %vm2621_vm8, %v2629_v34, %v2637_v0  ;;  %v9959_v63 = vpack.c.b16 %v2527_v23, %v2525_v36  ;;  %v9977_v21 = vpack.c.b16 %v2528_v40, %v2526_v52  ;;  %v8030_v36 = vld [vmem:[%s11756_s5 + $0x14] sm:$0xf] }
 0x3d3   : > { %2874 = vmatmul.bf16.gmra.mxu0 %v2638_v18  ;;  %v2655_v20 = vsel %vm2621_vm8, %v2646_v27, %v2654_v31  ;;  %2932 = vmatmul.bf16.gmra.mxu2 %v2638_v18  ;;  %v2374_v55 = vadd.f32 %v2373_v17, %v2340_v56  ;;  %v6801_v34 = vor.u32 %v8032_v26, %v6798_v12  ;;  %v8045_v56 = vld [vmem:[%s11756_s5 + $0x84] sm:$0xf0]  ;;  %v6782_v12 = vld [vmem:[%s11756_s5 + $0x8] sm:$0xf0]  ;;  %v3223_v53 = vunpack.c.h.b16 %v3196_v42 }
 0x3d4   : > { %v2458_v16 = vmax.f32 %v9904_v11, %v2437_v15  ;;  %6771 = vmatmul.msk.bf16.gmra.mxu1 %vm2848_vm7, %v2655_v20  ;;  %6775 = vmatmul.msk.bf16.gmra.mxu3 %vm2848_vm7, %v2655_v20  ;;  %v2664_v14 = vshrl.u32 %v9959_v63, 16  ;;  %v2667_v10 = vshll.u32 %v9959_v63, 16  ;;  %v3215_v11 = vrot.slane %v9923_v19, 2  ;;  %v6844_v15 = vld [vmem:[%s11756_s5 + $0x80] sm:$0xf] }
 0x3d5   : > { %v2681_v19 = vshrl.u32 %v9977_v21, 16  ;;  %v2684_v38 = vshll.u32 %v9977_v21, 16  ;;  %3083 = vmatpush.bf16.msrb.mxu0 %v6797_v39  ;;  %v6789_v57 = vor.u32 %v8031_v50, %v6788_v44  ;;  %v2459_v17 = vmax.f32 %v9707_v1, %v2374_v55  ;;  %v8044_v20 = vld [vmem:[%s11756_s5 + $0x84] sm:$0xf]  ;;  %v6846_v1 = vld [vmem:[%s11756_s5 + $0x88] sm:$0xf0]  ;;  %3141 = vmatpush.bf16.msra.mxu2 %v6801_v34 }
 0x3d6   : > { %v2468_v13 = vpack.c.bf16 %v2458_v16, %v2457_v6  ;;  %v10003_v24 = vrot.slane %v2664_v14, 2  ;;  %v10009_v37 = vrot.slane %v2667_v10, 3  ;;  %v10027_v0 = vsel %vm2535_vm9, %v3214_v3, %v3215_v11 }
 0x3d7   : > { %v2584_v33 = vld [vmem:[#allocation2 + $0x30] sm:$0x77]  ;;  %v2683_v18 = vrot.slane %v2681_v19, 2  ;;  %v2686_v35 = vrot.slane %v2684_v38, 3  ;;  %v2490_v51 = vld [vmem:[#allocation2 + $0x30] sm:$0x88]  ;;  %v6845_v29 = vor.u32 %v8045_v56, %v6844_v15  ;;  %v6793_v10 = vor.u32 %v8030_v36, %v6790_v54 }
 0x3d8   : > { %2480 = vst.msk [vmem:[#allocation2 + $0x38] sm:$0xff] %vm9804_vm6, %v2468_v13  ;;  %v2658_v48 = vunpack.c.l.b16 %v2584_v33  ;;  %v2659_v30 = vunpack.c.h.b16 %v2584_v33  ;;  %v6849_v58 = vor.u32 %v8044_v20, %v6846_v1  ;;  %v2670_v3 = vor.u32 %v10009_v37, %v10003_v24 }
 0x3d9   : > { %v2406_v41 = vpop.f32.mrf.mxu2  ;;  %v2439_v25 = vpop.f32.mrf.mxu3  ;;  %3084 = vmatpush.bf16.msrb.mxu0 %v6789_v57  ;;  %3114 = vmatpush.bf16.msrb.mxu1 %v6845_v29  ;;  %v2546_v38 = vunpack.c.l.b16 %v2490_v51  ;;  %v2547_v39 = vunpack.c.h.b16 %v2490_v51  ;;  %v3218_v50 = vrot.slane %v9925_v9, 2  ;;  %v2687_v34 = vor.u32 %v2686_v35, %v2683_v18 }
 0x3da   : > { %v2440_v59 = vadd.f32 %v2439_v25, %v2406_v41  ;;  %v2342_v62 = vpop.f32.mrf.mxu0  ;;  %v2375_v27 = vpop.f32.mrf.mxu1  ;;  %v10029_v31 = vpack.c.b16 %v2658_v48, %v2658_v48  ;;  %v10031_v52 = vpack.c.b16 %v2659_v30, %v2659_v30  ;;  %3172 = vmatpush.bf16.msra.mxu3 %v6849_v58  ;;  %3142 = vmatpush.bf16.msra.mxu2 %v6793_v10  ;;  %v3222_v37 = vunpack.c.l.b16 %v3196_v42 }
 0x3db   : > { %v10073_v45 = vsel %vm2535_vm9, %v3217_v4, %v3218_v50  ;;  %v6936_v50 = vld [vmem:[%s11756_s5 + $0x198] sm:$0xf0] }
 0x3dc   : > { %v2460_v22 = vmax.f32 %v9733_v7, %v2440_v59  ;;  %v2672_v49 = vshrl.u32 %v10029_v31, 16  ;;  %v2675_v6 = vshll.u32 %v10029_v31, 16  ;;  %v2689_v16 = vshrl.u32 %v10031_v52, 16  ;;  %v8028_v7 = vld [vmem:[%s11756_s5 + $0x4] sm:$0xf] }
 0x3dd   : > { %v2692_v14 = vshll.u32 %v10031_v52, 16  ;;  %3085 = vmatpush.bf16.msrb.mxu0 %v6781_v5  ;;  %v6785_v24 = vor.u32 %v8028_v7, %v6782_v12  ;;  %v3224_v59 = vpack.c.b16 %v2527_v23, %v3222_v37  ;;  %v3227_v27 = vrot.slane %v10029_v31, 3 }
 0x3de   : > { %v2469_v11 = vpack.c.bf16 %v2460_v22, %v2459_v17  ;;  %v2674_v13 = vrot.slane %v2672_v49, 2  ;;  %v2677_v55 = vrot.slane %v2675_v6, 3  ;;  %v2691_v26 = vrot.slane %v2689_v16, 2 }
 0x3df   : > { %v2694_v33 = vrot.slane %v2692_v14, 3  ;;  %v2491_v19 = vld [vmem:[#allocation2 + $0x38] sm:$0xff]  ;;  %3143 = vmatpush.bf16.msra.mxu2 %v6785_v24  ;;  %v3226_v17 = vrot.slane %v3224_v59, 3  ;;  %v3225_v23 = vpack.c.b16 %v2528_v40, %v3223_v53  ;;  %v3230_v18 = vrot.slane %v10031_v52, 3 }
 0x3e0   : > { %2481 = vst.msk [vmem:[#allocation2 + $0x40] sm:$0xff] %vm9804_vm6, %v2469_v11  ;;  %v2678_v48 = vor.u32 %v2677_v55, %v2674_v13  ;;  %v2548_v30 = vunpack.c.l.b16 %v2491_v19  ;;  %v2549_v44 = vunpack.c.h.b16 %v2491_v19  ;;  %v8075_v59 = vld [vmem:[%s11756_s5 + $0x174] sm:$0xf0]  ;;  %v6920_v53 = vld [vmem:[%s11756_s5 + $0x178] sm:$0xf0] }
 0x3e1   : > { %v2408_v41 = vpop.f32.mrf.mxu2  ;;  %v2441_v25 = vpop.f32.mrf.mxu3  ;;  %v2695_v57 = vor.u32 %v2694_v33, %v2691_v26  ;;  %v10089_v31 = vsel %vm2556_vm11, %v3226_v17, %v3227_v27  ;;  %v3229_v20 = vrot.slane %v3225_v23, 3  ;;  %v8074_v27 = vld [vmem:[%s11756_s5 + $0x174] sm:$0xf]  ;;  %v6910_v17 = vld [vmem:[%s11756_s5 + $0x160] sm:$0xf] }
 0x3e2   : > { %v2679_v36 = vsel %vm2662_vm10, %v2670_v3, %v2678_v48  ;;  %v10066_v54 = vpack.c.b16 %v2548_v30, %v2546_v38  ;;  %v10068_v46 = vpack.c.b16 %v2549_v44, %v2547_v39  ;;  %v2486_v38 = vld [vmem:[#allocation2 + $0x20] sm:$0x11]  ;;  %v6934_v39 = vld [vmem:[%s11756_s5 + $0x190] sm:$0xf]  ;;  %v8079_v48 = vld [vmem:[%s11756_s5 + $0x194] sm:$0xf0] }
 0x3e3   : > { %2879 = vmatmul.bf16.gmra.mxu0 %v2679_v36  ;;  %v2696_v9 = vsel %vm2662_vm10, %v2687_v34, %v2695_v57  ;;  %2937 = vmatmul.bf16.gmra.mxu2 %v2679_v36  ;;  %v10096_v61 = vsel %vm2556_vm11, %v3229_v20, %v3230_v18  ;;  %v8077_v41 = vld [vmem:[%s11756_s5 + $0x184] sm:$0xf0]  ;;  %v8076_v34 = vld [vmem:[%s11756_s5 + $0x184] sm:$0xf]  ;;  %v6928_v57 = vld [vmem:[%s11756_s5 + $0x188] sm:$0xf0]  ;;  %v2510_v24 = vunpack.c.h.b16 %v2486_v38 }
 0x3e4   : > { %6772 = vmatmul.msk.bf16.gmra.mxu1 %vm2848_vm7, %v2696_v9  ;;  %6776 = vmatmul.msk.bf16.gmra.mxu3 %vm2848_vm7, %v2696_v9  ;;  %v2705_v62 = vshrl.u32 %v10066_v54, 16  ;;  %v2708_v4 = vshll.u32 %v10066_v54, 16  ;;  %v2722_v2 = vshrl.u32 %v10068_v46, 16  ;;  %v2725_v56 = vshll.u32 %v10068_v46, 16  ;;  %v6918_v9 = vld [vmem:[%s11756_s5 + $0x170] sm:$0xf] }
 0x3e5   : > { %v6931_v36 = vor.u32 %v8076_v34, %v6928_v57  ;;  %v8073_v23 = vld [vmem:[%s11756_s5 + $0x164] sm:$0xf0]  ;;  %v8072_v18 = vld [vmem:[%s11756_s5 + $0x164] sm:$0xf]  ;;  %v2518_v20 = vrot.slane %v9883_v60, 1 }
 0x3e6   : > { %v2707_v29 = vrot.slane %v2705_v62, 3  ;;  %v2710_v1 = vrot.slane %v2708_v4, 4  ;;  %v2724_v14 = vrot.slane %v2722_v2, 3  ;;  %v2727_v10 = vrot.slane %v2725_v56, 4  ;;  %v8071_v60 = vld [vmem:[%s11756_s5 + $0x154] sm:$0xf0] }
 0x3e7   : > { %v2585_v15 = vld [vmem:[#allocation2 + $0x40] sm:$0xff]  ;;  %v2514_v4 = vpack.c.b16 %v2510_v24, %v2510_v24  ;;  %v6919_v2 = vor.u32 %v8075_v59, %v6918_v9  ;;  %v8065_v34 = vld [vmem:[%s11756_s5 + $0x124] sm:$0xf0] }
 0x3e8   : > { %v2699_v35 = vunpack.c.l.b16 %v2585_v15  ;;  %v2700_v51 = vunpack.c.h.b16 %v2585_v15  ;;  %v2711_v55 = vor.u32 %v2710_v1, %v2707_v29  ;;  %v2728_v12 = vor.u32 %v2727_v10, %v2724_v14  ;;  %v2489_v10 = vld [vmem:[#allocation2 + $0x30] sm:$0x33]  ;;  %v6942_v57 = vld [vmem:[%s11756_s5 + $0x1a0] sm:$0xf]  ;;  %v8081_v24 = vld [vmem:[%s11756_s5 + $0x1a4] sm:$0xf0] }
 0x3e9   : > { %v6923_v15 = vor.u32 %v8074_v27, %v6920_v53  ;;  %v2515_v29 = vrot.slane %v9873_v47, 1  ;;  %v6902_v47 = vld [vmem:[%s11756_s5 + $0x150] sm:$0xf]  ;;  %v6943_v59 = vor.u32 %v8081_v24, %v6942_v57  ;;  %v6944_v27 = vld [vmem:[%s11756_s5 + $0x1a8] sm:$0xf0] }
 0x3ea   : > { %v2701_v22 = vpack.c.b16 %v2699_v35, %v2699_v35  ;;  %v2702_v49 = vpack.c.b16 %v2700_v51, %v2700_v51  ;;  %v10091_v6 = vpack.c.b16 %v2699_v35, %v2548_v30  ;;  %v10093_v16 = vpack.c.b16 %v2700_v51, %v2549_v44  ;;  %v8078_v30 = vld [vmem:[%s11756_s5 + $0x194] sm:$0xf]  ;;  %v6912_v35 = vld [vmem:[%s11756_s5 + $0x168] sm:$0xf0] }
 0x3eb   : > { %v2509_v44 = vunpack.c.l.b16 %v2486_v38  ;;  %v6939_v25 = vor.u32 %v8078_v30, %v6936_v50  ;;  %v2519_v51 = vrot.slane %v2514_v4, 1  ;;  %v6888_v30 = vld [vmem:[%s11756_s5 + $0x138] sm:$0xf0]  ;;  %v2536_v50 = vrot.slane %v9959_v63, 2  ;;  %v8064_v63 = vld [vmem:[%s11756_s5 + $0x124] sm:$0xf]  ;;  %3393 = vmatpush.bf16.msra.mxu1 %v6943_v59 }
 0x3ec   : > { %v2713_v40 = vshrl.u32 %v2701_v22, 16  ;;  %v2716_v52 = vshll.u32 %v2701_v22, 16  ;;  %v2730_v5 = vshrl.u32 %v2702_v49, 16  ;;  %v2733_v7 = vshll.u32 %v2702_v49, 16 }
 0x3ed   : > { %3415 = vmatpush.bf16.msrb.mxu2 %v6939_v25  ;;  %v2513_v62 = vpack.c.b16 %v2509_v44, %v2509_v44  ;;  %v6911_v22 = vor.u32 %v8073_v23, %v6910_v17  ;;  %v6915_v49 = vor.u32 %v8072_v18, %v6912_v35  ;;  %v2520_v14 = vsel %vm1204_vm3, %v2518_v20, %v2519_v51  ;;  %v6878_v25 = vld [vmem:[%s11756_s5 + $0x120] sm:$0xf] }
 0x3ee   : > { %v2715_v58 = vrot.slane %v2713_v40, 3  ;;  %v2718_v42 = vrot.slane %v2716_v52, 4  ;;  %v2732_v11 = vrot.slane %v2730_v5, 3  ;;  %v2735_v13 = vrot.slane %v2733_v7, 4  ;;  %v8070_v40 = vld [vmem:[%s11756_s5 + $0x154] sm:$0xf] }
 0x3ef   : > { %v2516_v56 = vrot.slane %v2513_v62, 1  ;;  %v6903_v52 = vor.u32 %v8071_v60, %v6902_v47  ;;  %v6904_v5 = vld [vmem:[%s11756_s5 + $0x158] sm:$0xf0]  ;;  %v6894_v7 = vld [vmem:[%s11756_s5 + $0x140] sm:$0xf]  ;;  %v6879_v9 = vor.u32 %v8065_v34, %v6878_v25  ;;  %v2560_v20 = vrot.slane %v10068_v46, 3 }
 0x3f0   : > { %v2719_v26 = vor.u32 %v2718_v42, %v2715_v58  ;;  %v2736_v3 = vor.u32 %v2735_v13, %v2732_v11  ;;  %v2529_v58 = vunpack.c.l.b16 %v2489_v10  ;;  %v2530_v42 = vunpack.c.h.b16 %v2489_v10  ;;  %v8069_v13 = vld [vmem:[%s11756_s5 + $0x144] sm:$0xf0]  ;;  %v8080_v62 = vld [vmem:[%s11756_s5 + $0x1a4] sm:$0xf] }
 0x3f1   : > { %3416 = vmatpush.bf16.msrb.mxu2 %v6931_v36  ;;  %v2517_v1 = vsel %vm1204_vm3, %v2515_v29, %v2516_v56  ;;  %v6907_v11 = vor.u32 %v8070_v40, %v6904_v5  ;;  %v2539_v36 = vrot.slane %v9977_v21, 2  ;;  %v2492_v21 = vld [vmem:[#allocation2 + $0x40] sm:$0x77]  ;;  %v2557_v29 = vrot.slane %v10066_v54, 3 }
 0x3f2   : > { %v2720_v33 = vsel %vm2703_vm12, %v2711_v55, %v2719_v26  ;;  %v2737_v19 = vsel %vm2703_vm12, %v2728_v12, %v2736_v3  ;;  %v8068_v55 = vld [vmem:[%s11756_s5 + $0x144] sm:$0xf]  ;;  %v6896_v26 = vld [vmem:[%s11756_s5 + $0x148] sm:$0xf0]  ;;  %v6895_v12 = vor.u32 %v8069_v13, %v6894_v7  ;;  %v2534_v38 = vpack.c.b16 %v2530_v42, %v2530_v42 }
 0x3f3   : > { %2884 = vmatmul.bf16.gmra.mxu0 %v2720_v33  ;;  %2942 = vmatmul.bf16.gmra.mxu2 %v2720_v33  ;;  %v6899_v3 = vor.u32 %v8068_v55, %v6896_v26  ;;  %v6886_v33 = vld [vmem:[%s11756_s5 + $0x130] sm:$0xf]  ;;  %v2550_v56 = vunpack.c.l.b16 %v2492_v21  ;;  %v2551_v17 = vunpack.c.h.b16 %v2492_v21 }
 0x3f4   : > { %6773 = vmatmul.msk.bf16.gmra.mxu1 %vm2848_vm7, %v2737_v19  ;;  %6777 = vmatmul.msk.bf16.gmra.mxu3 %vm2848_vm7, %v2737_v19  ;;  %v2533_v19 = vpack.c.b16 %v2529_v58, %v2529_v58 }
 0x3f5   : > { %3417 = vmatpush.bf16.msrb.mxu2 %v6923_v15  ;;  %v2554_v23 = vpack.c.b16 %v2550_v56, %v2550_v56  ;;  %v2555_v18 = vpack.c.b16 %v2551_v17, %v2551_v17 }
 0x3f7   : > { %v2558_v35 = vrot.slane %v2554_v23, 3  ;;  %v2561_v51 = vrot.slane %v2555_v18, 3 }
 0x3f9   : > { %3418 = vmatpush.bf16.msrb.mxu2 %v6915_v49  ;;  %v2562_v49 = vsel %vm2556_vm11, %v2560_v20, %v2561_v51 }
 0x3fd   : > { %3419 = vmatpush.bf16.msrb.mxu2 %v6907_v11 }
 0x401   : > { %3420 = vmatpush.bf16.msrb.mxu2 %v6899_v3 }
 0x403   : > { %3086 = vmatmul.bf16.vlgmr.msrb.gmra.mxu0 %v9830_v32  ;;  %3144 = vmatmul.bf16.vlgmr.msra.gmra.mxu2 %v9830_v32  ;;  %v6935_v32 = vor.u32 %v8079_v48, %v6934_v39  ;;  %v8067_v39 = vld [vmem:[%s11756_s5 + $0x134] sm:$0xf0]  ;;  %v8066_v48 = vld [vmem:[%s11756_s5 + $0x134] sm:$0xf] }
 0x404   : > { %6850 = vmatmul.msk.bf16.vlgmr.msrb.gmra.mxu1 %vm2848_vm7, %v9832_v8  ;;  %6854 = vmatmul.msk.bf16.vlgmr.msra.gmra.mxu3 %vm2848_vm7, %v9832_v8  ;;  %v6926_v8 = vld [vmem:[%s11756_s5 + $0x180] sm:$0xf]  ;;  %v6887_v44 = vor.u32 %v8067_v39, %v6886_v33 }
 0x405   : > { %3357 = vmatpush.bf16.msra.mxu0 %v6935_v32  ;;  %v6927_v37 = vor.u32 %v8077_v41, %v6926_v8  ;;  %v6891_v32 = vor.u32 %v8066_v48, %v6888_v30  ;;  %v2537_v8 = vrot.slane %v2533_v19, 2  ;;  %v2540_v41 = vrot.slane %v2534_v38, 2 }
 0x407   : > { %3421 = vmatpush.bf16.msrb.mxu2 %v6891_v32  ;;  %v2538_v53 = vsel %vm2535_vm9, %v2536_v50, %v2537_v8  ;;  %v2541_v15 = vsel %vm2535_vm9, %v2539_v36, %v2540_v41 }
 0x409   : > { %3358 = vmatpush.bf16.msra.mxu0 %v6927_v37  ;;  %v6880_v37 = vld [vmem:[%s11756_s5 + $0x128] sm:$0xf0]  ;;  %s8362_s5 = sshra.s32 %s6033_s2, 4  ;;  %s8363_s5 = int_to_ptr.hbm [resolvable:$true] %s8362_s5 }
 0x40a   : > { %v6883_v4 = vor.u32 %v8064_v63, %v6880_v37  ;;  %p8369_p0 = scmp.lt.s32.totalorder %s8363_s5, %s11717_s20 }
 0x40c   : > { %3422 = vmatpush.bf16.msrb.mxu2 %v6883_v4 }
 0x40d   : > { %3359 = vmatpush.bf16.msra.mxu0 %v6919_v2  ;;  %v6947_v2 = vor.u32 %v8080_v62, %v6944_v27 }
 0x40f   : > { %3451 = vmatpush.bf16.msrb.mxu3 %v6947_v2 }
 0x411   : > { %3360 = vmatpush.bf16.msra.mxu0 %v6911_v22  ;;  %v2559_v22 = vsel %vm2556_vm11, %v2557_v29, %v2558_v35 }
 0x413   : > { %3091 = vmatmul.bf16.gmra.mxu0 %v2517_v1  ;;  %3149 = vmatmul.bf16.gmra.mxu2 %v2517_v1 }
 0x414   : > { %6851 = vmatmul.msk.bf16.gmra.mxu1 %vm2848_vm7, %v2520_v14  ;;  %6855 = vmatmul.msk.bf16.gmra.mxu3 %vm2848_vm7, %v2520_v14 }
 0x415   : > { %3361 = vmatpush.bf16.msra.mxu0 %v6903_v52 }
 0x419   : > { %3362 = vmatpush.bf16.msra.mxu0 %v6895_v12 }
 0x41d   : > { %3363 = vmatpush.bf16.msra.mxu0 %v6887_v44 }
 0x421   : > { %3364 = vmatpush.bf16.msra.mxu0 %v6879_v9 }
 0x423   : > { %3096 = vmatmul.bf16.gmra.mxu0 %v2538_v53  ;;  %3154 = vmatmul.bf16.gmra.mxu2 %v2538_v53 }
 0x424   : > { %6852 = vmatmul.msk.bf16.gmra.mxu1 %vm2848_vm7, %v2541_v15  ;;  %6856 = vmatmul.msk.bf16.gmra.mxu3 %vm2848_vm7, %v2541_v15 }
 0x433   : > { %3101 = vmatmul.bf16.gmra.mxu0 %v2559_v22  ;;  %3159 = vmatmul.bf16.gmra.mxu2 %v2559_v22 }
 0x434   : > { %6853 = vmatmul.msk.bf16.gmra.mxu1 %vm2848_vm7, %v2562_v49  ;;  %6857 = vmatmul.msk.bf16.gmra.mxu3 %vm2848_vm7, %v2562_v49 }
 0x43e   : > { %v2870_v1 = vpop.f32.mrf.mxu0  ;;  %v2899_v14 = vpop.f32.mrf.mxu1 }
 0x43f   : > { %v2900_v10 = vadd.f32 %v2899_v14, %v2870_v1 }
 0x443   : > { %3365 = vmatmul.bf16.vlgmr.msra.gmra.mxu0 %v9843_v28  ;;  %3423 = vmatmul.bf16.vlgmr.msrb.gmra.mxu2 %v9843_v28 }
 0x444   : > { %6948 = vmatmul.msk.bf16.vlgmr.msra.gmra.mxu1 %vm2848_vm7, %v9848_v43  ;;  %6952 = vmatmul.msk.bf16.vlgmr.msrb.gmra.mxu3 %vm2848_vm7, %v9848_v43 }
 0x445   : > { %v2928_v54 = vpop.f32.mrf.mxu2  ;;  %v2957_v46 = vpop.f32.mrf.mxu3 }
 0x446   : > { %v2958_v47 = vadd.f32 %v2957_v46, %v2928_v54  ;;  %v10238_v60 = vpop.f32.mrf.mxu0  ;;  %v10240_v40 = vpop.f32.mrf.mxu1 }
 0x44d   : > { %v10242_v52 = vpop.f32.mrf.mxu2  ;;  %v10244_v5 = vpop.f32.mrf.mxu3 }
 0x450   : > { %v2875_v7 = vpop.f32.mrf.mxu0 }
 0x451   : > { %v2904_v58 = vpop.f32.mrf.mxu1 }
 0x452   : > { %v2905_v28 = vadd.f32 %v2904_v58, %v2875_v7 }
 0x453   : > { %3370 = vmatmul.bf16.gmra.mxu0 %v10027_v0  ;;  %3428 = vmatmul.bf16.gmra.mxu2 %v10027_v0 }
 0x454   : > { %6949 = vmatmul.msk.bf16.gmra.mxu1 %vm2848_vm7, %v10073_v45  ;;  %6953 = vmatmul.msk.bf16.gmra.mxu3 %vm2848_vm7, %v10073_v45 }
 0x456   : > { %v2933_v43 = vpop.f32.mrf.mxu2 }
 0x457   : > { %v2962_v42 = vpop.f32.mrf.mxu3 }
 0x458   : > { %v2963_v11 = vadd.f32 %v2962_v42, %v2933_v43  ;;  %v10252_v13 = vpop.f32.mrf.mxu0 }
 0x459   : > { %v10254_v55 = vpop.f32.mrf.mxu1 }
 0x45e   : > { %v10256_v26 = vpop.f32.mrf.mxu2 }
 0x45f   : > { %v10258_v12 = vpop.f32.mrf.mxu3 }
 0x460   : > { %v2880_v3 = vpop.f32.mrf.mxu0 }
 0x461   : > { %v2909_v33 = vpop.f32.mrf.mxu1 }
 0x462   : > { %v2910_v0 = vadd.f32 %v2909_v33, %v2880_v3 }
 0x463   : > { %3375 = vmatmul.bf16.gmra.mxu0 %v10089_v31  ;;  %3433 = vmatmul.bf16.gmra.mxu2 %v10089_v31 }
 0x464   : > { %6950 = vmatmul.msk.bf16.gmra.mxu1 %vm2848_vm7, %v10096_v61  ;;  %6954 = vmatmul.msk.bf16.gmra.mxu3 %vm2848_vm7, %v10096_v61 }
 0x466   : > { %v2938_v45 = vpop.f32.mrf.mxu2 }
 0x467   : > { %v2967_v19 = vpop.f32.mrf.mxu3 }
 0x468   : > { %v2968_v38 = vadd.f32 %v2967_v19, %v2938_v45  ;;  %v10266_v39 = vpop.f32.mrf.mxu0 }
 0x469   : > { %v10268_v48 = vpop.f32.mrf.mxu1 }
 0x46e   : > { %v10270_v30 = vpop.f32.mrf.mxu2 }
 0x46f   : > { %v10272_v44 = vpop.f32.mrf.mxu3 }
 0x470   : > { %v2885_v32 = vpop.f32.mrf.mxu0 }
 0x471   : > { %v2914_v50 = vpop.f32.mrf.mxu1 }
 0x472   : > { %v2915_v31 = vadd.f32 %v2914_v50, %v2885_v32 }
 0x473   : > { %3380 = vmatmul.bf16.gmra.mxu0 %v10091_v6  ;;  %3438 = vmatmul.bf16.gmra.mxu2 %v10091_v6 }
 0x474   : > { %6951 = vmatmul.msk.bf16.gmra.mxu1 %vm2848_vm7, %v10093_v16  ;;  %6955 = vmatmul.msk.bf16.gmra.mxu3 %vm2848_vm7, %v10093_v16 }
 0x476   : > { %v2943_v61 = vpop.f32.mrf.mxu2 }
 0x477   : > { %v2972_v8 = vpop.f32.mrf.mxu3 }
 0x478   : > { %v2973_v41 = vadd.f32 %v2972_v8, %v2943_v61  ;;  %v10280_v25 = vpop.f32.mrf.mxu0 }
 0x479   : > { %v10282_v34 = vpop.f32.mrf.mxu1 }
 0x47e   : > { %v10284_v57 = vpop.f32.mrf.mxu2 }
 0x47f   : > { %v10286_v24 = vpop.f32.mrf.mxu3 }
 0x480   : > { %v3087_v63 = vpop.f32.mrf.mxu0 }
 0x481   : > { %v3088_v37 = vadd.f32 %v3087_v63, %v2900_v10  ;;  %v3116_v6 = vpop.f32.mrf.mxu1 }
 0x483   : > { %v3117_v36 = vadd.f32 %v3116_v6, %v3088_v37 }
 0x486   : > { %v3145_v9 = vpop.f32.mrf.mxu2 }
 0x487   : > { %v3146_v59 = vadd.f32 %v3145_v9, %v2958_v47  ;;  %v3174_v62 = vpop.f32.mrf.mxu3 }
 0x488   : > { %v10288_v27 = vpop.f32.mrf.mxu0 }
 0x489   : > { %v3175_v16 = vadd.f32 %v3174_v62, %v3146_v59  ;;  %v10290_v53 = vpop.f32.mrf.mxu1 }
 0x48e   : > { %v10292_v4 = vpop.f32.mrf.mxu2 }
 0x48f   : > { %v10294_v2 = vpop.f32.mrf.mxu3 }
 0x490   : > { %11759 = vst [vmem:[#allocation14_spill] sm:$0xff] %v10294_v2  ;;  %v3092_v15 = vpop.f32.mrf.mxu0 }
 0x491   : > { %v3093_v21 = vadd.f32 %v3092_v15, %v2905_v28  ;;  %v3121_v56 = vpop.f32.mrf.mxu1 }
 0x493   : > { %v10296_v17 = vadd.f32 %v3121_v56, %v3093_v21 }
 0x496   : > { %v3150_v23 = vpop.f32.mrf.mxu2 }
 0x497   : > { %v3151_v18 = vadd.f32 %v3150_v23, %v2963_v11  ;;  %v3179_v35 = vpop.f32.mrf.mxu3 }
 0x498   : > { %v10298_v51 = vpop.f32.mrf.mxu0 }
 0x499   : > { %v10300_v29 = vadd.f32 %v3179_v35, %v3151_v18  ;;  %v10302_v20 = vpop.f32.mrf.mxu1 }
 0x49b   : > { %11760 = vst [vmem:[#allocation15_spill] sm:$0xff] %v10300_v29 }
 0x49e   : > { %v10304_v22 = vpop.f32.mrf.mxu2 }
 0x49f   : > { %v10306_v49 = vpop.f32.mrf.mxu3 }
 0x4a0   : > { %v3097_v1 = vpop.f32.mrf.mxu0 }
 0x4a1   : > { %v3098_v14 = vadd.f32 %v3097_v1, %v2910_v0  ;;  %v3126_v10 = vpop.f32.mrf.mxu1 }
 0x4a3   : > { %v10308_v54 = vadd.f32 %v3126_v10, %v3098_v14 }
 0x4a6   : > { %v3155_v46 = vpop.f32.mrf.mxu2 }
 0x4a7   : > { %v3156_v47 = vadd.f32 %v3155_v46, %v2968_v38  ;;  %v3184_v7 = vpop.f32.mrf.mxu3 }
 0x4a8   : > { %v3099_v58 = vpop.f32.mrf.mxu0 }
 0x4a9   : > { %v10310_v28 = vadd.f32 %v3184_v7, %v3156_v47  ;;  %v10312_v43 = vpop.f32.mrf.mxu1 }
 0x4ab   : > { %11761 = vst [vmem:[#allocation16_spill] sm:$0xff] %v10310_v28  ;;  %v2965_v28 = vadd.f32 %v10258_v12, %v10256_v26 }
 0x4ad   : > { %v3153_v26 = vadd.f32 %v10304_v22, %v2965_v28 }
 0x4ae   : > { %v10314_v42 = vpop.f32.mrf.mxu2 }
 0x4af   : > { %v10316_v11 = vpop.f32.mrf.mxu3 }
 0x4b0   : > { %v3102_v3 = vpop.f32.mrf.mxu0 }
 0x4b1   : > { %v3103_v33 = vadd.f32 %v3102_v3, %v2915_v31  ;;  %v3131_v45 = vpop.f32.mrf.mxu1 }
 0x4b3   : > { %v3132_v19 = vadd.f32 %v3131_v45, %v3103_v33 }
 0x4b6   : > { %v3160_v0 = vpop.f32.mrf.mxu2 }
 0x4b7   : > { %v3161_v32 = vadd.f32 %v3160_v0, %v2973_v41  ;;  %v3189_v50 = vpop.f32.mrf.mxu3 }
 0x4b8   : > { %v3104_v61 = vpop.f32.mrf.mxu0 }
 0x4b9   : > { %v10318_v8 = vadd.f32 %v3189_v50, %v3161_v32  ;;  %v3133_v38 = vpop.f32.mrf.mxu1 }
 0x4be   : > { %v10320_v63 = vpop.f32.mrf.mxu2 }
 0x4bf   : > { %v10322_v37 = vpop.f32.mrf.mxu3 }
 0x4c0   : > { %v3366_v6 = vpop.f32.mrf.mxu0 }
 0x4c1   : > { %v3395_v9 = vpop.f32.mrf.mxu1 }
 0x4c2   : > { %v3396_v59 = vadd.f32 %v3395_v9, %v3366_v6 }
 0x4c4   : > { %v10324_v62 = vadd.f32 %v3396_v59, %v3117_v36 }
 0x4c6   : > { %11762 = vst [vmem:[#allocation17_spill] sm:$0xff] %v10324_v62  ;;  %v3424_v15 = vpop.f32.mrf.mxu2 }
 0x4c7   : > { %v3453_v31 = vpop.f32.mrf.mxu3 }
 0x4c8   : > { %v3454_v21 = vadd.f32 %v3453_v31, %v3424_v15  ;;  %v10326_v56 = vpop.f32.mrf.mxu0  ;;  %v2902_v31 = vadd.f32 %v10240_v40, %v10238_v60  ;;  %v3489_v40 = vld [vmem:[%s11766_s6] sm:$0x3]  ;;  %s8364_s6 = scalar_lea.hbm %s8363_s5, 4 }
 0x4c9   : > { %v10328_v41 = vpop.f32.mrf.mxu1  ;;  %p8365_p11 = scmp.ne.s32.totalorder %s8363_s5, %s8364_s6  ;;  %p8370_p1 = scmp.lt.s32.totalorder %s8368_s28, %s8364_s6 }
 0x4ca   : > { %v10330_v23 = vadd.f32 %v3454_v21, %v3175_v16  ;;  %v2912_v21 = vadd.f32 %v10268_v48, %v10266_v39  ;;  %v3090_v62 = vadd.f32 %v10288_v27, %v2902_v31 }
 0x4cb   : > { %p8366_p12 = pnand %p8365_p11, %p8554_p5  ;;  %p8371_p2 = por %p8370_p1, %p8369_p0 }
 0x4cc   : > { %11763 = vst [vmem:[#allocation18_spill] sm:$0xff] %v10330_v23  ;;  %v2917_v23 = vadd.f32 %v10282_v34, %v10280_v25  ;;  %v3100_v29 = vadd.f32 %v3099_v58, %v2912_v21  ;;  %v2970_v25 = vadd.f32 %v10272_v44, %v10270_v30  ;;  %v2975_v34 = vadd.f32 %v10286_v24, %v10284_v57 }
 0x4cd   : > { %v3491_v30 = vperm.slane %v3489_v40, 0  ;;  %p8367_p13 = pneg %p8366_p12 }
 0x4ce   : > { %v10332_v18 = vpop.f32.mrf.mxu2  ;;  %v3105_v60 = vadd.f32 %v3104_v61, %v2917_v23  ;;  %v3129_v12 = vadd.f32 %v10312_v43, %v3100_v29  ;;  %v3158_v23 = vadd.f32 %v10314_v42, %v2970_v25  ;;  %v3492_v42 = vperm.slane %v3489_v40, 1  ;;  %v11770_v25 = vld [vmem:[#allocation14_spill] sm:$0xff] }
 0x4cf   : > { %11764 = vst [vmem:[#allocation19_spill] sm:$0xff] %v10332_v18  ;;  %v10334_v35 = vpop.f32.mrf.mxu3  ;;  %v2960_v18 = vadd.f32 %v10244_v5, %v10242_v52  ;;  %v3119_v5 = vadd.f32 %v10290_v53, %v3090_v62  ;;  %v3163_v53 = vadd.f32 %v10320_v63, %v2975_v34  ;;  %p8372_p3 = pnand %p8371_p2, %p8367_p13 }
 0x4d0   : > { %11765 = vst [vmem:[#allocation20_spill] sm:$0xff] %v10334_v35  ;;  %v3371_v1 = vpop.f32.mrf.mxu0  ;;  %v2907_v35 = vadd.f32 %v10254_v55, %v10252_v13  ;;  %v3134_v57 = vadd.f32 %v3133_v38, %v3105_v60 }
 0x4d1   : > { %v3400_v14 = vpop.f32.mrf.mxu1  ;;  %v3148_v61 = vadd.f32 %v10292_v4, %v2960_v18  ;;  %v3187_v18 = vadd.f32 %v10316_v11, %v3158_v23 }
 0x4d2   : > { %v3095_v13 = vadd.f32 %v10298_v51, %v2907_v35  ;;  %v3401_v22 = vadd.f32 %v3400_v14, %v3371_v1 }
 0x4d3   : > { %v3177_v34 = vadd.f32 %v11770_v25, %v3148_v61 }
 0x4d6   : > { %v10336_v10 = vpop.f32.mrf.mxu2 }
 0x4d7   : > { %v10338_v46 = vpop.f32.mrf.mxu3  ;;  %v11769_v21 = vld [vmem:[#allocation20_spill] sm:$0xff] }
 0x4d8   : > { %v3373_v36 = vpop.f32.mrf.mxu0  ;;  %v3459_v11 = vadd.f32 %v10338_v46, %v10336_v10  ;;  %v11771_v46 = vld [vmem:[#allocation15_spill] sm:$0xff] }
 0x4d9   : > { %v3402_v47 = vpop.f32.mrf.mxu1 }
 0x4da   : > { %v3403_v44 = vadd.f32 %v3402_v47, %v3373_v36 }
 0x4de   : > { %v10340_v7 = vpop.f32.mrf.mxu2 }
 0x4df   : > { %v3460_v3 = vpop.f32.mrf.mxu3 }
 0x4e0   : > { %v3376_v33 = vpop.f32.mrf.mxu0  ;;  %v3461_v14 = vadd.f32 %v3460_v3, %v10340_v7 }
 0x4e1   : > { %v3405_v45 = vpop.f32.mrf.mxu1 }
 0x4e2   : > { %v3406_v55 = vadd.f32 %v3405_v45, %v3376_v33  ;;  %v3124_v33 = vadd.f32 %v10302_v20, %v3095_v13  ;;  %v3478_v13 = vadd.f32 %v3459_v11, %v11771_v46  ;;  %v7111_v11 = vld [vmem:[%s11705_s8 + $0xf0] sm:$0xf] }
 0x4e4   : > { %v3481_v29 = vadd.f32 %v3406_v55, %v10308_v54  ;;  %v3479_v38 = vadd.f32 %v3403_v44, %v3124_v33  ;;  %v3192_v54 = vadd.f32 %v10322_v37, %v3163_v53 }
 0x4e6   : > { %v3434_v0 = vpop.f32.mrf.mxu2  ;;  %v3503_v47 = vadd.f32 %v3491_v30, %v3481_v29 }
 0x4e7   : > { %v3463_v16 = vpop.f32.mrf.mxu3 }
 0x4e8   : > { %v3378_v32 = vpop.f32.mrf.mxu0  ;;  %v3464_v62 = vadd.f32 %v3463_v16, %v3434_v0  ;;  %v3501_v16 = vadd.f32 %v3491_v30, %v3479_v38  ;;  %v3519_v40 = vmax.f32 %v3503_v47, 0.0  ;;  %v8082_v38 = vld [vmem:[%s11704_s7] sm:$0xff] }
 0x4e9   : > { %v3407_v50 = vpop.f32.mrf.mxu1 }
 0x4ea   : > { %v3408_v39 = vadd.f32 %v3407_v50, %v3378_v32  ;;  %v3517_v55 = vmax.f32 %v3501_v16, 0.0  ;;  %v8085_v16 = vld [vmem:[%s11704_s7 + $0x1c] sm:$0xff] }
 0x4ec   : > { %v3483_v24 = vadd.f32 %v3408_v39, %v3129_v12 }
 0x4ee   : > { %v3436_v6 = vpop.f32.mrf.mxu2  ;;  %v3505_v36 = vadd.f32 %v3491_v30, %v3483_v24 }
 0x4ef   : > { %v3465_v9 = vpop.f32.mrf.mxu3 }
 0x4f0   : > { %v3381_v59 = vpop.f32.mrf.mxu0  ;;  %v3466_v28 = vadd.f32 %v3465_v9, %v3436_v6  ;;  %v3521_v31 = vmax.f32 %v3505_v36, 0.0 }
 0x4f1   : > { %v3410_v15 = vpop.f32.mrf.mxu1 }
 0x4f2   : > { %v3411_v2 = vadd.f32 %v3410_v15, %v3381_v59  ;;  %v3484_v50 = vadd.f32 %v3466_v28, %v3187_v18  ;;  %v3531_v12 = vpack.c.bf16 %v3521_v31, %v3519_v40  ;;  %v7033_v31 = vld [vmem:[%s11705_s8 + $0x58] sm:$0xf0]  ;;  %v7103_v40 = vld [vmem:[%s11705_s8 + $0xe0] sm:$0xf] }
 0x4f4   : > { %v3485_v27 = vadd.f32 %v3411_v2, %v3132_v19  ;;  %v3182_v2 = vadd.f32 %v10306_v49, %v3153_v26  ;;  %v3398_v19 = vadd.f32 %v10328_v41, %v10326_v56  ;;  %v3477_v49 = vadd.f32 %v3401_v22, %v10296_v17  ;;  %v11768_v17 = vld [vmem:[#allocation19_spill] sm:$0xff] }
 0x4f5   : > { %v3456_v7 = vadd.f32 %v11769_v21, %v11768_v17  ;;  %v3506_v39 = vadd.f32 %v3492_v42, %v3484_v50  ;;  %v8114_v50 = vld [vmem:[%s11705_s8 + $0xe4] sm:$0xf]  ;;  %v8112_v21 = vld [vmem:[%s11705_s8 + $0xd4] sm:$0xf] }
 0x4f6   : > { %v3439_v48 = vpop.f32.mrf.mxu2  ;;  %v3507_v4 = vadd.f32 %v3491_v30, %v3485_v27  ;;  %v3475_v0 = vadd.f32 %v3398_v19, %v3119_v5  ;;  %v3499_v3 = vadd.f32 %v3491_v30, %v3477_v49  ;;  %v3480_v60 = vadd.f32 %v3461_v14, %v3182_v2  ;;  %v11772_v27 = vld [vmem:[#allocation17_spill] sm:$0xff]  ;;  %v7113_v49 = vld [vmem:[%s11705_s8 + $0xf8] sm:$0xf0]  ;;  %v8098_v14 = vld [vmem:[%s11705_s8 + $0x64] sm:$0xf] }
 0x4f7   : > { %v3468_v52 = vpop.f32.mrf.mxu3  ;;  %v3476_v23 = vadd.f32 %v3456_v7, %v3177_v34  ;;  %v3522_v24 = vmax.f32 %v3506_v39, 0.0  ;;  %v8084_v19 = vld [vmem:[%s11704_s7 + $0x14] sm:$0xff]  ;;  %v7097_v7 = vld [vmem:[%s11705_s8 + $0xd8] sm:$0xf0]  ;;  %v8115_v39 = vld [vmem:[%s11705_s8 + $0xe4] sm:$0xf0] }
 0x4f8   : > { %v3383_v58 = vpop.f32.mrf.mxu0  ;;  %v3469_v51 = vadd.f32 %v3468_v52, %v3439_v48  ;;  %v3523_v6 = vmax.f32 %v3507_v4, 0.0  ;;  %v3497_v10 = vadd.f32 %v3491_v30, %v3475_v0  ;;  %v3515_v44 = vmax.f32 %v3499_v3, 0.0  ;;  %v8101_v0 = vld [vmem:[%s11705_s8 + $0x74] sm:$0xf0]  ;;  %v7039_v3 = vld [vmem:[%s11705_s8 + $0x60] sm:$0xf] }
 0x4f9   : > { %v3412_v32 = vpop.f32.mrf.mxu1  ;;  %v3498_v22 = vadd.f32 %v3492_v42, %v3476_v23  ;;  %v8094_v34 = vld [vmem:[%s11705_s8 + $0x44] sm:$0xf]  ;;  %v7104_v46 = vor.u32 %v8115_v39, %v7103_v40  ;;  %v7057_v40 = vld [vmem:[%s11705_s8 + $0x88] sm:$0xf0]  ;;  %v6999_v39 = vld [vmem:[%s11705_s8 + $0x10] sm:$0xf] }
 0x4fa   : > { %v3413_v35 = vadd.f32 %v3412_v32, %v3383_v58  ;;  %v3486_v20 = vadd.f32 %v3469_v51, %v10318_v8  ;;  %v11767_v8 = vld [vmem:[#allocation16_spill] sm:$0xff]  ;;  %v3495_v58 = vadd.f32 %v3491_v30, %v11772_v27  ;;  %v3502_v32 = vadd.f32 %v3492_v42, %v3480_v60  ;;  %v8113_v27 = vld [vmem:[%s11705_s8 + $0xd4] sm:$0xf0] }
 0x4fb   : > { %v3482_v9 = vadd.f32 %v3464_v62, %v11767_v8  ;;  %v3500_v51 = vadd.f32 %v3492_v42, %v3478_v13  ;;  %v3529_v61 = vpack.c.bf16 %v3517_v55, %v3515_v44  ;;  %v3513_v33 = vmax.f32 %v3497_v10, 0.0  ;;  %v8083_v8 = vld [vmem:[%s11704_s7 + $0x8] sm:$0xff]  ;;  %v7031_v55 = vld [vmem:[%s11705_s8 + $0x50] sm:$0xf]  ;;  %v8092_v44 = vld [vmem:[%s11705_s8 + $0x34] sm:$0xf] }
 0x4fc   : > { %v3487_v43 = vadd.f32 %v3413_v35, %v3134_v57  ;;  %v3508_v59 = vadd.f32 %v3492_v42, %v3486_v20  ;;  %v3511_v53 = vmax.f32 %v3495_v58, 0.0  ;;  %v3518_v2 = vmax.f32 %v3502_v32, 0.0  ;;  %v8100_v20 = vld [vmem:[%s11705_s8 + $0x74] sm:$0xf]  ;;  %v8099_v60 = vld [vmem:[%s11705_s8 + $0x64] sm:$0xf0] }
 0x4fd   : > { %v3504_v52 = vadd.f32 %v3492_v42, %v3482_v9  ;;  %v3516_v4 = vmax.f32 %v3500_v51, 0.0  ;;  %v3514_v18 = vmax.f32 %v3498_v22, 0.0  ;;  %v7040_v25 = vor.u32 %v8099_v60, %v7039_v3  ;;  %v7025_v13 = vld [vmem:[%s11705_s8 + $0x48] sm:$0xf0]  ;;  %v7017_v32 = vld [vmem:[%s11705_s8 + $0x38] sm:$0xf0] }
 0x4fe   : > { %v3509_v63 = vadd.f32 %v3491_v30, %v3487_v43  ;;  %v3441_v1 = vpop.f32.mrf.mxu2  ;;  %v3524_v5 = vmax.f32 %v3508_v59, 0.0  ;;  %v11773_v30 = vld [vmem:[#allocation18_spill] sm:$0xff]  ;;  %v3527_v43 = vpack.c.bf16 %v3513_v33, %v3511_v53  ;;  %v7100_v10 = vor.u32 %v8112_v21, %v7097_v7  ;;  %v8108_v51 = vld [vmem:[%s11705_s8 + $0xb4] sm:$0xf]  ;;  %v3539_v33 = vld [vmem:[%s11704_s7 + $0x10] sm:$0xf] }
 0x4ff   : > { %v3470_v45 = vpop.f32.mrf.mxu3  ;;  %v3520_v35 = vmax.f32 %v3504_v52, 0.0  ;;  %v3496_v28 = vadd.f32 %v3492_v42, %v11773_v30  ;;  %v3530_v62 = vpack.c.bf16 %v3518_v2, %v3516_v4  ;;  %v8097_v52 = vld [vmem:[%s11705_s8 + $0x54] sm:$0xf0]  ;;  %v7028_v58 = vor.u32 %v8094_v34, %v7025_v13  ;;  %v7023_v4 = vld [vmem:[%s11705_s8 + $0x40] sm:$0xf] }
 0x500   : > { %v3525_v56 = vmax.f32 %v3509_v63, 0.0  ;;  %v3471_v41 = vadd.f32 %v3470_v45, %v3441_v1  ;;  %v7049_v63 = vld [vmem:[%s11705_s8 + $0x78] sm:$0xf0]  ;;  %v7041_v45 = vld [vmem:[%s11705_s8 + $0x68] sm:$0xf0]  ;;  %v7032_v23 = vor.u32 %v8097_v52, %v7031_v55  ;;  %v7020_v53 = vor.u32 %v8092_v44, %v7017_v32 }
 0x501   : > { %v3532_v29 = vpack.c.bf16 %v3522_v24, %v3520_v35  ;;  %v3512_v36 = vmax.f32 %v3496_v28, 0.0  ;;  %v7052_v1 = vor.u32 %v8100_v20, %v7049_v63  ;;  %v7081_v35 = vld [vmem:[%s11705_s8 + $0xb8] sm:$0xf0]  ;;  %v3549_v2 = vunpack.c.l.b16 %v3539_v33  ;;  %v8106_v63 = vld [vmem:[%s11705_s8 + $0xa4] sm:$0xf] }
 0x502   : > { %v3488_v15 = vadd.f32 %v3471_v41, %v3192_v54  ;;  %v3533_v37 = vpack.c.bf16 %v3525_v56, %v3523_v6  ;;  %v8116_v54 = vld [vmem:[%s11705_s8 + $0xf4] sm:$0xf]  ;;  %v7105_v6 = vld [vmem:[%s11705_s8 + $0xe8] sm:$0xf0]  ;;  %v7044_v56 = vor.u32 %v8098_v14, %v7041_v45  ;;  %v7047_v41 = vld [vmem:[%s11705_s8 + $0x70] sm:$0xf]  ;;  %v7084_v22 = vor.u32 %v8108_v51, %v7081_v35 }
 0x503   : > { %v7116_v47 = vor.u32 %v8116_v54, %v7113_v49  ;;  %v7108_v9 = vor.u32 %v8114_v50, %v7105_v6  ;;  %v7048_v59 = vor.u32 %v8101_v0, %v7047_v41  ;;  %v3552_v28 = vpack.c.b16 %v3549_v2, %v3549_v2  ;;  %v7015_v54 = vld [vmem:[%s11705_s8 + $0x30] sm:$0xf]  ;;  %v8093_v14 = vld [vmem:[%s11705_s8 + $0x34] sm:$0xf0]  ;;  %v7001_v41 = vld [vmem:[%s11705_s8 + $0x18] sm:$0xf0] }
 0x504   : > { %v3510_v48 = vadd.f32 %v3492_v42, %v3488_v15  ;;  %3567 = vmatpush.bf16.msrb.mxu0 %v3533_v37  ;;  %3641 = vmatpush.bf16.msra.mxu2 %v3533_v37  ;;  %v3528_v42 = vpack.c.bf16 %v3514_v18, %v3512_v36  ;;  %v8117_v15 = vld [vmem:[%s11705_s8 + $0xf4] sm:$0xf0]  ;;  %v8096_v37 = vld [vmem:[%s11705_s8 + $0x54] sm:$0xf]  ;;  %v8090_v18 = vld [vmem:[%s11705_s8 + $0x24] sm:$0xf]  ;;  %v7016_v50 = vor.u32 %v8093_v14, %v7015_v54 }
 0x505   : > { %v7112_v17 = vor.u32 %v8117_v15, %v7111_v11  ;;  %v7009_v36 = vld [vmem:[%s11705_s8 + $0x28] sm:$0xf0]  ;;  %v8109_v45 = vld [vmem:[%s11705_s8 + $0xb4] sm:$0xf0]  ;;  %v8104_v0 = vld [vmem:[%s11705_s8 + $0x94] sm:$0xf] }
 0x506   : > { %v3526_v26 = vmax.f32 %v3510_v48, 0.0  ;;  %v7036_v48 = vor.u32 %v8096_v37, %v7033_v31  ;;  %v7012_v20 = vor.u32 %v8090_v18, %v7009_v36  ;;  %v7071_v15 = vld [vmem:[%s11705_s8 + $0xa0] sm:$0xf]  ;;  %v8107_v31 = vld [vmem:[%s11705_s8 + $0xa4] sm:$0xf0] }
 0x507   : > { %v6993_v21 = vld [vmem:[%s11705_s8 + $0x8] sm:$0xf0]  ;;  %v7072_v7 = vor.u32 %v8107_v31, %v7071_v15  ;;  %v8102_v60 = vld [vmem:[%s11705_s8 + $0x84] sm:$0xf]  ;;  %v7063_v34 = vld [vmem:[%s11705_s8 + $0x90] sm:$0xf] }
 0x508   : > { %3568 = vmatpush.bf16.msrb.mxu0 %v3531_v12  ;;  %3642 = vmatpush.bf16.msra.mxu2 %v3531_v12  ;;  %v3534_v57 = vpack.c.bf16 %v3526_v26, %v3524_v5  ;;  %v8110_v5 = vld [vmem:[%s11705_s8 + $0xc4] sm:$0xf]  ;;  %v7089_v26 = vld [vmem:[%s11705_s8 + $0xc8] sm:$0xf0]  ;;  %v7095_v12 = vld [vmem:[%s11705_s8 + $0xd0] sm:$0xf] }
 0x509   : > { %v7096_v24 = vor.u32 %v8113_v27, %v7095_v12  ;;  %v6991_v55 = vld [vmem:[%s11705_s8] sm:$0xf]  ;;  %v8087_v52 = vld [vmem:[%s11705_s8 + $0x4] sm:$0xf0]  ;;  %v8148_v51 = vld [vmem:[%s11705_s8 + $0x1f4] sm:$0xf] }
 0x50a   : > { %3590 = vmatpush.bf16.msrb.mxu1 %v3534_v57  ;;  %3664 = vmatpush.bf16.msra.mxu3 %v3534_v57  ;;  %v7092_v57 = vor.u32 %v8110_v5, %v7089_v26  ;;  %v7055_v5 = vld [vmem:[%s11705_s8 + $0x80] sm:$0xf]  ;;  %v6992_v26 = vor.u32 %v8087_v52, %v6991_v55  ;;  %v8103_v12 = vld [vmem:[%s11705_s8 + $0x84] sm:$0xf0]  ;;  %v8130_v33 = vld [vmem:[%s11705_s8 + $0x164] sm:$0xf] }
 0x50b   : > { %v7056_v27 = vor.u32 %v8103_v12, %v7055_v5  ;;  %v7265_v2 = vld [vmem:[%s11705_s8 + $0x1e8] sm:$0xf0]  ;;  %v8144_v54 = vld [vmem:[%s11705_s8 + $0x1d4] sm:$0xf]  ;;  %v8142_v31 = vld [vmem:[%s11705_s8 + $0x1c4] sm:$0xf] }
 0x50c   : > { %3569 = vmatpush.bf16.msrb.mxu0 %v3529_v61  ;;  %3643 = vmatpush.bf16.msra.mxu2 %v3529_v61  ;;  %v6974_v61 = vld [vmem:[%s11704_s7 + $0x24] sm:$0xf]  ;;  %v7185_v15 = vld [vmem:[%s11705_s8 + $0x148] sm:$0xf0]  ;;  %v8124_v5 = vld [vmem:[%s11705_s8 + $0x134] sm:$0xf] }
 0x50d   : > { %v8140_v12 = vld [vmem:[%s11705_s8 + $0x1b4] sm:$0xf] }
 0x50e   : > { %3591 = vmatpush.bf16.msrb.mxu1 %v3532_v29  ;;  %3665 = vmatpush.bf16.msra.mxu3 %v3532_v29  ;;  %v3624_v29 = vunpack.c.l.b16 %v6974_v61  ;;  %v7273_v61 = vld [vmem:[%s11705_s8 + $0x1f8] sm:$0xf0] }
 0x510   : > { %3570 = vmatpush.bf16.msrb.mxu0 %v3527_v43  ;;  %3644 = vmatpush.bf16.msra.mxu2 %v3527_v43  ;;  %v3627_v30 = vpack.c.b16 %v3624_v29, %v3624_v29  ;;  %v8095_v43 = vld [vmem:[%s11705_s8 + $0x44] sm:$0xf0]  ;;  %v8146_v29 = vld [vmem:[%s11705_s8 + $0x1e4] sm:$0xf] }
 0x512   : > { %3592 = vmatpush.bf16.msrb.mxu1 %v3530_v62  ;;  %3666 = vmatpush.bf16.msra.mxu3 %v3530_v62  ;;  %v8111_v62 = vld [vmem:[%s11705_s8 + $0xc4] sm:$0xf0] }
 0x513   : > { %6983 = vmatmul.msk.bf16.vlgmr.msra.gmra.mxu2 %vm3553_vm13, %v8084_v19  ;;  %6964 = vmatmul.msk.bf16.vlgmr.msrb.gmra.mxu0 %vm3553_vm13, %v8082_v38 }
 0x514   : > { %3937 = vmatpush.bf16.msrb.mxu2 %v7052_v1  ;;  %3891 = vmatpush.bf16.msra.mxu0 %v7048_v59  ;;  %v7073_v1 = vld [vmem:[%s11705_s8 + $0xa8] sm:$0xf0]  ;;  %v8091_v59 = vld [vmem:[%s11705_s8 + $0x24] sm:$0xf0] }
 0x515   : > { %v7076_v49 = vor.u32 %v8106_v63, %v7073_v1 }
 0x516   : > { %3593 = vmatpush.bf16.msrb.mxu1 %v3528_v42  ;;  %3667 = vmatpush.bf16.msra.mxu3 %v3528_v42 }
 0x518   : > { %3938 = vmatpush.bf16.msrb.mxu2 %v7044_v56  ;;  %3892 = vmatpush.bf16.msra.mxu0 %v7040_v25  ;;  %v8088_v56 = vld [vmem:[%s11705_s8 + $0x14] sm:$0xf]  ;;  %v8089_v25 = vld [vmem:[%s11705_s8 + $0x14] sm:$0xf0] }
 0x519   : > { %6986 = vmatmul.msk.bf16.vlgmr.msra.gmra.mxu3 %vm3553_vm13, %v8084_v19  ;;  %6967 = vmatmul.msk.bf16.vlgmr.msrb.gmra.mxu1 %vm3553_vm13, %v8082_v38  ;;  %v7087_v19 = vld [vmem:[%s11705_s8 + $0xc0] sm:$0xf]  ;;  %v7024_v38 = vor.u32 %v8095_v43, %v7023_v4  ;;  %v7004_v11 = vor.u32 %v8088_v56, %v7001_v41  ;;  %v8133_v43 = vld [vmem:[%s11705_s8 + $0x174] sm:$0xf0] }
 0x51a   : > { %3960 = vmatpush.bf16.msrb.mxu3 %v7116_v47  ;;  %3914 = vmatpush.bf16.msra.mxu1 %v7112_v17  ;;  %v7088_v42 = vor.u32 %v8111_v62, %v7087_v19  ;;  %v7079_v47 = vld [vmem:[%s11705_s8 + $0xb0] sm:$0xf]  ;;  %v8086_v17 = vld [vmem:[%s11705_s8 + $0x4] sm:$0xf]  ;;  %v7268_v62 = vor.u32 %v8146_v29, %v7265_v2  ;;  %v7233_v29 = vld [vmem:[%s11705_s8 + $0x1a8] sm:$0xf0] }
 0x51b   : > { %v7080_v6 = vor.u32 %v8109_v45, %v7079_v47  ;;  %v6996_v3 = vor.u32 %v8086_v17, %v6993_v21  ;;  %v7271_v19 = vld [vmem:[%s11705_s8 + $0x1f0] sm:$0xf]  ;;  %v7199_v45 = vld [vmem:[%s11705_s8 + $0x160] sm:$0xf]  ;;  %v8129_v17 = vld [vmem:[%s11705_s8 + $0x154] sm:$0xf0] }
 0x51c   : > { %3939 = vmatpush.bf16.msrb.mxu2 %v7036_v48  ;;  %3893 = vmatpush.bf16.msra.mxu0 %v7032_v23  ;;  %v7060_v48 = vor.u32 %v8102_v60, %v7057_v40  ;;  %v7249_v21 = vld [vmem:[%s11705_s8 + $0x1c8] sm:$0xf0] }
 0x51e   : > { %3961 = vmatpush.bf16.msrb.mxu3 %v7108_v9  ;;  %3915 = vmatpush.bf16.msra.mxu1 %v7104_v46  ;;  %v7007_v9 = vld [vmem:[%s11705_s8 + $0x20] sm:$0xf]  ;;  %v7000_v46 = vor.u32 %v8089_v25, %v6999_v39 }
 0x51f   : > { %v7008_v37 = vor.u32 %v8091_v59, %v7007_v9  ;;  %v8126_v59 = vld [vmem:[%s11705_s8 + $0x144] sm:$0xf] }
 0x520   : > { %3940 = vmatpush.bf16.msrb.mxu2 %v7028_v58  ;;  %3894 = vmatpush.bf16.msra.mxu0 %v7024_v38  ;;  %v8149_v38 = vld [vmem:[%s11705_s8 + $0x1f4] sm:$0xf0]  ;;  %v7188_v40 = vor.u32 %v8126_v59, %v7185_v15  ;;  %v8134_v15 = vld [vmem:[%s11705_s8 + $0x184] sm:$0xf] }
 0x521   : > { %v7272_v36 = vor.u32 %v8149_v38, %v7271_v19 }
 0x522   : > { %3962 = vmatpush.bf16.msrb.mxu3 %v7100_v10  ;;  %3916 = vmatpush.bf16.msra.mxu1 %v7096_v24  ;;  %v8105_v10 = vld [vmem:[%s11705_s8 + $0x94] sm:$0xf0]  ;;  %v7209_v24 = vld [vmem:[%s11705_s8 + $0x178] sm:$0xf0] }
 0x523   : > { %6984 = vmatmul.msk.bf16.gmra.mxu2 %vm3553_vm13, %v8085_v16  ;;  %6965 = vmatmul.msk.bf16.gmra.mxu0 %vm3553_vm13, %v8083_v8  ;;  %v7064_v13 = vor.u32 %v8105_v10, %v7063_v34 }
 0x524   : > { %3941 = vmatpush.bf16.msrb.mxu2 %v7020_v53  ;;  %3895 = vmatpush.bf16.msra.mxu0 %v7016_v50  ;;  %v7201_v53 = vld [vmem:[%s11705_s8 + $0x168] sm:$0xf0]  ;;  %v8131_v50 = vld [vmem:[%s11705_s8 + $0x164] sm:$0xf0] }
 0x525   : > { %v7204_v4 = vor.u32 %v8130_v33, %v7201_v53  ;;  %v7169_v53 = vld [vmem:[%s11705_s8 + $0x128] sm:$0xf0] }
 0x526   : > { %3963 = vmatpush.bf16.msrb.mxu3 %v7092_v57  ;;  %3917 = vmatpush.bf16.msra.mxu1 %v7088_v42  ;;  %v8132_v57 = vld [vmem:[%s11705_s8 + $0x174] sm:$0xf] }
 0x527   : > { %v7212_v35 = vor.u32 %v8132_v57, %v7209_v24  ;;  %v8128_v42 = vld [vmem:[%s11705_s8 + $0x154] sm:$0xf]  ;;  %v7247_v24 = vld [vmem:[%s11705_s8 + $0x1c0] sm:$0xf] }
 0x528   : > { %3942 = vmatpush.bf16.msrb.mxu2 %v7012_v20  ;;  %3896 = vmatpush.bf16.msra.mxu0 %v7008_v37  ;;  %v7193_v20 = vld [vmem:[%s11705_s8 + $0x158] sm:$0xf0]  ;;  %v7191_v37 = vld [vmem:[%s11705_s8 + $0x150] sm:$0xf] }
 0x529   : > { %6987 = vmatmul.msk.bf16.gmra.mxu3 %vm3553_vm13, %v8085_v16  ;;  %6968 = vmatmul.msk.bf16.gmra.mxu1 %vm3553_vm13, %v8083_v8  ;;  %v7065_v16 = vld [vmem:[%s11705_s8 + $0x98] sm:$0xf0]  ;;  %v7196_v41 = vor.u32 %v8128_v42, %v7193_v20  ;;  %v7192_v39 = vor.u32 %v8129_v17, %v7191_v37  ;;  %v7217_v37 = vld [vmem:[%s11705_s8 + $0x188] sm:$0xf0]  ;;  %v8121_v17 = vld [vmem:[%s11705_s8 + $0x114] sm:$0xf0] }
 0x52a   : > { %3964 = vmatpush.bf16.msrb.mxu3 %v7084_v22  ;;  %v7068_v8 = vor.u32 %v8104_v0, %v7065_v16  ;;  %3918 = vmatpush.bf16.msra.mxu1 %v7080_v6  ;;  %v7276_v22 = vor.u32 %v8148_v51, %v7273_v61  ;;  %v7263_v6 = vld [vmem:[%s11705_s8 + $0x1e0] sm:$0xf]  ;;  %v7200_v0 = vor.u32 %v8131_v50, %v7199_v45  ;;  %v8143_v51 = vld [vmem:[%s11705_s8 + $0x1c4] sm:$0xf0]  ;;  %v7161_v42 = vld [vmem:[%s11705_s8 + $0x118] sm:$0xf0] }
 0x52b   : > { %v7248_v33 = vor.u32 %v8143_v51, %v7247_v24  ;;  %v8123_v50 = vld [vmem:[%s11705_s8 + $0x124] sm:$0xf0] }
 0x52c   : > { %3943 = vmatpush.bf16.msrb.mxu2 %v7004_v11  ;;  %3897 = vmatpush.bf16.msra.mxu0 %v7000_v46  ;;  %v8147_v11 = vld [vmem:[%s11705_s8 + $0x1e4] sm:$0xf0]  ;;  %v7252_v46 = vor.u32 %v8142_v31, %v7249_v21  ;;  %v7159_v31 = vld [vmem:[%s11705_s8 + $0x110] sm:$0xf] }
 0x52d   : > { %v7264_v9 = vor.u32 %v8147_v11, %v7263_v6  ;;  %v7231_v6 = vld [vmem:[%s11705_s8 + $0x1a0] sm:$0xf]  ;;  %v8118_v11 = vld [vmem:[%s11705_s8 + $0x104] sm:$0xf] }
 0x52e   : > { %3965 = vmatpush.bf16.msrb.mxu3 %v7076_v49  ;;  %3919 = vmatpush.bf16.msra.mxu1 %v7072_v7  ;;  %v7257_v49 = vld [vmem:[%s11705_s8 + $0x1d8] sm:$0xf0]  ;;  %v7255_v7 = vld [vmem:[%s11705_s8 + $0x1d0] sm:$0xf] }
 0x530   : > { %3944 = vmatpush.bf16.msrb.mxu2 %v6996_v3  ;;  %3898 = vmatpush.bf16.msra.mxu0 %v6992_v26  ;;  %v8145_v3 = vld [vmem:[%s11705_s8 + $0x1d4] sm:$0xf0]  ;;  %v7177_v26 = vld [vmem:[%s11705_s8 + $0x138] sm:$0xf0] }
 0x532   : > { %3966 = vmatpush.bf16.msrb.mxu3 %v7068_v8  ;;  %3920 = vmatpush.bf16.msra.mxu1 %v7064_v13  ;;  %v7260_v8 = vor.u32 %v8144_v54, %v7257_v49  ;;  %v7256_v13 = vor.u32 %v8145_v3, %v7255_v7  ;;  %v8136_v54 = vld [vmem:[%s11705_s8 + $0x194] sm:$0xf]  ;;  %v7225_v49 = vld [vmem:[%s11705_s8 + $0x198] sm:$0xf0]  ;;  %v7223_v3 = vld [vmem:[%s11705_s8 + $0x190] sm:$0xf] }
 0x533   : > { %6985 = vmatmul.msk.bf16.gmra.mxu2 %vm3553_vm13, %v3627_v30  ;;  %6966 = vmatmul.msk.bf16.gmra.mxu0 %vm3553_vm13, %v3552_v28 }
 0x534   : > { %4222 = vmatpush.bf16.msra.mxu2 %v7212_v35  ;;  %v8122_v35 = vld [vmem:[%s11705_s8 + $0x124] sm:$0xf] }
 0x535   : > { %v7172_v2 = vor.u32 %v8122_v35, %v7169_v53 }
 0x536   : > { %3967 = vmatpush.bf16.msrb.mxu3 %v7060_v48  ;;  %3921 = vmatpush.bf16.msra.mxu1 %v7056_v27  ;;  %v7180_v27 = vor.u32 %v8124_v5, %v7177_v26  ;;  %v7151_v26 = vld [vmem:[%s11705_s8 + $0x100] sm:$0xf] }
 0x538   : > { %4223 = vmatpush.bf16.msra.mxu2 %v7204_v4  ;;  %v7239_v4 = vld [vmem:[%s11705_s8 + $0x1b0] sm:$0xf] }
 0x539   : > { %6988 = vmatmul.msk.bf16.gmra.mxu3 %vm3553_vm13, %v3627_v30  ;;  %6969 = vmatmul.msk.bf16.gmra.mxu1 %vm3553_vm13, %v3552_v28  ;;  %v7207_v30 = vld [vmem:[%s11705_s8 + $0x170] sm:$0xf] }
 0x53a   : > { %4245 = vmatpush.bf16.msra.mxu3 %v7276_v22  ;;  %v7208_v18 = vor.u32 %v8133_v43, %v7207_v30  ;;  %4199 = vmatpush.bf16.msrb.mxu1 %v7272_v36  ;;  %v8138_v22 = vld [vmem:[%s11705_s8 + $0x1a4] sm:$0xf]  ;;  %v7175_v30 = vld [vmem:[%s11705_s8 + $0x130] sm:$0xf]  ;;  %v8120_v36 = vld [vmem:[%s11705_s8 + $0x114] sm:$0xf] }
 0x53b   : > { %v7236_v38 = vor.u32 %v8138_v22, %v7233_v29  ;;  %v7164_v45 = vor.u32 %v8120_v36, %v7161_v42 }
 0x53c   : > { %4176 = vmatpush.bf16.msrb.mxu0 %v7208_v18  ;;  %4224 = vmatpush.bf16.msra.mxu2 %v7196_v41  ;;  %v8141_v18 = vld [vmem:[%s11705_s8 + $0x1b4] sm:$0xf0] }
 0x53e   : > { %4246 = vmatpush.bf16.msra.mxu3 %v7268_v62  ;;  %4200 = vmatpush.bf16.msrb.mxu1 %v7264_v9  ;;  %v7228_v9 = vor.u32 %v8136_v54, %v7225_v49 }
 0x540   : > { %4177 = vmatpush.bf16.msrb.mxu0 %v7200_v0  ;;  %4225 = vmatpush.bf16.msra.mxu2 %v7188_v40 }
 0x542   : > { %4247 = vmatpush.bf16.msra.mxu3 %v7260_v8  ;;  %4201 = vmatpush.bf16.msrb.mxu1 %v7256_v13  ;;  %v7153_v8 = vld [vmem:[%s11705_s8 + $0x108] sm:$0xf0] }
 0x543   : > { %v7156_v7 = vor.u32 %v8118_v11, %v7153_v8  ;;  %v7347_v11 = vld [vmem:[%s11706_s9 + $0x100] sm:$0xf]  ;;  %v8183_v8 = vld [vmem:[%s11706_s9 + $0x104] sm:$0xf0] }
 0x544   : > { %4178 = vmatpush.bf16.msrb.mxu0 %v7192_v39  ;;  %4226 = vmatpush.bf16.msra.mxu2 %v7180_v27 }
 0x546   : > { %4248 = vmatpush.bf16.msra.mxu3 %v7252_v46  ;;  %4202 = vmatpush.bf16.msrb.mxu1 %v7248_v33  ;;  %v7160_v46 = vor.u32 %v8121_v17, %v7159_v31  ;;  %v7348_v17 = vor.u32 %v8183_v8, %v7347_v11 }
 0x548   : > { %4227 = vmatpush.bf16.msra.mxu2 %v7172_v2 }
 0x54c   : > { %4228 = vmatpush.bf16.msra.mxu2 %v7164_v45  ;;  %v7355_v45 = vld [vmem:[%s11706_s9 + $0x110] sm:$0xf] }
 0x550   : > { %4229 = vmatpush.bf16.msra.mxu2 %v7156_v7 }
 0x590   : > { %v3572_v58 = vpop.f32.mrf.mxu0 }
 0x596   : > { %v10610_v23 = vpop.f32.mrf.mxu1  ;;  %v3646_v44 = vpop.f32.mrf.mxu2 }
 0x597   : > { %v3683_v14 = vmax.f32 %v3572_v58, %v3646_v44  ;;  %v7241_v58 = vld [vmem:[%s11705_s8 + $0x1b8] sm:$0xf0]  ;;  %v8127_v44 = vld [vmem:[%s11705_s8 + $0x144] sm:$0xf0] }
 0x598   : > { %v3574_v32 = vpop.f32.mrf.mxu0 }
 0x59c   : > { %v3669_v28 = vpop.f32.mrf.mxu3 }
 0x59d   : > { %v3684_v48 = vmax.f32 %v10610_v23, %v3669_v28  ;;  %v7183_v23 = vld [vmem:[%s11705_s8 + $0x140] sm:$0xf]  ;;  %v8125_v28 = vld [vmem:[%s11705_s8 + $0x134] sm:$0xf0] }
 0x59e   : > { %v3597_v63 = vpop.f32.mrf.mxu1  ;;  %v3648_v1 = vpop.f32.mrf.mxu2  ;;  %v7184_v57 = vor.u32 %v8127_v44, %v7183_v23  ;;  %v7176_v62 = vor.u32 %v8125_v28, %v7175_v30 }
 0x59f   : > { %v3685_v47 = vmax.f32 %v3574_v32, %v3648_v1  ;;  %v7244_v32 = vor.u32 %v8140_v12, %v7241_v58  ;;  %v7240_v1 = vor.u32 %v8141_v18, %v7239_v4  ;;  %v7215_v12 = vld [vmem:[%s11705_s8 + $0x180] sm:$0xf]  ;;  %v8135_v58 = vld [vmem:[%s11705_s8 + $0x184] sm:$0xf0] }
 0x5a0   : > { %v10669_v56 = vpop.f32.mrf.mxu0  ;;  %4179 = vmatpush.bf16.msrb.mxu0 %v7184_v57  ;;  %v7216_v44 = vor.u32 %v8135_v58, %v7215_v12 }
 0x5a1   : > { %v10674_v16 = vpack.c.bf16 %v3685_v47, %v3683_v14  ;;  %4249 = vmatpush.bf16.msra.mxu3 %v7244_v32  ;;  %v7167_v14 = vld [vmem:[%s11705_s8 + $0x120] sm:$0xf]  ;;  %4203 = vmatpush.bf16.msrb.mxu1 %v7240_v1 }
 0x5a2   : > { %v7168_v0 = vor.u32 %v8123_v50, %v7167_v14  ;;  %v8185_v50 = vld [vmem:[%s11706_s9 + $0x114] sm:$0xf0] }
 0x5a3   : > { %3945 = vmatmul.bf16.vlgmr.msrb.gmra.mxu2 %v10674_v16  ;;  %3899 = vmatmul.bf16.vlgmr.msra.gmra.mxu0 %v10674_v16 }
 0x5a4   : > { %v3671_v60 = vpop.f32.mrf.mxu3  ;;  %4180 = vmatpush.bf16.msrb.mxu0 %v7176_v62 }
 0x5a5   : > { %v3686_v25 = vmax.f32 %v3597_v63, %v3671_v60  ;;  %4250 = vmatpush.bf16.msra.mxu3 %v7236_v38  ;;  %v8137_v60 = vld [vmem:[%s11705_s8 + $0x194] sm:$0xf0] }
 0x5a6   : > { %v10703_v34 = vpop.f32.mrf.mxu1  ;;  %v3651_v10 = vpop.f32.mrf.mxu2 }
 0x5a7   : > { %v10705_v55 = vpack.c.bf16 %v3686_v25, %v3684_v48  ;;  %v3687_v20 = vmax.f32 %v10669_v56, %v3651_v10  ;;  %v8139_v56 = vld [vmem:[%s11705_s8 + $0x1a4] sm:$0xf0]  ;;  %v7220_v10 = vor.u32 %v8134_v15, %v7217_v37  ;;  %v8161_v15 = vld [vmem:[%s11706_s9 + $0x54] sm:$0xf0] }
 0x5a8   : > { %v3579_v52 = vpop.f32.mrf.mxu0  ;;  %v7232_v59 = vor.u32 %v8139_v56, %v7231_v6  ;;  %4181 = vmatpush.bf16.msrb.mxu0 %v7168_v0  ;;  %v7431_v6 = vld [vmem:[%s11706_s9 + $0x60] sm:$0xf]  ;;  %v8163_v0 = vld [vmem:[%s11706_s9 + $0x64] sm:$0xf0] }
 0x5a9   : > { %3968 = vmatmul.bf16.vlgmr.msrb.gmra.mxu3 %v10705_v55  ;;  %3922 = vmatmul.bf16.vlgmr.msra.gmra.mxu1 %v10705_v55 }
 0x5aa   : > { %4251 = vmatpush.bf16.msra.mxu3 %v7228_v9  ;;  %4204 = vmatpush.bf16.msrb.mxu1 %v7232_v59  ;;  %v7432_v9 = vor.u32 %v8163_v0, %v7431_v6  ;;  %v7423_v59 = vld [vmem:[%s11706_s9 + $0x50] sm:$0xf] }
 0x5ab   : > { %v7455_v6 = vld [vmem:[%s11706_s9 + $0x90] sm:$0xf] }
 0x5ac   : > { %v3674_v61 = vpop.f32.mrf.mxu3  ;;  %4182 = vmatpush.bf16.msrb.mxu0 %v7160_v46  ;;  %v8179_v46 = vld [vmem:[%s11706_s9 + $0xe4] sm:$0xf0] }
 0x5ad   : > { %v3688_v40 = vmax.f32 %v10703_v34, %v3674_v61  ;;  %v8119_v34 = vld [vmem:[%s11705_s8 + $0x104] sm:$0xf0] }
 0x5ae   : > { %v3602_v43 = vpop.f32.mrf.mxu1  ;;  %v3653_v19 = vpop.f32.mrf.mxu2  ;;  %4252 = vmatpush.bf16.msra.mxu3 %v7220_v10  ;;  %v7152_v27 = vor.u32 %v8119_v34, %v7151_v26  ;;  %v7331_v10 = vld [vmem:[%s11706_s9 + $0xe0] sm:$0xf] }
 0x5af   : > { %v3689_v63 = vmax.f32 %v3579_v52, %v3653_v19  ;;  %v7224_v52 = vor.u32 %v8137_v60, %v7223_v3  ;;  %v7339_v3 = vld [vmem:[%s11706_s9 + $0xf0] sm:$0xf]  ;;  %v8181_v60 = vld [vmem:[%s11706_s9 + $0xf4] sm:$0xf0]  ;;  %v7332_v12 = vor.u32 %v8179_v46, %v7331_v10  ;;  %v8151_v46 = vld [vmem:[%s11706_s9 + $0x4] sm:$0xf0] }
 0x5b0   : > { %v3582_v47 = vpop.f32.mrf.mxu0  ;;  %4183 = vmatpush.bf16.msrb.mxu0 %v7152_v27 }
 0x5b1   : > { %v3695_v41 = vpack.c.bf16 %v3689_v63, %v3687_v20  ;;  %4205 = vmatpush.bf16.msrb.mxu1 %v7224_v52  ;;  %v7439_v20 = vld [vmem:[%s11706_s9 + $0x70] sm:$0xf]  ;;  %v8165_v63 = vld [vmem:[%s11706_s9 + $0x74] sm:$0xf0] }
 0x5b2   : > { %v7440_v54 = vor.u32 %v8165_v63, %v7439_v20  ;;  %v7407_v52 = vld [vmem:[%s11706_s9 + $0x30] sm:$0xf] }
 0x5b3   : > { %3950 = vmatmul.bf16.gmra.mxu2 %v3695_v41  ;;  %3904 = vmatmul.bf16.gmra.mxu0 %v3695_v41 }
 0x5b4   : > { %v3676_v21 = vpop.f32.mrf.mxu3  ;;  %4770 = vmatpush.bf16.msrb.mxu2 %v7440_v54 }
 0x5b5   : > { %v3690_v39 = vmax.f32 %v3602_v43, %v3676_v21  ;;  %4206 = vmatpush.bf16.msrb.mxu1 %v7216_v44  ;;  %v7424_v21 = vor.u32 %v8161_v15, %v7423_v59  ;;  %v7323_v44 = vld [vmem:[%s11706_s9 + $0xd0] sm:$0xf] }
 0x5b6   : > { %v3605_v48 = vpop.f32.mrf.mxu1  ;;  %v3656_v25 = vpop.f32.mrf.mxu2 }
 0x5b7   : > { %v3696_v13 = vpack.c.bf16 %v3690_v39, %v3688_v40  ;;  %v3691_v23 = vmax.f32 %v3582_v47, %v3656_v25  ;;  %v7415_v40 = vld [vmem:[%s11706_s9 + $0x40] sm:$0xf]  ;;  %v8159_v25 = vld [vmem:[%s11706_s9 + $0x44] sm:$0xf0] }
 0x5b8   : > { %v3584_v5 = vpop.f32.mrf.mxu0  ;;  %4771 = vmatpush.bf16.msrb.mxu2 %v7432_v9  ;;  %v8170_v9 = vld [vmem:[%s11706_s9 + $0xa4] sm:$0xf] }
 0x5b9   : > { %3973 = vmatmul.bf16.gmra.mxu3 %v3696_v13  ;;  %3927 = vmatmul.bf16.gmra.mxu1 %v3696_v13  ;;  %v3697_v51 = vpack.c.bf16 %v3691_v23, %v3691_v23  ;;  %v8157_v5 = vld [vmem:[%s11706_s9 + $0x34] sm:$0xf0] }
 0x5ba   : > { %v7408_v27 = vor.u32 %v8157_v5, %v7407_v52  ;;  %v8167_v52 = vld [vmem:[%s11706_s9 + $0x84] sm:$0xf0] }
 0x5bc   : > { %v3679_v32 = vpop.f32.mrf.mxu3  ;;  %4772 = vmatpush.bf16.msrb.mxu2 %v7424_v21 }
 0x5bd   : > { %v3692_v35 = vmax.f32 %v3605_v48, %v3679_v32  ;;  %v7340_v48 = vor.u32 %v8181_v60, %v7339_v3  ;;  %v8177_v32 = vld [vmem:[%s11706_s9 + $0xd4] sm:$0xf0]  ;;  %v7371_v3 = vld [vmem:[%s11706_s9 + $0x130] sm:$0xf] }
 0x5be   : > { %v3607_v57 = vpop.f32.mrf.mxu1  ;;  %v3658_v24 = vpop.f32.mrf.mxu2  ;;  %v8189_v60 = vld [vmem:[%s11706_s9 + $0x134] sm:$0xf0] }
 0x5bf   : > { %v3698_v33 = vpack.c.bf16 %v3692_v35, %v3692_v35  ;;  %v7399_v57 = vld [vmem:[%s11706_s9 + $0x20] sm:$0xf]  ;;  %v8155_v35 = vld [vmem:[%s11706_s9 + $0x24] sm:$0xf0]  ;;  %v7372_v10 = vor.u32 %v8189_v60, %v7371_v3 }
 0x5c0   : > { %v7519_v60 = vld [vmem:[%s11706_s9 + $0x180] sm:$0xf] }
 0x5c1   : > { %4615 = vmatpush.bf16.msra.mxu1 %v7372_v10 }
 0x5c3   : > { %3955 = vmatmul.bf16.gmra.mxu2 %v3697_v51  ;;  %3909 = vmatmul.bf16.gmra.mxu0 %v3697_v51 }
 0x5c4   : > { %v3681_v61 = vpop.f32.mrf.mxu3 }
 0x5c5   : > { %v7315_v61 = vld [vmem:[%s11706_s9 + $0xc0] sm:$0xf] }
 0x5c9   : > { %3978 = vmatmul.bf16.gmra.mxu3 %v3698_v33  ;;  %3932 = vmatmul.bf16.gmra.mxu1 %v3698_v33 }
 0x5d3   : > { %4230 = vmatmul.bf16.vlgmr.msra.gmra.mxu2 %v10674_v16  ;;  %4184 = vmatmul.bf16.vlgmr.msrb.gmra.mxu0 %v10674_v16 }
 0x5d9   : > { %4253 = vmatmul.bf16.vlgmr.msra.gmra.mxu3 %v10705_v55  ;;  %4207 = vmatmul.bf16.vlgmr.msrb.gmra.mxu1 %v10705_v55 }
 0x5e3   : > { %4235 = vmatmul.bf16.gmra.mxu2 %v3695_v41  ;;  %4189 = vmatmul.bf16.gmra.mxu0 %v3695_v41  ;;  %v7356_v41 = vor.u32 %v8185_v50, %v7355_v45  ;;  %v7391_v45 = vld [vmem:[%s11706_s9 + $0x10] sm:$0xf]  ;;  %v8153_v50 = vld [vmem:[%s11706_s9 + $0x14] sm:$0xf0] }
 0x5e4   : > { %v7392_v11 = vor.u32 %v8153_v50, %v7391_v45  ;;  %v7349_v45 = vld [vmem:[%s11706_s9 + $0x108] sm:$0xf0] }
 0x5e5   : > { %4590 = vmatpush.bf16.msra.mxu0 %v7356_v41 }
 0x5e9   : > { %4258 = vmatmul.bf16.gmra.mxu3 %v3696_v13  ;;  %4212 = vmatmul.bf16.gmra.mxu1 %v3696_v13  ;;  %v7416_v13 = vor.u32 %v8159_v25, %v7415_v40  ;;  %v7383_v40 = vld [vmem:[%s11706_s9] sm:$0xf] }
 0x5ea   : > { %4591 = vmatpush.bf16.msra.mxu0 %v7348_v17  ;;  %v8173_v17 = vld [vmem:[%s11706_s9 + $0xb4] sm:$0xf0] }
 0x5eb   : > { %4773 = vmatpush.bf16.msrb.mxu2 %v7416_v13  ;;  %v7447_v13 = vld [vmem:[%s11706_s9 + $0x80] sm:$0xf] }
 0x5ee   : > { %4592 = vmatpush.bf16.msra.mxu0 %v7340_v48 }
 0x5ef   : > { %4774 = vmatpush.bf16.msrb.mxu2 %v7408_v27 }
 0x5f2   : > { %4593 = vmatpush.bf16.msra.mxu0 %v7332_v12 }
 0x5f3   : > { %4240 = vmatmul.bf16.gmra.mxu2 %v3697_v51  ;;  %4194 = vmatmul.bf16.gmra.mxu0 %v3697_v51  ;;  %v7324_v51 = vor.u32 %v8177_v32, %v7323_v44  ;;  %v7543_v44 = vld [vmem:[%s11706_s9 + $0x1b0] sm:$0xf]  ;;  %v8205_v32 = vld [vmem:[%s11706_s9 + $0x1b4] sm:$0xf0] }
 0x5f6   : > { %4594 = vmatpush.bf16.msra.mxu0 %v7324_v51  ;;  %v7544_v51 = vor.u32 %v8205_v32, %v7543_v44 }
 0x5f9   : > { %4263 = vmatmul.bf16.gmra.mxu3 %v3698_v33  ;;  %4217 = vmatmul.bf16.gmra.mxu1 %v3698_v33  ;;  %v8175_v33 = vld [vmem:[%s11706_s9 + $0xc4] sm:$0xf0] }
 0x620   : > { %v10823_v53 = vpop.f32.mrf.mxu0 }
 0x626   : > { %v10825_v22 = vpop.f32.mrf.mxu1  ;;  %v10827_v29 = vpop.f32.mrf.mxu2 }
 0x627   : > { %v3924_v20 = vadd.f32 %v10825_v22, %v10823_v53  ;;  %v7316_v53 = vor.u32 %v8175_v33, %v7315_v61  ;;  %v8169_v22 = vld [vmem:[%s11706_s9 + $0x94] sm:$0xf0]  ;;  %v7357_v61 = vld [vmem:[%s11706_s9 + $0x118] sm:$0xf0]  ;;  %v7535_v33 = vld [vmem:[%s11706_s9 + $0x1a0] sm:$0xf] }
 0x628   : > { %v10829_v2 = vpop.f32.mrf.mxu0  ;;  %v7456_v8 = vor.u32 %v8169_v22, %v7455_v6 }
 0x629   : > { %4595 = vmatpush.bf16.msra.mxu0 %v7316_v53  ;;  %v8201_v53 = vld [vmem:[%s11706_s9 + $0x194] sm:$0xf0] }
 0x62a   : > { %4795 = vmatpush.bf16.msrb.mxu3 %v7456_v8 }
 0x62c   : > { %v10831_v16 = vpop.f32.mrf.mxu3 }
 0x62d   : > { %v3970_v63 = vadd.f32 %v10831_v16, %v10827_v29 }
 0x62e   : > { %v10833_v30 = vpop.f32.mrf.mxu1  ;;  %v10835_v55 = vpop.f32.mrf.mxu2 }
 0x630   : > { %v10837_v28 = vpop.f32.mrf.mxu0 }
 0x634   : > { %v10839_v4 = vpop.f32.mrf.mxu3 }
 0x635   : > { %v3972_v48 = vadd.f32 %v10839_v4, %v10835_v55  ;;  %v7299_v55 = vld [vmem:[%s11706_s9 + $0xa0] sm:$0xf]  ;;  %v8171_v4 = vld [vmem:[%s11706_s9 + $0xa4] sm:$0xf0] }
 0x636   : > { %v10841_v43 = vpop.f32.mrf.mxu1  ;;  %v10843_v19 = vpop.f32.mrf.mxu2 }
 0x638   : > { %v10845_v38 = vpop.f32.mrf.mxu0 }
 0x63c   : > { %v10847_v62 = vpop.f32.mrf.mxu3 }
 0x63d   : > { %v3975_v8 = vadd.f32 %v10847_v62, %v10843_v19 }
 0x63e   : > { %v10849_v18 = vpop.f32.mrf.mxu1  ;;  %v10851_v36 = vpop.f32.mrf.mxu2 }
 0x640   : > { %v10853_v42 = vpop.f32.mrf.mxu0 }
 0x644   : > { %v10861_v1 = vpop.f32.mrf.mxu3 }
 0x646   : > { %v10863_v49 = vpop.f32.mrf.mxu1  ;;  %v10865_v14 = vpop.f32.mrf.mxu2 }
 0x648   : > { %v3912_v47 = vpop.f32.mrf.mxu0 }
 0x649   : > { %v7400_v47 = vor.u32 %v8155_v35, %v7399_v57  ;;  %v8184_v35 = vld [vmem:[%s11706_s9 + $0x114] sm:$0xf] }
 0x64b   : > { %4775 = vmatpush.bf16.msrb.mxu2 %v7400_v47  ;;  %v8182_v47 = vld [vmem:[%s11706_s9 + $0x104] sm:$0xf] }
 0x64c   : > { %v10876_v56 = vpop.f32.mrf.mxu3 }
 0x64e   : > { %v3935_v37 = vpop.f32.mrf.mxu1  ;;  %v3958_v31 = vpop.f32.mrf.mxu2 }
 0x64f   : > { %4776 = vmatpush.bf16.msrb.mxu2 %v7392_v11  ;;  %v7307_v31 = vld [vmem:[%s11706_s9 + $0xb0] sm:$0xf]  ;;  %v3929_v11 = vadd.f32 %v10841_v43, %v10837_v28  ;;  %v8199_v28 = vld [vmem:[%s11706_s9 + $0x184] sm:$0xf0] }
 0x650   : > { %v4185_v7 = vpop.f32.mrf.mxu0 }
 0x654   : > { %v3981_v39 = vpop.f32.mrf.mxu3 }
 0x655   : > { %v3926_v39 = vadd.f32 %v10833_v30, %v10829_v2  ;;  %v7384_v2 = vor.u32 %v8151_v46, %v7383_v40  ;;  %v7448_v30 = vor.u32 %v8167_v52, %v7447_v13  ;;  %v7333_v52 = vld [vmem:[%s11706_s9 + $0xe8] sm:$0xf0] }
 0x656   : > { %v4208_v26 = vpop.f32.mrf.mxu1  ;;  %v4231_v34 = vpop.f32.mrf.mxu2 }
 0x657   : > { %v4209_v23 = vadd.f32 %v4208_v26, %v4185_v7  ;;  %v7308_v7 = vor.u32 %v8173_v17, %v7307_v31  ;;  %4777 = vmatpush.bf16.msrb.mxu2 %v7384_v2  ;;  %4796 = vmatpush.bf16.msrb.mxu3 %v7448_v30 }
 0x658   : > { %v4187_v58 = vpop.f32.mrf.mxu0 }
 0x659   : > { %v4268_v29 = vmax.f32 %v3924_v20, %v4209_v23  ;;  %4596 = vmatpush.bf16.msra.mxu0 %v7308_v7  ;;  %v8187_v23 = vld [vmem:[%s11706_s9 + $0x124] sm:$0xf0] }
 0x65b   : > { %5011 = vmatpush.bf16.msra.mxu2 %v7544_v51 }
 0x65c   : > { %v4254_v24 = vpop.f32.mrf.mxu3 }
 0x65d   : > { %v4255_v54 = vadd.f32 %v4254_v24, %v4231_v34  ;;  %v7363_v34 = vld [vmem:[%s11706_s9 + $0x120] sm:$0xf] }
 0x65e   : > { %v4210_v41 = vpop.f32.mrf.mxu1  ;;  %v4233_v0 = vpop.f32.mrf.mxu2  ;;  %v7364_v24 = vor.u32 %v8187_v23, %v7363_v34 }
 0x65f   : > { %v4269_v16 = vmax.f32 %v3970_v63, %v4255_v54  ;;  %v4211_v37 = vadd.f32 %v4210_v41, %v4187_v58  ;;  %v7300_v58 = vor.u32 %v8171_v4, %v7299_v55  ;;  %v7360_v63 = vor.u32 %v8184_v35, %v7357_v61  ;;  %v8203_v54 = vld [vmem:[%s11706_s9 + $0x1a4] sm:$0xf0]  ;;  %v8197_v55 = vld [vmem:[%s11706_s9 + $0x174] sm:$0xf0]  ;;  %v7503_v35 = vld [vmem:[%s11706_s9 + $0x160] sm:$0xf] }
 0x660   : > { %v4190_v59 = vpop.f32.mrf.mxu0  ;;  %v7536_v50 = vor.u32 %v8203_v54, %v7535_v33  ;;  %4616 = vmatpush.bf16.msra.mxu1 %v7364_v24  ;;  %v7352_v41 = vor.u32 %v8182_v47, %v7349_v45  ;;  %v3977_v4 = vadd.f32 %v10861_v1, %v10851_v36  ;;  %v11089_v1 = vadd.f32 %v10876_v56, %v10865_v14  ;;  %v8176_v24 = vld [vmem:[%s11706_s9 + $0xd4] sm:$0xf]  ;;  %v8195_v61 = vld [vmem:[%s11706_s9 + $0x164] sm:$0xf0]  ;;  %v8174_v47 = vld [vmem:[%s11706_s9 + $0xc4] sm:$0xf] }
 0x661   : > { %v4278_v15 = vpack.c.bf16 %v4269_v16, %v4268_v29  ;;  %v4270_v12 = vmax.f32 %v3926_v39, %v4211_v37  ;;  %4597 = vmatpush.bf16.msra.mxu0 %v7300_v58  ;;  %v8180_v29 = vld [vmem:[%s11706_s9 + $0xf4] sm:$0xf]  ;;  %v7341_v16 = vld [vmem:[%s11706_s9 + $0xf8] sm:$0xf0]  ;;  %v7520_v39 = vor.u32 %v8199_v28, %v7519_v60  ;;  %v7317_v45 = vld [vmem:[%s11706_s9 + $0xc8] sm:$0xf0] }
 0x662   : > { %5012 = vmatpush.bf16.msra.mxu2 %v7536_v50  ;;  %v7344_v3 = vor.u32 %v8180_v29, %v7341_v16  ;;  %v8209_v60 = vld [vmem:[%s11706_s9 + $0x1d4] sm:$0xf0] }
 0x663   : > { %4285 = vst.msk [vmem:[#allocation3] sm:$0xff] %vm10953_vm15, %v4278_v15 }
 0x664   : > { %v4256_v21 = vpop.f32.mrf.mxu3 }
 0x665   : > { %v4257_v25 = vadd.f32 %v4256_v21, %v4233_v0  ;;  %4628 = vmatpush.bf16.msrb.mxu0 %v7360_v63  ;;  %v7527_v0 = vld [vmem:[%s11706_s9 + $0x190] sm:$0xf] }
 0x666   : > { %v4213_v5 = vpop.f32.mrf.mxu1  ;;  %v4236_v26 = vpop.f32.mrf.mxu2  ;;  %v7528_v31 = vor.u32 %v8201_v53, %v7527_v0 }
 0x667   : > { %v4271_v27 = vmax.f32 %v3972_v48, %v4257_v25  ;;  %v4214_v6 = vadd.f32 %v4213_v5, %v4190_v59  ;;  %v8178_v48 = vld [vmem:[%s11706_s9 + $0xe4] sm:$0xf]  ;;  %v7511_v5 = vld [vmem:[%s11706_s9 + $0x170] sm:$0xf] }
 0x668   : > { %v4192_v57 = vpop.f32.mrf.mxu0  ;;  %5013 = vmatpush.bf16.msra.mxu2 %v7528_v31  ;;  %v7336_v30 = vor.u32 %v8178_v48, %v7333_v52  ;;  %v7512_v36 = vor.u32 %v8197_v55, %v7511_v5  ;;  %v7309_v48 = vld [vmem:[%s11706_s9 + $0xb8] sm:$0xf0] }
 0x669   : > { %v4279_v20 = vpack.c.bf16 %v4271_v27, %v4270_v12  ;;  %v4272_v17 = vmax.f32 %v3929_v11, %v4214_v6  ;;  %4629 = vmatpush.bf16.msrb.mxu0 %v7352_v41  ;;  %v7373_v55 = vld [vmem:[%s11706_s9 + $0x138] sm:$0xf0] }
 0x66a   : > { %v4290_v7 = vld [vmem:[#allocation3] sm:$0xff] }
 0x66b   : > { %4286 = vst.msk [vmem:[#allocation3 + $0x8] sm:$0xff] %vm10953_vm15, %v4279_v20  ;;  %v11047_v62 = vunpack.c.l.b16 %v4290_v7  ;;  %v11056_v10 = vunpack.c.h.b16 %v4290_v7  ;;  %v8193_v7 = vld [vmem:[%s11706_s9 + $0x154] sm:$0xf0] }
 0x66c   : > { %v4259_v22 = vpop.f32.mrf.mxu3  ;;  %5014 = vmatpush.bf16.msra.mxu2 %v7520_v39  ;;  %v8172_v39 = vld [vmem:[%s11706_s9 + $0xb4] sm:$0xf] }
 0x66d   : > { %v4260_v59 = vadd.f32 %v4259_v22, %v4236_v26  ;;  %4630 = vmatpush.bf16.msrb.mxu0 %v7344_v3  ;;  %v3931_v26 = vadd.f32 %v10849_v18, %v10845_v38  ;;  %v11085_v38 = vadd.f32 %v10863_v49, %v10853_v42  ;;  %v7325_v42 = vld [vmem:[%s11706_s9 + $0xd8] sm:$0xf0]  ;;  %v7504_v22 = vor.u32 %v8195_v61, %v7503_v35  ;;  %v7559_v3 = vld [vmem:[%s11706_s9 + $0x1d0] sm:$0xf] }
 0x66e   : > { %v4215_v15 = vpop.f32.mrf.mxu1  ;;  %v4238_v37 = vpop.f32.mrf.mxu2  ;;  %v7328_v56 = vor.u32 %v8176_v24, %v7325_v42  ;;  %v4300_v31 = vpack.c.b16 %v11047_v62, %v11047_v62  ;;  %v8207_v24 = vld [vmem:[%s11706_s9 + $0x1c4] sm:$0xf0] }
 0x66f   : > { %v4273_v21 = vmax.f32 %v3975_v8, %v4260_v59  ;;  %v4216_v25 = vadd.f32 %v4215_v15, %v4192_v57  ;;  %v7320_v8 = vor.u32 %v8174_v47, %v7317_v45  ;;  %v7495_v59 = vld [vmem:[%s11706_s9 + $0x150] sm:$0xf] }
 0x670   : > { %v4195_v43 = vpop.f32.mrf.mxu0  ;;  %5015 = vmatpush.bf16.msra.mxu2 %v7512_v36 }
 0x671   : > { %v4280_v19 = vpack.c.bf16 %v4273_v21, %v4272_v17  ;;  %v4274_v44 = vmax.f32 %v3931_v26, %v4216_v25  ;;  %4631 = vmatpush.bf16.msrb.mxu0 %v7336_v30  ;;  %v4301_v17 = vpack.c.b16 %v11056_v10, %v11056_v10  ;;  %v8188_v25 = vld [vmem:[%s11706_s9 + $0x134] sm:$0xf]  ;;  %v7496_v26 = vor.u32 %v8193_v7, %v7495_v59 }
 0x672   : > { %v11049_v40 = vld [vmem:[#allocation3 + $0x8] sm:$0x11]  ;;  %v4291_v23 = vld [vmem:[#allocation3 + $0x8] sm:$0xee]  ;;  %v7312_v30 = vor.u32 %v8172_v39, %v7309_v48 }
 0x673   : > { %4287 = vst.msk [vmem:[#allocation3 + $0x10] sm:$0xff] %vm10953_vm15, %v4280_v19  ;;  %v4372_v46 = vunpack.c.h.b16 %v11049_v40  ;;  %v4371_v13 = vunpack.c.l.b16 %v11049_v40  ;;  %v4304_v20 = vunpack.c.l.b16 %v4291_v23  ;;  %v4305_v6 = vunpack.c.h.b16 %v4291_v23  ;;  %v7551_v23 = vld [vmem:[%s11706_s9 + $0x1c0] sm:$0xf] }
 0x674   : > { %v4261_v2 = vpop.f32.mrf.mxu3  ;;  %5016 = vmatpush.bf16.msra.mxu2 %v7504_v22 }
 0x675   : > { %v4262_v34 = vadd.f32 %v4261_v2, %v4238_v37  ;;  %v11076_v12 = vpack.c.b16 %v4372_v46, %v11056_v10  ;;  %v11081_v27 = vpack.c.b16 %v4371_v13, %v11047_v62  ;;  %4632 = vmatpush.bf16.msrb.mxu0 %v7328_v56  ;;  %v7560_v2 = vor.u32 %v8209_v60, %v7559_v3  ;;  %v8191_v56 = vld [vmem:[%s11706_s9 + $0x144] sm:$0xf0] }
 0x676   : > { %v4218_v18 = vpop.f32.mrf.mxu1  ;;  %v4241_v58 = vpop.f32.mrf.mxu2 }
 0x677   : > { %v4275_v32 = vmax.f32 %v3977_v4, %v4262_v34  ;;  %v4378_v57 = vshll.u32 %v11081_v27, 16  ;;  %v11098_v49 = vadd.f32 %v4218_v18, %v4195_v43  ;;  %v4385_v51 = vshll.u32 %v11076_v12, 16  ;;  %5036 = vmatpush.bf16.msra.mxu3 %v7560_v2 }
 0x678   : > { %v4197_v14 = vpop.f32.mrf.mxu0  ;;  %v4376_v63 = vshrl.u32 %v11081_v27, 16  ;;  %v4383_v54 = vshrl.u32 %v11076_v12, 16  ;;  %5017 = vmatpush.bf16.msra.mxu2 %v7496_v26 }
 0x679   : > { %v4281_v33 = vpack.c.bf16 %v4275_v32, %v4274_v44  ;;  %v4380_v0 = vrot.slane %v4378_v57, 1  ;;  %v4387_v53 = vrot.slane %v4385_v51, 1  ;;  %v4276_v15 = vmax.f32 %v11085_v38, %v11098_v49  ;;  %4633 = vmatpush.bf16.msrb.mxu0 %v7320_v8  ;;  %v7487_v14 = vld [vmem:[%s11706_s9 + $0x140] sm:$0xf] }
 0x67a   : > { %v4292_v50 = vld [vmem:[#allocation3 + $0x10] sm:$0x11]  ;;  %v7376_v57 = vor.u32 %v8188_v25, %v7373_v55  ;;  %v7488_v59 = vor.u32 %v8191_v56, %v7487_v14  ;;  %v8162_v25 = vld [vmem:[%s11706_s9 + $0x64] sm:$0xf] }
 0x67b   : > { %v11115_v41 = vld [vmem:[#allocation3 + $0x10] sm:$0x33]  ;;  %4288 = vst.msk [vmem:[#allocation3 + $0x18] sm:$0xff] %vm10953_vm15, %v4281_v33  ;;  %v4306_v29 = vunpack.c.l.b16 %v4292_v50  ;;  %v4307_v16 = vunpack.c.h.b16 %v4292_v50  ;;  %v4381_v47 = vor.u32 %v4380_v0, %v4376_v63  ;;  %v4388_v45 = vor.u32 %v4387_v53, %v4383_v54  ;;  %v7301_v0 = vld [vmem:[%s11706_s9 + $0xa8] sm:$0xf0] }
 0x67c   : > { %v4391_v11 = vunpack.c.h.b16 %v11115_v41  ;;  %v4264_v37 = vpop.f32.mrf.mxu3  ;;  %v4390_v21 = vunpack.c.l.b16 %v11115_v41  ;;  %4653 = vmatpush.bf16.msrb.mxu1 %v7376_v57  ;;  %v8186_v53 = vld [vmem:[%s11706_s9 + $0x124] sm:$0xf]  ;;  %5018 = vmatpush.bf16.msra.mxu2 %v7488_v59  ;;  %v7449_v41 = vld [vmem:[%s11706_s9 + $0x88] sm:$0xf0] }
 0x67d   : > { %v4265_v28 = vadd.f32 %v4264_v37, %v4241_v58  ;;  %v4308_v43 = vpack.c.b16 %v4306_v29, %v4304_v20  ;;  %v4309_v62 = vpack.c.b16 %v4307_v16, %v4305_v6  ;;  %v4293_v58 = vld [vmem:[#allocation3 + $0x10] sm:$0xcc]  ;;  %4634 = vmatpush.bf16.msrb.mxu0 %v7312_v30 }
 0x67e   : > { %v4393_v19 = vpack.c.b16 %v4391_v11, %v4305_v6  ;;  %v4392_v10 = vpack.c.b16 %v4390_v21, %v4304_v20  ;;  %v4220_v52 = vpop.f32.mrf.mxu1  ;;  %v4243_v5 = vpop.f32.mrf.mxu2  ;;  %v7552_v6 = vor.u32 %v8207_v24, %v7551_v23  ;;  %v4314_v16 = vunpack.c.l.b16 %v4293_v58  ;;  %v7425_v23 = vld [vmem:[%s11706_s9 + $0x58] sm:$0xf0] }
 0x67f   : > { %v4277_v4 = vmax.f32 %v11089_v1, %v4265_v28  ;;  %v4310_v34 = vrot.slane %v4308_v43, 5  ;;  %v4311_v38 = vrot.slane %v4309_v62, 5  ;;  %v4315_v63 = vunpack.c.h.b16 %v4293_v58  ;;  %v8164_v28 = vld [vmem:[%s11706_s9 + $0x74] sm:$0xf]  ;;  %v7441_v43 = vld [vmem:[%s11706_s9 + $0x78] sm:$0xf0] }
 0x680   : > { %v4403_v18 = vshrl.u32 %v4393_v19, 16  ;;  %v4395_v36 = vshrl.u32 %v4392_v10, 16  ;;  %v4398_v44 = vshll.u32 %v4392_v10, 16  ;;  %v4406_v32 = vshll.u32 %v4393_v19, 16  ;;  %5037 = vmatpush.bf16.msra.mxu3 %v7552_v6  ;;  %v7433_v10 = vld [vmem:[%s11706_s9 + $0x68] sm:$0xf0] }
 0x681   : > { %v4282_v42 = vpack.c.bf16 %v4277_v4, %v4276_v15  ;;  %v11163_v1 = vsel %vm2470_vm4, %v4300_v31, %v4310_v34  ;;  %v11166_v49 = vsel %vm2470_vm4, %v4301_v17, %v4311_v38  ;;  %v7365_v15 = vld [vmem:[%s11706_s9 + $0x128] sm:$0xf0]  ;;  %v7304_v19 = vor.u32 %v8170_v9, %v7301_v0  ;;  %v8160_v58 = vld [vmem:[%s11706_s9 + $0x54] sm:$0xf] }
 0x682   : > { %v4405_v51 = vrot.slane %v4403_v18, 5  ;;  %4778 = vmatmul.bf16.vlgmr.msrb.gmra.mxu2 %v11163_v1  ;;  %7461 = vmatmul.msk.bf16.vlgmr.msrb.gmra.mxu3 %vm4585_vm0, %v11166_v49  ;;  %v4397_v35 = vrot.slane %v4395_v36, 5  ;;  %v4400_v61 = vrot.slane %v4398_v44, 6  ;;  %v4408_v33 = vrot.slane %v4406_v32, 6  ;;  %v4294_v20 = vld [vmem:[#allocation3 + $0x18] sm:$0x33] }
 0x683   : > { %4289 = vst.msk [vmem:[#allocation3 + $0x20] sm:$0xff] %vm10953_vm15, %v4282_v42  ;;  %v11183_v50 = vld [vmem:[#allocation3 + $0x18] sm:$0x77]  ;;  %v4316_v27 = vunpack.c.l.b16 %v4294_v20  ;;  %v4295_v17 = vld [vmem:[#allocation3 + $0x18] sm:$0x88]  ;;  %v4317_v7 = vunpack.c.h.b16 %v4294_v20  ;;  %v7368_v62 = vor.u32 %v8186_v53, %v7365_v15  ;;  %4635 = vmatpush.bf16.msrb.mxu0 %v7304_v19  ;;  %v7444_v55 = vor.u32 %v8164_v28, %v7441_v43 }
 0x684   : > { %v4401_v22 = vor.u32 %v4400_v61, %v4397_v35  ;;  %v4409_v29 = vor.u32 %v4408_v33, %v4405_v51  ;;  %v4266_v8 = vpop.f32.mrf.mxu3  ;;  %v4411_v12 = vunpack.c.l.b16 %v11183_v50  ;;  %v4412_v54 = vunpack.c.h.b16 %v11183_v50  ;;  %v8158_v53 = vld [vmem:[%s11706_s9 + $0x44] sm:$0xf]  ;;  %v7417_v15 = vld [vmem:[%s11706_s9 + $0x48] sm:$0xf0]  ;;  %v4847_v28 = vld [vmem:[#allocation3 + $0x8] sm:$0xcc] }
 0x685   : > { %v4318_v39 = vpack.c.b16 %v4316_v27, %v4314_v16  ;;  %v4324_v48 = vunpack.c.l.b16 %v4295_v17  ;;  %v4319_v5 = vpack.c.b16 %v4317_v7, %v4315_v63  ;;  %v4325_v26 = vunpack.c.h.b16 %v4295_v17  ;;  %4654 = vmatpush.bf16.msrb.mxu1 %v7368_v62 }
 0x686   : > { %v11200_v37 = vsel %vm2470_vm4, %v4381_v47, %v4401_v22  ;;  %v11203_v31 = vsel %vm2470_vm4, %v4388_v45, %v4409_v29  ;;  %v4413_v3 = vpack.c.b16 %v4411_v12, %v4314_v16  ;;  %v4414_v60 = vpack.c.b16 %v4412_v54, %v4315_v63 }
 0x687   : > { %4598 = vmatmul.bf16.vlgmr.msra.gmra.mxu0 %v11200_v37  ;;  %7377 = vmatmul.msk.bf16.vlgmr.msra.gmra.mxu1 %vm4585_vm0, %v11203_v31  ;;  %v7436_v57 = vor.u32 %v8162_v25, %v7433_v10  ;;  %v4320_v24 = vrot.slane %v4318_v39, 2  ;;  %v4321_v14 = vrot.slane %v4319_v5, 2  ;;  %v7428_v61 = vor.u32 %v8160_v58, %v7425_v23  ;;  %v4846_v39 = vld [vmem:[#allocation3] sm:$0xee]  ;;  %v8156_v10 = vld [vmem:[%s11706_s9 + $0x34] sm:$0xf] }
 0x688   : > { %v4416_v30 = vshrl.u32 %v4413_v3, 16  ;;  %v4419_v38 = vshll.u32 %v4413_v3, 16  ;;  %v4424_v18 = vshrl.u32 %v4414_v60, 16  ;;  %v4427_v44 = vshll.u32 %v4414_v60, 16  ;;  %4808 = vmatpush.bf16.msra.mxu0 %v7444_v55 }
 0x689   : > { %v7420_v43 = vor.u32 %v8158_v53, %v7417_v15  ;;  %v4858_v25 = vunpack.c.h.b16 %v4847_v28  ;;  %v7529_v53 = vld [vmem:[%s11706_s9 + $0x198] sm:$0xf0] }
 0x68a   : > { %v4296_v52 = vld [vmem:[#allocation3 + $0x20] sm:$0x77]  ;;  %v4418_v47 = vrot.slane %v4416_v30, 2  ;;  %v4421_v45 = vrot.slane %v4419_v38, 3  ;;  %v4426_v22 = vrot.slane %v4424_v18, 2  ;;  %v4429_v29 = vrot.slane %v4427_v44, 3 }
 0x68b   : > { %v4369_v2 = vld [vmem:[#allocation3 + $0x20] sm:$0xff]  ;;  %v4326_v4 = vunpack.c.l.b16 %v4296_v52  ;;  %v4327_v34 = vunpack.c.h.b16 %v4296_v52  ;;  %v7409_v52 = vld [vmem:[%s11706_s9 + $0x38] sm:$0xf0]  ;;  %v4851_v30 = vunpack.c.h.b16 %v4846_v39  ;;  %v8168_v38 = vld [vmem:[%s11706_s9 + $0x94] sm:$0xf] }
 0x68c   : > { %v11230_v36 = vunpack.c.l.b16 %v4369_v2  ;;  %v11232_v32 = vunpack.c.h.b16 %v4369_v2  ;;  %4809 = vmatpush.bf16.msra.mxu0 %v7436_v57  ;;  %v4422_v17 = vor.u32 %v4421_v45, %v4418_v47  ;;  %v4430_v3 = vor.u32 %v4429_v29, %v4426_v22  ;;  %v7457_v18 = vld [vmem:[%s11706_s9 + $0x98] sm:$0xf0]  ;;  %v8204_v45 = vld [vmem:[%s11706_s9 + $0x1b4] sm:$0xf]  ;;  %v8202_v22 = vld [vmem:[%s11706_s9 + $0x1a4] sm:$0xf] }
 0x68d   : > { %v4328_v42 = vpack.c.b16 %v4326_v4, %v4324_v48  ;;  %v4329_v51 = vpack.c.b16 %v4327_v34, %v4325_v26  ;;  %v7412_v5 = vor.u32 %v8156_v10, %v7409_v52  ;;  %v4850_v2 = vunpack.c.l.b16 %v4846_v39  ;;  %v7401_v34 = vld [vmem:[%s11706_s9 + $0x28] sm:$0xf0]  ;;  %v4848_v47 = vld [vmem:[#allocation3 + $0x10] sm:$0x88]  ;;  %v8206_v52 = vld [vmem:[%s11706_s9 + $0x1c4] sm:$0xf] }
 0x68e   : > { %v4434_v56 = vpack.c.b16 %v11230_v36, %v4324_v48  ;;  %v4435_v35 = vpack.c.b16 %v11232_v32, %v4325_v26  ;;  %v4857_v48 = vunpack.c.l.b16 %v4847_v28  ;;  %v8154_v26 = vld [vmem:[%s11706_s9 + $0x24] sm:$0xf]  ;;  %v4860_v4 = vpack.c.b16 %v4391_v11, %v4858_v25  ;;  %v7521_v28 = vld [vmem:[%s11706_s9 + $0x188] sm:$0xf0]  ;;  %v7561_v25 = vld [vmem:[%s11706_s9 + $0x1d8] sm:$0xf0] }
 0x68f   : > { %v4330_v33 = vrot.slane %v4328_v42, 7  ;;  %v4331_v20 = vrot.slane %v4329_v51, 7  ;;  %v7460_v58 = vor.u32 %v8168_v38, %v7457_v18  ;;  %v4852_v11 = vpack.c.b16 %v4371_v13, %v4850_v2  ;;  %v8152_v51 = vld [vmem:[%s11706_s9 + $0x14] sm:$0xf]  ;;  %v7489_v38 = vld [vmem:[%s11706_s9 + $0x148] sm:$0xf0] }
 0x690   : > { %v4437_v6 = vshrl.u32 %v4434_v56, 16  ;;  %v4444_v16 = vshrl.u32 %v4435_v35, 16  ;;  %v4440_v9 = vshll.u32 %v4434_v56, 16  ;;  %v4447_v27 = vshll.u32 %v4435_v35, 16  ;;  %4810 = vmatpush.bf16.msra.mxu0 %v7428_v61  ;;  %v8150_v61 = vld [vmem:[%s11706_s9 + $0x4] sm:$0xf] }
 0x691   : > { %v11237_v8 = vsel %vm2470_vm4, %v4320_v24, %v4330_v33  ;;  %v11240_v59 = vsel %vm2470_vm4, %v4321_v14, %v4331_v20  ;;  %v4859_v55 = vpack.c.b16 %v4390_v21, %v4857_v48  ;;  %v8166_v21 = vld [vmem:[%s11706_s9 + $0x84] sm:$0xf]  ;;  %v4853_v23 = vpack.c.b16 %v4372_v46, %v4851_v30  ;;  %4833 = vmatpush.bf16.msra.mxu1 %v7460_v58  ;;  %v7393_v14 = vld [vmem:[%s11706_s9 + $0x18] sm:$0xf0]  ;;  %v7385_v33 = vld [vmem:[%s11706_s9 + $0x8] sm:$0xf0] }
 0x692   : > { %4783 = vmatmul.bf16.gmra.mxu2 %v11237_v8  ;;  %7462 = vmatmul.msk.bf16.gmra.mxu3 %vm4585_vm0, %v11240_v59  ;;  %v4439_v63 = vrot.slane %v4437_v6, 7  ;;  %v4446_v0 = vrot.slane %v4444_v16, 7  ;;  %v7404_v44 = vor.u32 %v8154_v26, %v7401_v34  ;;  %v7452_v57 = vor.u32 %v8166_v21, %v7449_v41  ;;  %v7545_v6 = vld [vmem:[%s11706_s9 + $0x1b8] sm:$0xf0]  ;;  %v8194_v48 = vld [vmem:[%s11706_s9 + $0x164] sm:$0xf] }
 0x693   : > { %v4861_v24 = vrot.slane %v4859_v55, 6  ;;  %v4862_v42 = vrot.slane %v4860_v4, 6  ;;  %v4854_v56 = vrot.slane %v4852_v11, 1  ;;  %v4855_v35 = vrot.slane %v4853_v23, 1  ;;  %v8192_v30 = vld [vmem:[%s11706_s9 + $0x154] sm:$0xf] }
 0x694   : > { %v4442_v7 = vor.u32 %v4440_v9, %v4439_v63  ;;  %v4449_v60 = vor.u32 %v4447_v27, %v4446_v0  ;;  %4811 = vmatpush.bf16.msra.mxu0 %v7420_v43  ;;  %v7396_v13 = vor.u32 %v8152_v51, %v7393_v14  ;;  %v7388_v20 = vor.u32 %v8150_v61, %v7385_v33  ;;  %v8200_v0 = vld [vmem:[%s11706_s9 + $0x194] sm:$0xf]  ;;  %v7513_v43 = vld [vmem:[%s11706_s9 + $0x178] sm:$0xf0]  ;;  %v8190_v34 = vld [vmem:[%s11706_s9 + $0x144] sm:$0xf] }
 0x695   : > { %4834 = vmatpush.bf16.msra.mxu1 %v7452_v57  ;;  %v11299_v40 = vsel %vm2470_vm4, %v4854_v56, %v4861_v24  ;;  %v11302_v46 = vsel %vm2470_vm4, %v4855_v35, %v4862_v42  ;;  %v7548_v29 = vor.u32 %v8204_v45, %v7545_v6  ;;  %v4864_v16 = vunpack.c.l.b16 %v4848_v47  ;;  %v7497_v55 = vld [vmem:[%s11706_s9 + $0x158] sm:$0xf0] }
 0x696   : > { %v11252_v19 = vsel %vm2470_vm4, %v4422_v17, %v4442_v7  ;;  %v11255_v62 = vsel %vm2470_vm4, %v4430_v3, %v4449_v60  ;;  %v4870_v15 = vpack.c.b16 %v11230_v36, %v11230_v36  ;;  %v4871_v17 = vpack.c.b16 %v11232_v32, %v11232_v32  ;;  %v8198_v60 = vld [vmem:[%s11706_s9 + $0x184] sm:$0xf]  ;;  %v8196_v32 = vld [vmem:[%s11706_s9 + $0x174] sm:$0xf] }
 0x697   : > { %4603 = vmatmul.bf16.gmra.mxu0 %v11252_v19  ;;  %7378 = vmatmul.msk.bf16.gmra.mxu1 %vm4585_vm0, %v11255_v62  ;;  %v4866_v27 = vpack.c.b16 %v4411_v12, %v4864_v16  ;;  %v7532_v3 = vor.u32 %v8200_v0, %v7529_v53  ;;  %v7524_v36 = vor.u32 %v8198_v60, %v7521_v28 }
 0x698   : > { %4812 = vmatpush.bf16.msra.mxu0 %v7412_v5  ;;  %v7516_v39 = vor.u32 %v8196_v32, %v7513_v43  ;;  %v7553_v5 = vld [vmem:[%s11706_s9 + $0x1c8] sm:$0xf0]  ;;  %v7500_v4 = vor.u32 %v8192_v30, %v7497_v55  ;;  %v7492_v18 = vor.u32 %v8190_v34, %v7489_v38 }
 0x699   : > { %v4868_v7 = vrot.slane %v4866_v27, 3  ;;  %v7556_v2 = vor.u32 %v8206_v52, %v7553_v5 }
 0x69b   : > { %v4881_v50 = vsel %vm2470_vm4, %v4868_v7, %v4870_v15 }
 0x69c   : > { %4813 = vmatpush.bf16.msra.mxu0 %v7404_v44 }
 0x6a0   : > { %4814 = vmatpush.bf16.msra.mxu0 %v7396_v13 }
 0x6a2   : > { %5019 = vmatmul.bf16.vlgmr.msra.gmra.mxu2 %v11299_v40  ;;  %7565 = vmatmul.msk.bf16.vlgmr.msra.gmra.mxu3 %vm4585_vm0, %v11302_v46 }
 0x6a4   : > { %4815 = vmatpush.bf16.msra.mxu0 %v7388_v20 }
 0x6a7   : > { %4636 = vmatmul.bf16.vlgmr.msrb.gmra.mxu0 %v11200_v37  ;;  %7379 = vmatmul.msk.bf16.vlgmr.msrb.gmra.mxu1 %vm4585_vm0, %v11203_v31  ;;  %v7537_v37 = vld [vmem:[%s11706_s9 + $0x1a8] sm:$0xf0]  ;;  %v4865_v31 = vunpack.c.h.b16 %v4848_v47 }
 0x6a8   : > { %5049 = vmatpush.bf16.msrb.mxu0 %v7548_v29  ;;  %v7540_v9 = vor.u32 %v8202_v22, %v7537_v37 }
 0x6a9   : > { %v4867_v63 = vpack.c.b16 %v4412_v54, %v4865_v31 }
 0x6ab   : > { %v4869_v12 = vrot.slane %v4867_v63, 3 }
 0x6ac   : > { %5050 = vmatpush.bf16.msrb.mxu0 %v7540_v9 }
 0x6ad   : > { %v4885_v54 = vsel %vm2470_vm4, %v4869_v12, %v4871_v17 }
 0x6b0   : > { %5051 = vmatpush.bf16.msrb.mxu0 %v7532_v3 }
 0x6b2   : > { %5024 = vmatmul.bf16.gmra.mxu2 %v4881_v50  ;;  %7566 = vmatmul.msk.bf16.gmra.mxu3 %vm4585_vm0, %v4885_v54 }
 0x6b4   : > { %5052 = vmatpush.bf16.msrb.mxu0 %v7524_v36 }
 0x6b7   : > { %4641 = vmatmul.bf16.gmra.mxu0 %v11252_v19  ;;  %7380 = vmatmul.msk.bf16.gmra.mxu1 %vm4585_vm0, %v11255_v62  ;;  %v7505_v19 = vld [vmem:[%s11706_s9 + $0x168] sm:$0xf0]  ;;  %v8208_v62 = vld [vmem:[%s11706_s9 + $0x1d4] sm:$0xf] }
 0x6b8   : > { %v7564_v10 = vor.u32 %v8208_v62, %v7561_v25  ;;  %5053 = vmatpush.bf16.msrb.mxu0 %v7516_v39  ;;  %v7508_v26 = vor.u32 %v8194_v48, %v7505_v19 }
 0x6ba   : > { %5074 = vmatpush.bf16.msrb.mxu1 %v7564_v10 }
 0x6bc   : > { %5054 = vmatpush.bf16.msrb.mxu0 %v7508_v26 }
 0x6be   : > { %5075 = vmatpush.bf16.msrb.mxu1 %v7556_v2 }
 0x6c0   : > { %5055 = vmatpush.bf16.msrb.mxu0 %v7500_v4 }
 0x6c4   : > { %5056 = vmatpush.bf16.msrb.mxu0 %v7492_v18 }
 0x6c7   : > { %4816 = vmatmul.bf16.vlgmr.msra.gmra.mxu0 %v11163_v1  ;;  %7463 = vmatmul.msk.bf16.vlgmr.msra.gmra.mxu1 %vm4585_vm0, %v11166_v49 }
 0x6d7   : > { %4821 = vmatmul.bf16.gmra.mxu0 %v11237_v8  ;;  %7464 = vmatmul.msk.bf16.gmra.mxu1 %vm4585_vm0, %v11240_v59 }
 0x6e7   : > { %5057 = vmatmul.bf16.vlgmr.msrb.gmra.mxu0 %v11299_v40  ;;  %7567 = vmatmul.msk.bf16.vlgmr.msrb.gmra.mxu1 %vm4585_vm0, %v11302_v46 }
 0x6f7   : > { %5062 = vmatmul.bf16.gmra.mxu0 %v4881_v50  ;;  %7568 = vmatmul.msk.bf16.gmra.mxu1 %vm4585_vm0, %v4885_v54  ;;  %v5095_v54 = vld [vmem:[%s11707_s10] sm:$0x3] }
 0x6f8   : > { %v5097_v25 = vperm.slane %v5095_v54, 0 }
 0x704   : > { %v4599_v58 = vpop.f32.mrf.mxu0  ;;  %v4618_v21 = vpop.f32.mrf.mxu1 }
 0x705   : > { %v4779_v1 = vpop.f32.mrf.mxu2  ;;  %v4798_v41 = vpop.f32.mrf.mxu3  ;;  %v4619_v31 = vadd.f32 %v4618_v21, %v4599_v58 }
 0x707   : > { %v4780_v7 = vadd.f32 %v4779_v1, %v4619_v31 }
 0x709   : > { %v4799_v39 = vadd.f32 %v4798_v41, %v4780_v7 }
 0x70c   : > { %v4601_v11 = vpop.f32.mrf.mxu0  ;;  %v4620_v49 = vpop.f32.mrf.mxu1 }
 0x70d   : > { %v4781_v23 = vpop.f32.mrf.mxu2  ;;  %v4800_v44 = vpop.f32.mrf.mxu3  ;;  %v4621_v29 = vadd.f32 %v4620_v49, %v4601_v11 }
 0x70f   : > { %v4782_v15 = vadd.f32 %v4781_v23, %v4621_v29 }
 0x711   : > { %v4801_v60 = vadd.f32 %v4800_v44, %v4782_v15 }
 0x714   : > { %v4604_v8 = vpop.f32.mrf.mxu0  ;;  %v4623_v57 = vpop.f32.mrf.mxu1 }
 0x715   : > { %v4784_v24 = vpop.f32.mrf.mxu2  ;;  %v4803_v59 = vpop.f32.mrf.mxu3  ;;  %v4624_v22 = vadd.f32 %v4623_v57, %v4604_v8 }
 0x717   : > { %v4785_v0 = vadd.f32 %v4784_v24, %v4624_v22 }
 0x719   : > { %v4804_v12 = vadd.f32 %v4803_v59, %v4785_v0  ;;  %v8210_v59 = vld [vmem:[%s11708_s11] sm:$0xff] }
 0x71c   : > { %v4606_v42 = vpop.f32.mrf.mxu0  ;;  %v4625_v51 = vpop.f32.mrf.mxu1 }
 0x71d   : > { %v4786_v14 = vpop.f32.mrf.mxu2  ;;  %v4805_v56 = vpop.f32.mrf.mxu3  ;;  %v4626_v53 = vadd.f32 %v4625_v51, %v4606_v42 }
 0x71f   : > { %v4787_v3 = vadd.f32 %v4786_v14, %v4626_v53 }
 0x721   : > { %v4806_v62 = vadd.f32 %v4805_v56, %v4787_v3 }
 0x724   : > { %v4637_v35 = vpop.f32.mrf.mxu0  ;;  %v4656_v13 = vpop.f32.mrf.mxu1 }
 0x725   : > { %v11400_v40 = vadd.f32 %v4656_v13, %v4637_v35  ;;  %v5020_v46 = vpop.f32.mrf.mxu2  ;;  %v5039_v61 = vpop.f32.mrf.mxu3 }
 0x726   : > { %v5040_v28 = vadd.f32 %v5039_v61, %v5020_v46  ;;  %v5098_v61 = vperm.slane %v5095_v54, 1 }
 0x728   : > { %v5087_v5 = vadd.f32 %v5040_v28, %v4799_v39  ;;  %v8235_v28 = vld [vmem:[%s11709_s12 + $0xb8] sm:$0xff] }
 0x72a   : > { %v5101_v4 = vadd.f32 %v5097_v25, %v5087_v5  ;;  %v8233_v5 = vld [vmem:[%s11709_s12 + $0xa8] sm:$0xff] }
 0x72c   : > { %v4639_v33 = vpop.f32.mrf.mxu0  ;;  %v4658_v20 = vpop.f32.mrf.mxu1  ;;  %v5109_v11 = vmax.f32 %v5101_v4, 0.0  ;;  %v8231_v4 = vld [vmem:[%s11709_s12 + $0x98] sm:$0xff] }
 0x72d   : > { %v11402_v47 = vadd.f32 %v4658_v20, %v4639_v33  ;;  %v5022_v45 = vpop.f32.mrf.mxu2  ;;  %v5041_v6 = vpop.f32.mrf.mxu3 }
 0x72e   : > { %v5042_v50 = vadd.f32 %v5041_v6, %v5022_v45 }
 0x730   : > { %v5089_v10 = vadd.f32 %v5042_v50, %v4801_v60 }
 0x732   : > { %v5103_v30 = vadd.f32 %v5097_v25, %v5089_v10  ;;  %v8234_v10 = vld [vmem:[%s11709_s12 + $0xb0] sm:$0xff] }
 0x734   : > { %v4642_v37 = vpop.f32.mrf.mxu0  ;;  %v4661_v16 = vpop.f32.mrf.mxu1  ;;  %v5111_v21 = vmax.f32 %v5103_v30, 0.0  ;;  %v8232_v30 = vld [vmem:[%s11709_s12 + $0xa0] sm:$0xff] }
 0x735   : > { %v11404_v9 = vadd.f32 %v4661_v16, %v4642_v37  ;;  %v5025_v27 = vpop.f32.mrf.mxu2  ;;  %v5044_v63 = vpop.f32.mrf.mxu3  ;;  %v8211_v37 = vld [vmem:[%s11708_s11 + $0x8] sm:$0xff] }
 0x736   : > { %v5045_v17 = vadd.f32 %v5044_v63, %v5025_v27  ;;  %v5117_v41 = vpack.c.bf16 %v5111_v21, %v5109_v11  ;;  %v8214_v11 = vld [vmem:[%s11709_s12 + $0x10] sm:$0xff] }
 0x738   : > { %v5091_v36 = vadd.f32 %v5045_v17, %v4804_v12 }
 0x73a   : > { %v5105_v26 = vadd.f32 %v5097_v25, %v5091_v36 }
 0x73c   : > { %v4644_v32 = vpop.f32.mrf.mxu0  ;;  %v4663_v43 = vpop.f32.mrf.mxu1  ;;  %v5113_v34 = vmax.f32 %v5105_v26, 0.0  ;;  %v8217_v26 = vld [vmem:[%s11709_s12 + $0x28] sm:$0xff] }
 0x73d   : > { %v5027_v48 = vpop.f32.mrf.mxu2  ;;  %v5046_v19 = vpop.f32.mrf.mxu3  ;;  %v4664_v53 = vadd.f32 %v4663_v43, %v4644_v32  ;;  %v8243_v32 = vld [vmem:[%s11709_s12 + $0xf8] sm:$0xff] }
 0x73e   : > { %v5047_v52 = vadd.f32 %v5046_v19, %v5027_v48  ;;  %v8219_v43 = vld [vmem:[%s11709_s12 + $0x38] sm:$0xff] }
 0x73f   : > { %5332 = vmatpush.bf16.msra.mxu0 %v8219_v43 }
 0x740   : > { %v5093_v2 = vadd.f32 %v5047_v52, %v4806_v62  ;;  %v8218_v52 = vld [vmem:[%s11709_s12 + $0x30] sm:$0xff] }
 0x742   : > { %v5107_v55 = vadd.f32 %v5097_v25, %v5093_v2 }
 0x743   : > { %5333 = vmatpush.bf16.msra.mxu0 %v8218_v52  ;;  %v5520_v52 = vld [vmem:[%s11710_s13] sm:$0x3] }
 0x744   : > { %v5115_v38 = vmax.f32 %v5107_v55, 0.0  ;;  %v4817_v18 = vpop.f32.mrf.mxu0  ;;  %v4836_v58 = vpop.f32.mrf.mxu1  ;;  %v8216_v55 = vld [vmem:[%s11709_s12 + $0x20] sm:$0xff] }
 0x745   : > { %v4818_v14 = vadd.f32 %v4817_v18, %v11400_v40  ;;  %v8227_v18 = vld [vmem:[%s11709_s12 + $0x78] sm:$0xff] }
 0x746   : > { %v5119_v1 = vpack.c.bf16 %v5115_v38, %v5113_v34  ;;  %v8215_v34 = vld [vmem:[%s11709_s12 + $0x18] sm:$0xff]  ;;  %v8242_v38 = vld [vmem:[%s11709_s12 + $0xf0] sm:$0xff]  ;;  %5346 = vmatpush.bf16.msra.mxu1 %v8227_v18  ;;  %v8265_v18 = vld [vmem:[%s11711_s14 + $0xa8] sm:$0xff] }
 0x747   : > { %v4837_v35 = vadd.f32 %v4836_v58, %v4818_v14  ;;  %5334 = vmatpush.bf16.msra.mxu0 %v8217_v26  ;;  %v8241_v58 = vld [vmem:[%s11709_s12 + $0xe8] sm:$0xff]  ;;  %v8267_v26 = vld [vmem:[%s11711_s14 + $0xb8] sm:$0xff] }
 0x748   : > { %5137 = vmatpush.bf16.msrb.mxu2 %v5119_v1 }
 0x74b   : > { %5335 = vmatpush.bf16.msra.mxu0 %v8216_v55  ;;  %v8255_v55 = vld [vmem:[%s11711_s14 + $0x58] sm:$0xff] }
 0x74c   : > { %v4819_v49 = vpop.f32.mrf.mxu0  ;;  %v4838_v23 = vpop.f32.mrf.mxu1  ;;  %5138 = vmatpush.bf16.msrb.mxu2 %v5117_v41 }
 0x74d   : > { %v4820_v13 = vadd.f32 %v4819_v49, %v11402_v47  ;;  %v8213_v49 = vld [vmem:[%s11709_s12 + $0x8] sm:$0xff] }
 0x74f   : > { %7573 = vmatmul.msk.bf16.vlgmr.msrb.gmra.mxu2 %vm4585_vm0, %v8210_v59  ;;  %v4839_v45 = vadd.f32 %v4838_v23, %v4820_v13  ;;  %5336 = vmatpush.bf16.msra.mxu0 %v8215_v34  ;;  %v8226_v23 = vld [vmem:[%s11709_s12 + $0x70] sm:$0xff] }
 0x750   : > { %5176 = vmatpush.bf16.msra.mxu2 %v5119_v1  ;;  %v8230_v1 = vld [vmem:[%s11709_s12 + $0x90] sm:$0xff]  ;;  %5347 = vmatpush.bf16.msra.mxu1 %v8226_v23  ;;  %v8272_v23 = vld [vmem:[%s11711_s14 + $0xe0] sm:$0xff] }
 0x751   : > { %v8238_v13 = vld [vmem:[%s11709_s12 + $0xd0] sm:$0xff] }
 0x752   : > { %v8274_v34 = vld [vmem:[%s11711_s14 + $0xf0] sm:$0xff] }
 0x753   : > { %5337 = vmatpush.bf16.msra.mxu0 %v8214_v11  ;;  %v8254_v11 = vld [vmem:[%s11711_s14 + $0x50] sm:$0xff] }
 0x754   : > { %5177 = vmatpush.bf16.msra.mxu2 %v5117_v41  ;;  %v4822_v44 = vpop.f32.mrf.mxu0  ;;  %v4841_v8 = vpop.f32.mrf.mxu1  ;;  %v8229_v41 = vld [vmem:[%s11709_s12 + $0x88] sm:$0xff] }
 0x755   : > { %v4823_v47 = vadd.f32 %v4822_v44, %v11404_v9  ;;  %v8240_v44 = vld [vmem:[%s11709_s12 + $0xe0] sm:$0xff] }
 0x757   : > { %v4842_v17 = vadd.f32 %v4841_v8, %v4823_v47  ;;  %5338 = vmatpush.bf16.msra.mxu0 %v8213_v49  ;;  %v8225_v8 = vld [vmem:[%s11709_s12 + $0x68] sm:$0xff] }
 0x758   : > { %5489 = vmatpush.bf16.msrb.mxu2 %v8235_v28  ;;  %5348 = vmatpush.bf16.msra.mxu1 %v8225_v8  ;;  %v8245_v49 = vld [vmem:[%s11711_s14 + $0x8] sm:$0xff]  ;;  %v8263_v8 = vld [vmem:[%s11711_s14 + $0x98] sm:$0xff] }
 0x75c   : > { %v4824_v57 = vpop.f32.mrf.mxu0  ;;  %v4843_v24 = vpop.f32.mrf.mxu1  ;;  %5490 = vmatpush.bf16.msrb.mxu2 %v8234_v10  ;;  %v8256_v10 = vld [vmem:[%s11711_s14 + $0x60] sm:$0xff] }
 0x75d   : > { %v4825_v7 = vadd.f32 %v4824_v57, %v4664_v53  ;;  %v8239_v57 = vld [vmem:[%s11709_s12 + $0xd8] sm:$0xff] }
 0x75f   : > { %7581 = vmatmul.msk.bf16.vlgmr.msra.gmra.mxu2 %vm4585_vm0, %v8211_v37  ;;  %v4844_v54 = vadd.f32 %v4843_v24, %v4825_v7  ;;  %v8250_v7 = vld [vmem:[%s11711_s14 + $0x30] sm:$0xff] }
 0x760   : > { %5491 = vmatpush.bf16.msrb.mxu2 %v8233_v5  ;;  %v7744_v5 = vld [vmem:[%s11710_s13 + $0x2] sm:$0x3] }
 0x764   : > { %v5058_v42 = vpop.f32.mrf.mxu0  ;;  %v5077_v51 = vpop.f32.mrf.mxu1  ;;  %5492 = vmatpush.bf16.msrb.mxu2 %v8232_v30  ;;  %v8247_v30 = vld [vmem:[%s11711_s14 + $0x18] sm:$0xff] }
 0x765   : > { %v5078_v56 = vadd.f32 %v5077_v51, %v5058_v42  ;;  %v8228_v42 = vld [vmem:[%s11709_s12 + $0x80] sm:$0xff] }
 0x766   : > { %v8212_v51 = vld [vmem:[%s11709_s12] sm:$0xff] }
 0x767   : > { %v5088_v46 = vadd.f32 %v5078_v56, %v4837_v35  ;;  %5339 = vmatpush.bf16.msra.mxu0 %v8212_v51  ;;  %v8224_v35 = vld [vmem:[%s11709_s12 + $0x60] sm:$0xff]  ;;  %v8270_v51 = vld [vmem:[%s11711_s14 + $0xd0] sm:$0xff] }
 0x768   : > { %5493 = vmatpush.bf16.msrb.mxu2 %v8231_v4  ;;  %5349 = vmatpush.bf16.msra.mxu1 %v8224_v35  ;;  %v8266_v4 = vld [vmem:[%s11711_s14 + $0xb0] sm:$0xff]  ;;  %v8260_v35 = vld [vmem:[%s11711_s14 + $0x80] sm:$0xff] }
 0x769   : > { %v5102_v22 = vadd.f32 %v5098_v61, %v5088_v46  ;;  %v8223_v46 = vld [vmem:[%s11709_s12 + $0x58] sm:$0xff] }
 0x76b   : > { %v5110_v40 = vmax.f32 %v5102_v22, 0.0  ;;  %v8220_v22 = vld [vmem:[%s11709_s12 + $0x40] sm:$0xff] }
 0x76c   : > { %v5060_v33 = vpop.f32.mrf.mxu0  ;;  %v5079_v20 = vpop.f32.mrf.mxu1  ;;  %5494 = vmatpush.bf16.msrb.mxu2 %v8230_v1  ;;  %5350 = vmatpush.bf16.msra.mxu1 %v8223_v46  ;;  %v7748_v1 = vld [vmem:[%s11710_s13 + $0x6] sm:$0x3]  ;;  %v8279_v46 = vld [vmem:[%s11713_s16 + $0x18] sm:$0xff] }
 0x76d   : > { %v5080_v6 = vadd.f32 %v5079_v20, %v5060_v33  ;;  %v8222_v33 = vld [vmem:[%s11709_s12 + $0x50] sm:$0xff]  ;;  %v8236_v20 = vld [vmem:[%s11709_s12 + $0xc0] sm:$0xff] }
 0x76f   : > { %v5090_v29 = vadd.f32 %v5080_v6, %v4839_v45  ;;  %v8221_v45 = vld [vmem:[%s11709_s12 + $0x48] sm:$0xff] }
 0x770   : > { %5495 = vmatpush.bf16.msrb.mxu2 %v8229_v41  ;;  %5351 = vmatpush.bf16.msra.mxu1 %v8222_v33  ;;  %v8264_v41 = vld [vmem:[%s11711_s14 + $0xa0] sm:$0xff] }
 0x771   : > { %v5104_v16 = vadd.f32 %v5098_v61, %v5090_v29 }
 0x773   : > { %v5112_v31 = vmax.f32 %v5104_v16, 0.0 }
 0x774   : > { %v5063_v27 = vpop.f32.mrf.mxu0  ;;  %v5082_v63 = vpop.f32.mrf.mxu1  ;;  %5496 = vmatpush.bf16.msrb.mxu2 %v8228_v42  ;;  %5352 = vmatpush.bf16.msra.mxu1 %v8221_v45  ;;  %v8262_v42 = vld [vmem:[%s11711_s14 + $0x90] sm:$0xff] }
 0x775   : > { %v5118_v0 = vpack.c.bf16 %v5112_v31, %v5110_v40  ;;  %v5083_v15 = vadd.f32 %v5082_v63, %v5063_v27 }
 0x777   : > { %v5092_v12 = vadd.f32 %v5083_v15, %v4842_v17  ;;  %v8251_v15 = vld [vmem:[%s11711_s14 + $0x38] sm:$0xff] }
 0x778   : > { %5353 = vmatpush.bf16.msra.mxu1 %v8220_v22  ;;  %v8259_v17 = vld [vmem:[%s11711_s14 + $0x78] sm:$0xff]  ;;  %5855 = vmatpush.bf16.msra.mxu2 %v8251_v15  ;;  %v8282_v15 = vld [vmem:[%s11715_s18 + $0x10] sm:$0xff] }
 0x779   : > { %v5106_v36 = vadd.f32 %v5098_v61, %v5092_v12  ;;  %v8258_v12 = vld [vmem:[%s11711_s14 + $0x70] sm:$0xff] }
 0x77b   : > { %v5114_v19 = vmax.f32 %v5106_v36, 0.0  ;;  %v8249_v36 = vld [vmem:[%s11711_s14 + $0x28] sm:$0xff] }
 0x77c   : > { %v5065_v3 = vpop.f32.mrf.mxu0  ;;  %v5084_v50 = vpop.f32.mrf.mxu1  ;;  %5856 = vmatpush.bf16.msra.mxu2 %v8250_v7 }
 0x77d   : > { %v5085_v60 = vadd.f32 %v5084_v50, %v5065_v3 }
 0x77f   : > { %v5094_v39 = vadd.f32 %v5085_v60, %v4844_v54 }
 0x780   : > { %5857 = vmatpush.bf16.msra.mxu2 %v8249_v36 }
 0x781   : > { %v5108_v48 = vadd.f32 %v5098_v61, %v5094_v39  ;;  %v8237_v61 = vld [vmem:[%s11709_s12 + $0xc8] sm:$0xff] }
 0x782   : > { %v8257_v39 = vld [vmem:[%s11711_s14 + $0x68] sm:$0xff] }
 0x783   : > { %v5116_v9 = vmax.f32 %v5108_v48, 0.0 }
 0x785   : > { %v5120_v62 = vpack.c.bf16 %v5116_v9, %v5114_v19 }
 0x787   : > { %5151 = vmatpush.bf16.msrb.mxu3 %v5120_v62 }
 0x78b   : > { %5152 = vmatpush.bf16.msrb.mxu3 %v5118_v0 }
 0x78e   : > { %7574 = vmatmul.msk.bf16.vlgmr.msrb.gmra.mxu3 %vm4585_vm0, %v8210_v59 }
 0x78f   : > { %5190 = vmatpush.bf16.msra.mxu3 %v5120_v62 }
 0x793   : > { %5191 = vmatpush.bf16.msra.mxu3 %v5118_v0 }
 0x797   : > { %5503 = vmatpush.bf16.msrb.mxu3 %v8243_v32 }
 0x79b   : > { %5504 = vmatpush.bf16.msrb.mxu3 %v8242_v38  ;;  %v8246_v38 = vld [vmem:[%s11711_s14 + $0x10] sm:$0xff] }
 0x79e   : > { %7582 = vmatmul.msk.bf16.vlgmr.msra.gmra.mxu3 %vm4585_vm0, %v8211_v37 }
 0x79f   : > { %5505 = vmatpush.bf16.msrb.mxu3 %v8241_v58  ;;  %v8273_v58 = vld [vmem:[%s11711_s14 + $0xe8] sm:$0xff] }
 0x7a3   : > { %5506 = vmatpush.bf16.msrb.mxu3 %v8240_v44  ;;  %v8253_v44 = vld [vmem:[%s11711_s14 + $0x48] sm:$0xff] }
 0x7a7   : > { %5507 = vmatpush.bf16.msrb.mxu3 %v8239_v57  ;;  %v8244_v57 = vld [vmem:[%s11711_s14] sm:$0xff] }
 0x7ab   : > { %5508 = vmatpush.bf16.msrb.mxu3 %v8238_v13  ;;  %v8268_v13 = vld [vmem:[%s11711_s14 + $0xc0] sm:$0xff] }
 0x7af   : > { %5509 = vmatpush.bf16.msrb.mxu3 %v8237_v61 }
 0x7b3   : > { %5510 = vmatpush.bf16.msrb.mxu3 %v8236_v20 }
 0x7b7   : > { %5868 = vmatpush.bf16.msra.mxu3 %v8259_v17 }
 0x7bb   : > { %5869 = vmatpush.bf16.msra.mxu3 %v8258_v12  ;;  %v8339_v12 = vld [vmem:[%s11712_s15] ss:$0 sm:$0xff] }
 0x7bf   : > { %5870 = vmatpush.bf16.msra.mxu3 %v8257_v39 }
 0x7c3   : > { %5871 = vmatpush.bf16.msra.mxu3 %v8256_v10  ;;  %v8340_v10 = vld [vmem:[%s11714_s17] ss:$0 sm:$0xff] }
 0x7c7   : > { %5872 = vmatpush.bf16.msra.mxu3 %v8255_v55  ;;  %v8341_v55 = vld [vmem:[%s11776_s30] ss:$0 sm:$0xff] }
 0x7cb   : > { %5873 = vmatpush.bf16.msra.mxu3 %v8254_v11 }
 0x7cf   : > { %5874 = vmatpush.bf16.msra.mxu3 %v8253_v44 }
 0x7d2   : > { %v5140_v25 = vpop.f32.mrf.mxu2 }
 0x7da   : > { %v5142_v2 = vpop.f32.mrf.mxu2 }
 0x7e2   : > { %v5179_v21 = vpop.f32.mrf.mxu2 }
 0x7e3   : > { %v5198_v24 = vmax.f32 %v5140_v25, %v5179_v21  ;;  %v8248_v25 = vld [vmem:[%s11711_s14 + $0x20] sm:$0xff] }
 0x7e4   : > { %5858 = vmatpush.bf16.msra.mxu2 %v8248_v25  ;;  %v7746_v21 = vld [vmem:[%s11710_s13 + $0x4] sm:$0x3] }
 0x7e5   : > { %v8280_v25 = vld [vmem:[%s11715_s18] sm:$0xff] }
 0x7e8   : > { %5859 = vmatpush.bf16.msra.mxu2 %v8247_v30 }
 0x7ea   : > { %v5181_v59 = vpop.f32.mrf.mxu2 }
 0x7eb   : > { %v5200_v14 = vmax.f32 %v5142_v2, %v5181_v59  ;;  %v8275_v2 = vld [vmem:[%s11711_s14 + $0xf8] sm:$0xff]  ;;  %v8252_v59 = vld [vmem:[%s11711_s14 + $0x40] sm:$0xff] }
 0x7ec   : > { %5860 = vmatpush.bf16.msra.mxu2 %v8246_v38  ;;  %5875 = vmatpush.bf16.msra.mxu3 %v8252_v59 }
 0x7ed   : > { %v5202_v56 = vpack.c.bf16 %v5200_v14, %v5198_v24  ;;  %v8271_v24 = vld [vmem:[%s11711_s14 + $0xd8] sm:$0xff]  ;;  %v8261_v14 = vld [vmem:[%s11711_s14 + $0x88] sm:$0xff] }
 0x7ef   : > { %5497 = vmatmul.bf16.vlgmr.msrb.gmra.mxu2 %v5202_v56  ;;  %5340 = vmatmul.bf16.vlgmr.msra.gmra.mxu0 %v5202_v56  ;;  %v8269_v56 = vld [vmem:[%s11711_s14 + $0xc8] sm:$0xff] }
 0x7f0   : > { %5861 = vmatpush.bf16.msra.mxu2 %v8245_v49 }
 0x7f4   : > { %5862 = vmatpush.bf16.msra.mxu2 %v8244_v57 }
 0x7f8   : > { %5952 = vmatpush.bf16.msrb.mxu2 %v8279_v46 }
 0x811   : > { %v5154_v6 = vpop.f32.mrf.mxu3 }
 0x819   : > { %v5156_v29 = vpop.f32.mrf.mxu3 }
 0x821   : > { %v5193_v37 = vpop.f32.mrf.mxu3 }
 0x822   : > { %v5199_v40 = vmax.f32 %v5154_v6, %v5193_v37 }
 0x829   : > { %v5195_v16 = vpop.f32.mrf.mxu3 }
 0x82a   : > { %v5201_v31 = vmax.f32 %v5156_v29, %v5195_v16 }
 0x82c   : > { %v5203_v27 = vpack.c.bf16 %v5201_v31, %v5199_v40 }
 0x82e   : > { %5511 = vmatmul.bf16.vlgmr.msrb.gmra.mxu3 %v5203_v27  ;;  %5354 = vmatmul.bf16.vlgmr.msra.gmra.mxu1 %v5203_v27 }
 0x86c   : > { %v5341_v47 = vpop.f32.mrf.mxu0 }
 0x872   : > { %v5498_v0 = vpop.f32.mrf.mxu2 }
 0x874   : > { %v5343_v54 = vpop.f32.mrf.mxu0 }
 0x87a   : > { %v5500_v60 = vpop.f32.mrf.mxu2 }
 0x8ab   : > { %v5355_v63 = vpop.f32.mrf.mxu1 }
 0x8ac   : > { %v5356_v48 = vadd.f32 %v5355_v63, %v5341_v47  ;;  %v8278_v63 = vld [vmem:[%s11713_s16 + $0x10] sm:$0xff]  ;;  %v8277_v47 = vld [vmem:[%s11713_s16 + $0x8] sm:$0xff] }
 0x8ad   : > { %5953 = vmatpush.bf16.msrb.mxu2 %v8278_v63 }
 0x8b1   : > { %v5512_v53 = vpop.f32.mrf.mxu3  ;;  %5954 = vmatpush.bf16.msrb.mxu2 %v8277_v47 }
 0x8b2   : > { %v5513_v50 = vadd.f32 %v5512_v53, %v5498_v0  ;;  %v8276_v0 = vld [vmem:[%s11713_s16] sm:$0xff]  ;;  %v8283_v53 = vld [vmem:[%s11715_s18 + $0x18] sm:$0xff] }
 0x8b3   : > { %v5357_v3 = vpop.f32.mrf.mxu1  ;;  %6006 = vmatpush.bf16.msrb.mxu3 %v8283_v53 }
 0x8b4   : > { %v5358_v19 = vadd.f32 %v5357_v3, %v5343_v54  ;;  %v5517_v62 = vmax.f32 %v5356_v48, %v5513_v50 }
 0x8b5   : > { %5955 = vmatpush.bf16.msrb.mxu2 %v8276_v0 }
 0x8b7   : > { %6007 = vmatpush.bf16.msrb.mxu3 %v8282_v15 }
 0x8b9   : > { %v5514_v28 = vpop.f32.mrf.mxu3 }
 0x8ba   : > { %v5515_v9 = vadd.f32 %v5514_v28, %v5500_v60 }
 0x8bc   : > { %v5518_v32 = vmax.f32 %v5358_v19, %v5515_v9 }
 0x8be   : > { %v5519_v43 = vpack.c.bf16 %v5518_v32, %v5517_v62 }
 0x8c0   : > { %5531 = vmatpush.bf16.msrb.mxu0 %v5519_v43  ;;  %5549 = vmatpush.bf16.msrb.mxu1 %v5519_v43 }
 0x8c3   : > { %7743 = vmatmul.msk.bf16.vlgmr.msrb.gmra.mxu0 %vm2848_vm7, %v5520_v52  ;;  %7745 = vmatmul.msk.bf16.vlgmr.msrb.gmra.mxu1 %vm2848_vm7, %v7744_v5 }
 0x8c4   : > { %5567 = vmatpush.bf16.msra.mxu0 %v5519_v43  ;;  %5585 = vmatpush.bf16.msra.mxu1 %v5519_v43  ;;  %v8281_v43 = vld [vmem:[%s11715_s18 + $0x8] sm:$0xff] }
 0x8c5   : > { %6008 = vmatpush.bf16.msrb.mxu3 %v8281_v43 }
 0x8c8   : > { %5881 = vmatpush.bf16.msrb.mxu0 %v8267_v26  ;;  %5894 = vmatpush.bf16.msrb.mxu1 %v8275_v2 }
 0x8c9   : > { %6009 = vmatpush.bf16.msrb.mxu3 %v8280_v25 }
 0x8cc   : > { %5882 = vmatpush.bf16.msrb.mxu0 %v8266_v4  ;;  %5895 = vmatpush.bf16.msrb.mxu1 %v8274_v34 }
 0x8d0   : > { %5883 = vmatpush.bf16.msrb.mxu0 %v8265_v18  ;;  %5896 = vmatpush.bf16.msrb.mxu1 %v8273_v58 }
 0x8d3   : > { %7747 = vmatmul.msk.bf16.vlgmr.msra.gmra.mxu0 %vm2848_vm7, %v7746_v21  ;;  %7749 = vmatmul.msk.bf16.vlgmr.msra.gmra.mxu1 %vm2848_vm7, %v7748_v1 }
 0x8d4   : > { %5884 = vmatpush.bf16.msrb.mxu0 %v8264_v41  ;;  %5897 = vmatpush.bf16.msrb.mxu1 %v8272_v23 }
 0x8d8   : > { %5885 = vmatpush.bf16.msrb.mxu0 %v8263_v8  ;;  %5898 = vmatpush.bf16.msrb.mxu1 %v8271_v24 }
 0x8dc   : > { %5886 = vmatpush.bf16.msrb.mxu0 %v8262_v42  ;;  %5899 = vmatpush.bf16.msrb.mxu1 %v8270_v51 }
 0x8e0   : > { %5887 = vmatpush.bf16.msrb.mxu0 %v8261_v14  ;;  %5900 = vmatpush.bf16.msrb.mxu1 %v8269_v56 }
 0x8e4   : > { %5888 = vmatpush.bf16.msrb.mxu0 %v8260_v35  ;;  %5901 = vmatpush.bf16.msrb.mxu1 %v8268_v13 }
 0x940   : > { %v5533_v61 = vpop.f32.mrf.mxu0  ;;  %v5551_v33 = vpop.f32.mrf.mxu1 }
 0x941   : > { %v5591_v20 = vpack.c.bf16 %v5533_v61, %v5533_v61  ;;  %v5592_v45 = vpack.c.bf16 %v5551_v33, %v5551_v33 }
 0x943   : > { %5863 = vmatmul.bf16.vlgmr.msra.gmra.mxu2 %v5591_v20  ;;  %5876 = vmatmul.bf16.vlgmr.msra.gmra.mxu3 %v5592_v45 }
 0x948   : > { %v5535_v6 = vpop.f32.mrf.mxu0  ;;  %v5553_v22 = vpop.f32.mrf.mxu1 }
 0x950   : > { %v5569_v29 = vpop.f32.mrf.mxu0  ;;  %v5587_v37 = vpop.f32.mrf.mxu1 }
 0x951   : > { %v5593_v16 = vpack.c.bf16 %v5569_v29, %v5569_v29  ;;  %v5594_v40 = vpack.c.bf16 %v5587_v37, %v5587_v37 }
 0x953   : > { %5889 = vmatmul.bf16.vlgmr.msrb.gmra.mxu0 %v5593_v16  ;;  %5902 = vmatmul.bf16.vlgmr.msrb.gmra.mxu1 %v5594_v40 }
 0x958   : > { %v5571_v31 = vpop.f32.mrf.mxu0  ;;  %v5589_v27 = vpop.f32.mrf.mxu1 }
 0x9c6   : > { %v5864_v17 = vpop.f32.mrf.mxu2  ;;  %v5877_v7 = vpop.f32.mrf.mxu3 }
 0x9c7   : > { %v5865_v3 = vadd.f32 %v8339_v12, %v5864_v17 }
 0x9c9   : > { %v5878_v60 = vadd.f32 %v5877_v7, %v5865_v3 }
 0x9ce   : > { %v5866_v50 = vpop.f32.mrf.mxu2  ;;  %v5879_v54 = vpop.f32.mrf.mxu3 }
 0x9d0   : > { %v5890_v28 = vpop.f32.mrf.mxu0  ;;  %v5903_v36 = vpop.f32.mrf.mxu1 }
 0x9d1   : > { %v5891_v39 = vadd.f32 %v5890_v28, %v5878_v60 }
 0x9d3   : > { %v5904_v48 = vadd.f32 %v5903_v36, %v5891_v39 }
 0x9d5   : > { %v5907_v19 = vmax.f32 %v5904_v48, 0.0 }
 0x9d7   : > { %v5908_v9 = vpack.c.bf16 %v5907_v19, %v5907_v19 }
 0x9d8   : > { %v5892_v62 = vpop.f32.mrf.mxu0  ;;  %v5905_v32 = vpop.f32.mrf.mxu1 }
 0x9d9   : > { %7894 = vmatmul.msk.bf16.vlgmr.msrb.gmra.mxu2 %vm3553_vm13, %v5908_v9 }
 0xa5c   : > { %v5957_v52 = vpop.f32.mrf.mxu2 }
 0xa5d   : > { %v5958_v5 = vadd.f32 %v8340_v10, %v5957_v52 }
 0xa5f   : > { %v5961_v26 = vmax.f32 %v5958_v5, 0.0 }
 0xa61   : > { %v5962_v2 = vpack.c.bf16 %v5961_v26, %v5961_v26 }
 0xa63   : > { %7911 = vmatmul.msk.bf16.vlgmr.msrb.gmra.mxu3 %vm3553_vm13, %v5962_v2 }
 0xa64   : > { %v5959_v30 = vpop.f32.mrf.mxu2 }
 0xae6   : > { %v6011_v4 = vpop.f32.mrf.mxu3 }
 0xae7   : > { %v6012_v34 = vadd.f32 %v8341_v55, %v6011_v4 }
 0xae9   : > { %6016 = vst.msk [vmem:[%s625_s1] sm:$0xf] %vm6015_vm1, %v6012_v34 }
 0xaea   : > { %8375 = shalt.err (!%p8372_p3)
}
 0xaeb   : > { %8300 = dma.vmem_to_hbm [thread:$0]  (%p8554_p5), %s6031_s19, 64, %s6033_s2, %s6018_s4  }
 0xaee   : > { %v6013_v38 = vpop.f32.mrf.mxu3 }
 0xaef PF: > { %s11778_s0 = sld [smem:[#allocation9_spill]] }
 0xaf0   : > { %s11779_s23 = sld [smem:[#allocation7_spill]] }
 0xaf5   : > { %p8306_p4 = scmp.ge.s32.totalorder %s11778_s0, 2 }
 0xaf6   : > { %s6044_s30 = sand.u32 1, %s11779_s23  }
 0xaf7   : > { %p8303_p7 = pnand %p8306_p4, %p8558_p6  ;;  %s6045_s1 = scalar_lea.sflag [#allocation5], %s6044_s30 }
 0xaf9   : > { %p8304_p8 = pneg %p8303_p7 }
 0xafb   : > { %8393 = dma.done.wait (%p8304_p8), %s6045_s1, 64  }
 0xafc   : > { %8395 = vsyncadd (%p8304_p8), %s6045_s1, 4294967232  ;;  %s11781_s24 = sld [smem:[#allocation10_spill]]  ;;  %s11784_s1 = smov %s8402_s22 }
 0xafd   : > { %s11782_s5 = sld [smem:[#allocation8_spill]] }
 0xafe   : > { %s11783_s23 = sld [smem:[#allocation11_spill]] }
 0xb02   : > { %p30_p9 = scmp.ge.s32.totalorder %s11781_s24, 4  }
 0xb03   : > { %s11785_s22 = smov %s11782_s5 }
 0xb04   :  { %32 = sbr.rel (!%p30_p9) target bundleno = 12 (0xc), region = 153 }
 0xb09   :  { %6051 = vsyncpa [#allocation5], 1 }
 0xb0a   :  { %6053 = vsyncpa [#allocation5 + $0x1], 1 }

</bundles_post_ra>
